<compile_context>
chip_gen: v5e
topology: v5e:2x2
jax: 0.10.0
libtpu: 0.0.40
codegen_flags: <defaults>
</compile_context>

<pallas_src>
import functools
import math

import jax
import jax.numpy as jnp
from jax.experimental import pallas as pl
from jax.experimental.pallas import tpu as pltpu

BN_EPS = 1e-5
ACT_DTYPE = jnp.bfloat16


def _round_up(x, m):
    return (x + m - 1) // m * m


# ------------------- per-channel batch statistics (bn1) -------------------- #

def _chan_stats_kernel(x_ref, sum_ref, sq_ref):
    h, w, c = x_ref.shape[1], x_ref.shape[2], x_ref.shape[3]
    x = x_ref[0].astype(jnp.float32).reshape(h * w, c)
    sum_ref[0] = jnp.sum(x, axis=0, keepdims=True)
    sq_ref[0] = jnp.sum(x * x, axis=0, keepdims=True)


def channel_stats(x_nhwc):
    """Per-channel sum / sum-of-squares; one image per (parallel) grid step."""
    n, h, w, c = x_nhwc.shape
    sums, sqs = pl.pallas_call(
        _chan_stats_kernel,
        out_shape=(jax.ShapeDtypeStruct((n, 1, c), jnp.float32),
                   jax.ShapeDtypeStruct((n, 1, c), jnp.float32)),
        grid_spec=pltpu.PrefetchScalarGridSpec(
            num_scalar_prefetch=0,
            grid=(n,),
            in_specs=[pl.BlockSpec((1, h, w, c), lambda i: (i, 0, 0, 0))],
            out_specs=(pl.BlockSpec((1, 1, c), lambda i: (i, 0, 0)),
                       pl.BlockSpec((1, 1, c), lambda i: (i, 0, 0)))),
        compiler_params=pltpu.CompilerParams(
            dimension_semantics=("parallel",)),
    )(x_nhwc)
    return jnp.sum(sums, axis=(0, 1)), jnp.sum(sqs, axis=(0, 1))


def _bn_scale_shift(sum_c, sq_c, count, gamma, beta):
    """Fold training-mode BN into per-channel (scale, shift): y = x*scale+shift."""
    mean = sum_c / count
    var = jnp.maximum(sq_c / count - mean * mean, 0.0)  # cancellation guard
    scale = gamma.astype(jnp.float32) * jax.lax.rsqrt(var + BN_EPS)
    shift = beta.astype(jnp.float32) - mean * scale
    c = sum_c.shape[0]
    return scale.reshape(1, c), shift.reshape(1, c)


# ----------------- fused Bayesian weight sampling + KL ---------------------- #

def _sample_kl_kernel(mu_ref, rho_ref, eps_ref, w_ref, kl_ref, *,
                      log_prior_std, inv_two_var):
    @pl.when(pl.program_id(0) == 0)
    def _():
        kl_ref[...] = jnp.zeros_like(kl_ref)

    mu = mu_ref[...]
    rho = rho_ref[...]
    # Numerically stable softplus: max(x,0) + log1p(exp(-|x|)).
    sigma = jnp.maximum(rho, 0.0) + jnp.log1p(jnp.exp(-jnp.abs(rho)))
    w_ref[...] = (mu + sigma * eps_ref[...]).astype(w_ref.dtype)
    kl = (log_prior_std - jnp.log(sigma)
          + (sigma * sigma + mu * mu) * inv_two_var - 0.5)
    kl_ref[...] += jnp.sum(kl).reshape(1, 1)


def _row_tile(rows, cap=1024):
    if rows <= cap:
        return rows
    for t in range(cap, 7, -1):
        if rows % t == 0 and t % 8 == 0:
            return t
    return rows


def sample_weight_and_kl(mu, rho, eps, prior_std, *, w_dtype=jnp.bfloat16):
    """W = mu + softplus(rho)*eps (bf16) and sum KL(N(mu,s^2) || N(0,prior^2)).

    Weights are kept in HWIO layout (3,3,Cin,Cout) so the conv kernel consumes
    them directly (no per-call transpose).
    """
    shape = mu.shape
    o = shape[-1]
    rows = math.prod(shape[:-1])
    mu2 = mu.reshape(rows, o).astype(jnp.float32)
    rho2 = rho.reshape(rows, o).astype(jnp.float32)
    eps2 = eps.reshape(rows, o).astype(jnp.float32)
    tr = _row_tile(rows)
    grid = (rows // tr,)

    w2, kl = pl.pallas_call(
        functools.partial(
            _sample_kl_kernel,
            log_prior_std=float(math.log(prior_std)),
            inv_two_var=float(1.0 / (2.0 * prior_std * prior_std))),
        out_shape=(jax.ShapeDtypeStruct((rows, o), w_dtype),
                   jax.ShapeDtypeStruct((1, 1), jnp.float32)),
        grid_spec=pltpu.PrefetchScalarGridSpec(
            num_scalar_prefetch=0,
            grid=grid,
            in_specs=[pl.BlockSpec((tr, o), lambda i: (i, 0)),
                      pl.BlockSpec((tr, o), lambda i: (i, 0)),
                      pl.BlockSpec((tr, o), lambda i: (i, 0))],
            out_specs=(pl.BlockSpec((tr, o), lambda i: (i, 0)),
                       pl.BlockSpec((1, 1), lambda i: (0, 0)))),
        compiler_params=pltpu.CompilerParams(
            dimension_semantics=("arbitrary",)),
    )(mu2, rho2, eps2)
    return w2.reshape(shape), kl[0, 0]


# --------------- fused BN+ReLU -> 3x3 conv (+shortcut/residual) ------------- #

def _conv3x3_bn_kernel(*refs, stride, hw_in, has_shortcut, has_residual,
                       emit_padded):
    """One grid step = one image x one output-channel tile.

    The input arrives spatially zero-padded and split into stride x stride
    phase planes, so every one of the 9 taps is a contiguous static slice
    (in-VMEM im2col; nothing is materialized in HBM).
    """
    s = stride
    h_in, w_in = hw_in
    ho = (h_in - 1) // s + 1
    wo = (w_in - 1) // s + 1

    it = iter(refs)
    x_ref = next(it)
    scale_ref = next(it)
    shift_ref = next(it)
    w_ref = next(it)
    ws_ref = next(it) if has_shortcut else None
    r_ref = next(it) if has_residual else None
    o_ref = next(it)
    sum_ref = next(it)
    sq_ref = next(it)
    sc_ref = next(it) if has_shortcut else None
    act_ref = next(it)

    c = x_ref.shape[-1]
    hh, wh = x_ref.shape[3], x_ref.shape[4]
    to = w_ref.shape[-1]

    scale = scale_ref[...].reshape(1, 1, c)
    shift = shift_ref[...].reshape(1, 1, c)

    # Fused BN + ReLU of the input tile (computed once per step).  Positions
    # belonging to the conv's zero padding are left at exactly 0.
    for pi in range(s):
        for pj in range(s):
            act_ref[pi, pj] = jnp.zeros((hh, wh, c), act_ref.dtype)
            a_lo = 0 if pi >= 1 else 1
            b_lo = 0 if pj >= 1 else 1
            a_hi = min(hh - 1, (h_in - pi) // s)
            b_hi = min(wh - 1, (w_in - pj) // s)
            xv = x_ref[0, pi, pj, a_lo:a_hi + 1, b_lo:b_hi + 1, :]
            act = jnp.maximum(xv.astype(jnp.float32) * scale + shift, 0.0)
            act_ref[pi, pj, a_lo:a_hi + 1, b_lo:b_hi + 1, :] = (
                act.astype(act_ref.dtype))

    # 9 accumulating MXU matmuls: tap (di, dj) reads phase plane
    # (di % s, dj % s), rows di//s .. di//s + ho - 1 (contiguous slice).
    acc = jnp.zeros((ho * wo, to), jnp.float32)
    for di in range(3):
        for dj in range(3):
            a = act_ref[di % s, dj % s,
                        di // s: di // s + ho,
                        dj // s: dj // s + wo, :]
            acc = acc + jnp.dot(a.reshape(ho * wo, c), w_ref[di, dj],
                                preferred_element_type=jnp.float32)

    # Per-image channel sums of the conv output (consumer BN statistics),
    # computed before the residual add.
    sum_ref[0] = jnp.sum(acc, axis=0, keepdims=True)
    sq_ref[0] = jnp.sum(acc * acc, axis=0, keepdims=True)

    if has_residual:
        acc = acc + r_ref[0].reshape(ho * wo, to).astype(jnp.float32)

    out3 = acc.reshape(ho, wo, to)
    if emit_padded:
        # Emit already spatially padded (zero halo) so the next fused conv can
        # consume it directly with no XLA pad pass in between.
        o_ref[0, 0, 0] = jnp.zeros((ho + 2, wo + 2, to), o_ref.dtype)
        o_ref[0, 0, 0, 1:ho + 1, 1:wo + 1, :] = out3.astype(o_ref.dtype)
    else:
        o_ref[0] = out3.astype(o_ref.dtype)

    if has_shortcut:
        # Fused 1x1 convShortcut over the same activated input; stride handled
        # by reading phase plane (1 % s, 1 % s).
        p0, r0 = 1 % s, 1 // s
        a_sc = act_ref[p0, p0, r0:r0 + ho, r0:r0 + wo, :].reshape(ho * wo, c)
        sc = jnp.dot(a_sc, ws_ref[...], preferred_element_type=jnp.float32)
        sc_ref[0] = sc.reshape(ho, wo, to).astype(sc_ref.dtype)


def conv3x3_bn(x_phase, scale, shift, w, *, stride, hw_in, out_planes,
               residual=None, shortcut_w=None, emit_padded=False,
               out_dtype=jnp.float32):
    """Fused relu(bn(x)) -> conv3x3 (pad 1, `stride`), optional fused 1x1
    shortcut conv and fused residual add.  Also returns per-image channel
    sum / sum-of-squares of the conv output (for the next BatchNorm)."""
    n = x_phase.shape[0]
    s = stride
    assert x_phase.shape[1] == s and x_phase.shape[2] == s
    hh, wh, c = x_phase.shape[3], x_phase.shape[4], x_phase.shape[5]
    h_in, w_in = hw_in
    ho = (h_in - 1) // s + 1
    wo = (w_in - 1) // s + 1
    o = out_planes

    # Output-channel tile: whole O unless it is large and 128-divisible
    # (bounds per-step VMEM for wide WRN layers, keeps >=2 parallel tiles).
    if o > 256 and o % 128 == 0:
        to = 256 if o % 256 == 0 else 128
    else:
        to = o
    grid = (n, o // to)

    in_specs = [
        pl.BlockSpec((1, s, s, hh, wh, c), lambda i, j: (i, 0, 0, 0, 0, 0)),
        pl.BlockSpec((1, c), lambda i, j: (0, 0)),
        pl.BlockSpec((1, c), lambda i, j: (0, 0)),
        pl.BlockSpec((3, 3, c, to), lambda i, j: (0, 0, 0, j)),
    ]
    operands = [x_phase, scale, shift, w]
    if shortcut_w is not None:
        in_specs.append(pl.BlockSpec((c, to), lambda i, j: (0, j)))
        operands.append(shortcut_w)
    if residual is not None:
        in_specs.append(pl.BlockSpec((1, ho, wo, to), lambda i, j: (i, 0, 0, j)))
        operands.append(residual)

    if emit_padded:
        out_shapes = [jax.ShapeDtypeStruct((n, 1, 1, ho + 2, wo + 2, o),
                                           out_dtype)]
        out_specs = [pl.BlockSpec((1, 1, 1, ho + 2, wo + 2, to),
                                  lambda i, j: (i, 0, 0, 0, 0, j))]
    else:
        out_shapes = [jax.ShapeDtypeStruct((n, ho, wo, o), out_dtype)]
        out_specs = [pl.BlockSpec((1, ho, wo, to), lambda i, j: (i, 0, 0, j))]
    out_shapes += [jax.ShapeDtypeStruct((n, 1, o), jnp.float32),
                   jax.ShapeDtypeStruct((n, 1, o), jnp.float32)]
    out_specs += [pl.BlockSpec((1, 1, to), lambda i, j: (i, 0, j)),
                  pl.BlockSpec((1, 1, to), lambda i, j: (i, 0, j))]
    if shortcut_w is not None:
        out_shapes.append(jax.ShapeDtypeStruct((n, ho, wo, o), jnp.bfloat16))
        out_specs.append(pl.BlockSpec((1, ho, wo, to),
                                      lambda i, j: (i, 0, 0, j)))

    kernel = functools.partial(
        _conv3x3_bn_kernel, stride=s, hw_in=hw_in,
        has_shortcut=shortcut_w is not None,
        has_residual=residual is not None,
        emit_padded=emit_padded)

    return pl.pallas_call(
        kernel,
        out_shape=tuple(out_shapes),
        grid_spec=pltpu.PrefetchScalarGridSpec(
            num_scalar_prefetch=0,
            grid=grid,
            in_specs=in_specs,
            out_specs=tuple(out_specs),
            scratch_shapes=[pltpu.VMEM((s, s, hh, wh, c), ACT_DTYPE)]),
        compiler_params=pltpu.CompilerParams(
            dimension_semantics=("parallel", "parallel")),
    )(*operands)


# ------------------------------- conv glue ---------------------------------- #

def _phase_pad(x_nhwc, stride):
    """Zero-pad spatially by 1 and split into stride x stride phase planes so
    every 3x3 tap is a contiguous slice in the conv kernel (space-to-depth for
    stride 2; a plain pad + reshape for stride 1)."""
    n, h, w, c = x_nhwc.shape
    s = stride
    hp = _round_up(h + 2, s)
    wp = _round_up(w + 2, s)
    xp = jnp.pad(x_nhwc, ((0, 0), (1, hp - h - 1), (1, wp - w - 1), (0, 0)))
    if s == 1:
        return xp.reshape(n, 1, 1, hp, wp, c)
    xp = xp.reshape(n, hp // s, s, wp // s, s, c)
    return jnp.transpose(xp, (0, 2, 4, 1, 3, 5))   # (n, s, s, hp/s, wp/s, c)


# --------------------------- BasicBlock forward ------------------------------ #

def init_params(key, in_planes, out_planes):
    # NOTE: conv weights are stored in HWIO layout (3, 3, Cin, Cout); the
    # PyTorch (Cout, Cin, 3, 3) layout would need a one-time transpose when
    # porting checkpoints.  Shortcut weight is stored (Cin, Cout).
    ks = jax.random.split(key, 7)
    s1 = (3, 3, in_planes, out_planes)
    s2 = (3, 3, out_planes, out_planes)
    p = {
        "bn1_gamma": jnp.ones((in_planes,), jnp.float32),
        "bn1_beta": jnp.zeros((in_planes,), jnp.float32),
        "bn2_gamma": jnp.ones((out_planes,), jnp.float32),
        "bn2_beta": jnp.zeros((out_planes,), jnp.float32),
        "conv1_mu": 0.1 * jax.random.normal(ks[0], s1, jnp.float32),
        "conv1_rho": -3.0 + 0.1 * jax.random.normal(ks[1], s1, jnp.float32),
        "conv1_eps": jax.random.normal(ks[2], s1, jnp.float32),
        "conv2_mu": 0.1 * jax.random.normal(ks[3], s2, jnp.float32),
        "conv2_rho": -3.0 + 0.1 * jax.random.normal(ks[4], s2, jnp.float32),
        "conv2_eps": jax.random.normal(ks[5], s2, jnp.float32),
    }
    if in_planes != out_planes:
        p["shortcut_w"] = 0.1 * jax.random.normal(
            ks[6], (in_planes, out_planes), jnp.float32)
    return p


def basic_block_forward(params, x_nchw, stride, var0=1.0):
    """Forward of the Bayesian WRN BasicBlock (training-mode BN, reparam conv
    weights).  Returns (NCHW output, total KL)."""
    prior_std = float(var0) ** 0.5
    in_planes = x_nchw.shape[1]
    out_planes = params["conv1_mu"].shape[-1]
    equal_in_out = in_planes == out_planes
    if equal_in_out:
        assert stride == 1, "identity residual path requires stride == 1"

    n, _, h, w = x_nchw.shape
    ho = (h - 1) // stride + 1
    wo = (w - 1) // stride + 1

    x = jnp.transpose(x_nchw, (0, 2, 3, 1)).astype(jnp.float32)   # NHWC

    # bn1 batch statistics (biased, training-mode).
    s1, q1 = channel_stats(x)
    scale1, shift1 = _bn_scale_shift(s1, q1, float(n * h * w),
                                     params["bn1_gamma"], params["bn1_beta"])

    # Bayesian weight sampling + KL (one fused pass over mu/rho/eps each).
    w1, kl1 = sample_weight_and_kl(params["conv1_mu"], params["conv1_rho"],
                                   params["conv1_eps"], prior_std)
    w2, kl2 = sample_weight_and_kl(params["conv2_mu"], params["conv2_rho"],
                                   params["conv2_eps"], prior_std)

    x_ph = _phase_pad(x, stride)
    sc_w = None if equal_in_out else params["shortcut_w"].astype(jnp.bfloat16)

    # conv1: fused bn1+relu1 -> 3x3 conv (stride) [+ fused 1x1 shortcut conv].
    # Emits a spatially padded bf16 output (conv2's input, no XLA pad pass)
    # and per-image channel sums for bn2 (no extra stats read of the output).
    res1 = conv3x3_bn(x_ph, scale1, shift1, w1, stride=stride, hw_in=(h, w),
                      out_planes=out_planes, shortcut_w=sc_w,
                      emit_padded=True, out_dtype=jnp.bfloat16)
    if equal_in_out:
        h1_pad, s2, q2 = res1
        residual = x                      # identity residual (original input)
    else:
        h1_pad, s2, q2, residual = res1   # 1x1-conv shortcut of relu(bn1(x))

    scale2, shift2 = _bn_scale_shift(jnp.sum(s2, axis=(0, 1)),
                                     jnp.sum(q2, axis=(0, 1)),
                                     float(n * ho * wo),
                                     params["bn2_gamma"], params["bn2_beta"])

    # conv2: fused bn2+relu2 -> 3x3 conv (stride 1) + fused residual add.
    out, _, _ = conv3x3_bn(h1_pad, scale2, shift2, w2, stride=1,
                           hw_in=(ho, wo), out_planes=out_planes,
                           residual=residual, emit_padded=False,
                           out_dtype=jnp.float32)

    return jnp.transpose(out, (0, 3, 1, 2)), kl1 + kl2


if __name__ == "__main__":
    key = jax.random.PRNGKey(0)
    k_x, k_p1, k_p2 = jax.random.split(key, 3)

    # Case 1: in_planes != out_planes -> 1x1 convShortcut path, stride 2.
    x1 = jax.random.normal(k_x, (2, 4, 16, 16), jnp.float32)
    p1 = init_params(k_p1, in_planes=4, out_planes=8)
    fwd_s2 = jax.jit(lambda p, x: basic_block_forward(p, x, stride=2, var0=1.0))
    y1, kl_1 = fwd_s2(p1, x1)
    jax.block_until_ready((y1, kl_1))
    assert y1.shape == (2, 8, 8, 8)
    assert kl_1.shape == ()
    assert bool(jnp.isfinite(y1).all()) and bool(jnp.isfinite(kl_1))

    # Case 2: in_planes == out_planes -> identity residual path, stride 1.
    x2 = jax.random.normal(jax.random.fold_in(k_x, 1), (2, 8, 16, 16),
                           jnp.float32)
    p2 = init_params(k_p2, in_planes=8, out_planes=8)
    fwd_s1 = jax.jit(lambda p, x: basic_block_forward(p, x, stride=1, var0=1.0))
    y2, kl_2 = fwd_s1(p2, x2)
    jax.block_until_ready((y2, kl_2))
    assert y2.shape == (2, 8, 16, 16)
    assert bool(jnp.isfinite(y2).all())

    print("KERNEL_OK")
</pallas_src>

<mosaic_0001>
module attributes {stable_mosaic.version = 11 : i64} {
  func.func @_chan_stats_kernel(%arg0: i32, %arg1: memref<1x16x16x4xf32, #tpu.memory_space<vmem>>, %arg2: memref<1x1x4xf32, #tpu.memory_space<vmem>>, %arg3: memref<1x1x4xf32, #tpu.memory_space<vmem>>) attributes {dimension_semantics = [#tpu.dimension_semantics<parallel>], iteration_bounds = array<i64: 2>, scalar_prefetch = 0 : i64, scratch_operands = 0 : i64, tpu.core_type = #tpu.core_type<tc>, window_params = [{transform_indices = @transform_0, window_bounds = array<i64: 1, 16, 16, 4>}, {transform_indices = @transform_1, window_bounds = array<i64: 1, 1, 4>}, {transform_indices = @transform_2, window_bounds = array<i64: 1, 1, 4>}]} {
    %c0 = arith.constant 0 : index
    %c0_0 = arith.constant 0 : index
    %c0_1 = arith.constant 0 : index
    %c0_2 = arith.constant 0 : index
    %0 = vector.load %arg1[%c0, %c0_0, %c0_1, %c0_2] : memref<1x16x16x4xf32, #tpu.memory_space<vmem>>, vector<1x16x16x4xf32>
    %1 = vector.shape_cast %0 : vector<1x16x16x4xf32> to vector<16x16x4xf32>
    %2 = vector.shape_cast %1 : vector<16x16x4xf32> to vector<256x4xf32>
    %cst = arith.constant dense<0.000000e+00> : vector<4xf32>
    %3 = vector.multi_reduction <add>, %2, %cst [0] : vector<256x4xf32> to vector<4xf32>
    %4 = vector.shape_cast %3 : vector<4xf32> to vector<1x4xf32>
    %c0_3 = arith.constant 0 : index
    %c0_4 = arith.constant 0 : index
    %c0_5 = arith.constant 0 : index
    %5 = vector.load %arg2[%c0_3, %c0_4, %c0_5] : memref<1x1x4xf32, #tpu.memory_space<vmem>>, vector<1x1x4xf32>
    %6 = vector.shape_cast %5 : vector<1x1x4xf32> to vector<1x4xf32>
    %7 = vector.shape_cast %4 : vector<1x4xf32> to vector<1x1x4xf32>
    tpu.vector_store %arg2[%c0_3, %c0_4, %c0_5], %7 {strides = array<i32>} : memref<1x1x4xf32, #tpu.memory_space<vmem>>, vector<1x1x4xf32>,
    %8 = arith.mulf %2, %2 : vector<256x4xf32>
    %cst_6 = arith.constant dense<0.000000e+00> : vector<4xf32>
    %9 = vector.multi_reduction <add>, %8, %cst_6 [0] : vector<256x4xf32> to vector<4xf32>
    %10 = vector.shape_cast %9 : vector<4xf32> to vector<1x4xf32>
    %c0_7 = arith.constant 0 : index
    %c0_8 = arith.constant 0 : index
    %c0_9 = arith.constant 0 : index
    %11 = vector.load %arg3[%c0_7, %c0_8, %c0_9] : memref<1x1x4xf32, #tpu.memory_space<vmem>>, vector<1x1x4xf32>
    %12 = vector.shape_cast %11 : vector<1x1x4xf32> to vector<1x4xf32>
    %13 = vector.shape_cast %10 : vector<1x4xf32> to vector<1x1x4xf32>
    tpu.vector_store %arg3[%c0_7, %c0_8, %c0_9], %13 {strides = array<i32>} : memref<1x1x4xf32, #tpu.memory_space<vmem>>, vector<1x1x4xf32>,
    return
  }
  func.func @transform_0(%arg0: i32) -> (i32, i32, i32, i32) {
    %c0_i32 = arith.constant 0 : i32
    %c0_i32_0 = arith.constant 0 : i32
    %c0_i32_1 = arith.constant 0 : i32
    %c0_i32_2 = arith.constant 0 : i32
    return %arg0, %c0_i32, %c0_i32_0, %c0_i32_1 : i32, i32, i32, i32
  }
  func.func @transform_1(%arg0: i32) -> (i32, i32, i32) {
    %c0_i32 = arith.constant 0 : i32
    %c0_i32_0 = arith.constant 0 : i32
    %c0_i32_1 = arith.constant 0 : i32
    return %arg0, %c0_i32, %c0_i32_0 : i32, i32, i32
  }
  func.func @transform_2(%arg0: i32) -> (i32, i32, i32) {
    %c0_i32 = arith.constant 0 : i32
    %c0_i32_0 = arith.constant 0 : i32
    %c0_i32_1 = arith.constant 0 : i32
    return %arg0, %c0_i32, %c0_i32_0 : i32, i32, i32
  }
}

module attributes {stable_mosaic.version = 11 : i64} {
  func.func @_sample_kl_kernel(%arg0: i32, %arg1: memref<36x8xf32, #tpu.memory_space<vmem>>, %arg2: memref<36x8xf32, #tpu.memory_space<vmem>>, %arg3: memref<36x8xf32, #tpu.memory_space<vmem>>, %arg4: memref<36x8xbf16, #tpu.memory_space<vmem>>, %arg5: memref<1x1xf32, #tpu.memory_space<vmem>>) attributes {dimension_semantics = [#tpu.dimension_semantics<arbitrary>], iteration_bounds = array<i64: 1>, scalar_prefetch = 0 : i64, scratch_operands = 0 : i64, tpu.core_type = #tpu.core_type<tc>, window_params = [{transform_indices = @transform_0, window_bounds = array<i64: 36, 8>}, {transform_indices = @transform_1, window_bounds = array<i64: 36, 8>}, {transform_indices = @transform_2, window_bounds = array<i64: 36, 8>}, {transform_indices = @transform_3, window_bounds = array<i64: 36, 8>}, {pipeline_mode = #tpu.pipeline_mode<synchronous>, transform_indices = @transform_4, window_bounds = array<i64: 1, 1>}]} {
    %c0_i32 = arith.constant 0 : i32
    %0 = arith.cmpi eq, %arg0, %c0_i32 : i32
    %1 = arith.extui %0 : i1 to i32
    %c0_i32_0 = arith.constant 0 : i32
    %2 = arith.cmpi ne, %1, %c0_i32_0 : i32
    scf.if %2 {
      %cst_17 = arith.constant 0.000000e+00 : f32
      %37 = vector.broadcast %cst_17 : f32 to vector<1x1xf32>
      %c0_18 = arith.constant 0 : index
      %c0_19 = arith.constant 0 : index
      %38 = vector.load %arg5[%c0_18, %c0_19] : memref<1x1xf32, #tpu.memory_space<vmem>>, vector<1x1xf32>
      tpu.vector_store %arg5[%c0_18, %c0_19], %37 {strides = array<i32>} : memref<1x1xf32, #tpu.memory_space<vmem>>, vector<1x1xf32>,
    } else {
    }
    %c0 = arith.constant 0 : index
    %c0_1 = arith.constant 0 : index
    %3 = vector.load %arg1[%c0, %c0_1] : memref<36x8xf32, #tpu.memory_space<vmem>>, vector<36x8xf32>
    %c0_2 = arith.constant 0 : index
    %c0_3 = arith.constant 0 : index
    %4 = vector.load %arg2[%c0_2, %c0_3] : memref<36x8xf32, #tpu.memory_space<vmem>>, vector<36x8xf32>
    %cst = arith.constant 0.000000e+00 : f32
    %5 = vector.broadcast %cst : f32 to vector<36x8xf32>
    %6 = arith.maximumf %4, %5 : vector<36x8xf32>
    %7 = math.absf %4 : vector<36x8xf32>
    %cst_4 = arith.constant 0.000000e+00 : f32
    %8 = vector.broadcast %cst_4 : f32 to vector<36x8xf32>
    %9 = arith.subf %8, %7 : vector<36x8xf32>
    %10 = math.exp %9 : vector<36x8xf32>
    %11 = math.log1p %10 : vector<36x8xf32>
    %12 = arith.addf %6, %11 : vector<36x8xf32>
    %c0_5 = arith.constant 0 : index
    %c0_6 = arith.constant 0 : index
    %13 = vector.load %arg3[%c0_5, %c0_6] : memref<36x8xf32, #tpu.memory_space<vmem>>, vector<36x8xf32>
    %14 = arith.mulf %12, %13 : vector<36x8xf32>
    %15 = arith.addf %3, %14 : vector<36x8xf32>
    %16 = arith.truncf %15 : vector<36x8xf32> to vector<36x8xbf16>
    %c0_7 = arith.constant 0 : index
    %c0_8 = arith.constant 0 : index
    %17 = vector.load %arg4[%c0_7, %c0_8] : memref<36x8xbf16, #tpu.memory_space<vmem>>, vector<36x8xbf16>
    tpu.vector_store %arg4[%c0_7, %c0_8], %16 {strides = array<i32>} : memref<36x8xbf16, #tpu.memory_space<vmem>>, vector<36x8xbf16>,
    %18 = math.log %12 : vector<36x8xf32>
    %cst_9 = arith.constant 0.000000e+00 : f32
    %19 = vector.broadcast %cst_9 : f32 to vector<36x8xf32>
    %20 = arith.subf %19, %18 : vector<36x8xf32>
    %21 = arith.mulf %12, %12 : vector<36x8xf32>
    %22 = arith.mulf %3, %3 : vector<36x8xf32>
    %23 = arith.addf %21, %22 : vector<36x8xf32>
    %cst_10 = arith.constant 5.000000e-01 : f32
    %24 = vector.broadcast %cst_10 : f32 to vector<36x8xf32>
    %25 = arith.mulf %23, %24 : vector<36x8xf32>
    %26 = arith.addf %20, %25 : vector<36x8xf32>
    %cst_11 = arith.constant 5.000000e-01 : f32
    %27 = vector.broadcast %cst_11 : f32 to vector<36x8xf32>
    %28 = arith.subf %26, %27 : vector<36x8xf32>
    %c0_12 = arith.constant 0 : index
    %c0_13 = arith.constant 0 : index
    %29 = vector.load %arg5[%c0_12, %c0_13] : memref<1x1xf32, #tpu.memory_space<vmem>>, vector<1x1xf32>
    %30 = vector.shape_cast %28 : vector<36x8xf32> to vector<1x36x8xf32>
    %cst_14 = arith.constant dense<0.000000e+00> : vector<1xf32>
    %31 = vector.multi_reduction <add>, %30, %cst_14 [1, 2] : vector<1x36x8xf32> to vector<1xf32>
    %32 = vector.shape_cast %31 : vector<1xf32> to vector<1x1x1xf32>
    %33 = vector.extract %32[0, 0, 0] : f32 from vector<1x1x1xf32>
    %34 = vector.broadcast %33 : f32 to vector<1x1xf32>
    %35 = arith.addf %29, %34 : vector<1x1xf32>
    %c0_15 = arith.constant 0 : index
    %c0_16 = arith.constant 0 : index
    %36 = vector.load %arg5[%c0_15, %c0_16] : memref<1x1xf32, #tpu.memory_space<vmem>>, vector<1x1xf32>
    tpu.vector_store %arg5[%c0_15, %c0_16], %35 {strides = array<i32>} : memref<1x1xf32, #tpu.memory_space<vmem>>, vector<1x1xf32>,
    return
  }
  func.func @transform_0(%arg0: i32) -> (i32, i32) {
    %c0_i32 = arith.constant 0 : i32
    %c0_i32_0 = arith.constant 0 : i32
    return %arg0, %c0_i32 : i32, i32
  }
  func.func @transform_1(%arg0: i32) -> (i32, i32) {
    %c0_i32 = arith.constant 0 : i32
    %c0_i32_0 = arith.constant 0 : i32
    return %arg0, %c0_i32 : i32, i32
  }
  func.func @transform_2(%arg0: i32) -> (i32, i32) {
    %c0_i32 = arith.constant 0 : i32
    %c0_i32_0 = arith.constant 0 : i32
    return %arg0, %c0_i32 : i32, i32
  }
  func.func @transform_3(%arg0: i32) -> (i32, i32) {
    %c0_i32 = arith.constant 0 : i32
    %c0_i32_0 = arith.constant 0 : i32
    return %arg0, %c0_i32 : i32, i32
  }
  func.func @transform_4(%arg0: i32) -> (i32, i32) {
    %c0_i32 = arith.constant 0 : i32
    %c0_i32_0 = arith.constant 0 : i32
    %c0_i32_1 = arith.constant 0 : i32
    return %c0_i32, %c0_i32_0 : i32, i32
  }
}

module attributes {stable_mosaic.version = 11 : i64} {
  func.func @_conv3x3_bn_kernel(%arg0: i32, %arg1: i32, %arg2: memref<1x2x2x9x9x4xf32, #tpu.memory_space<vmem>>, %arg3: memref<1x4xf32, #tpu.memory_space<vmem>>, %arg4: memref<1x4xf32, #tpu.memory_space<vmem>>, %arg5: memref<3x3x4x8xbf16, #tpu.memory_space<vmem>>, %arg6: memref<4x8xbf16, #tpu.memory_space<vmem>>, %arg7: memref<1x1x1x10x10x8xbf16, #tpu.memory_space<vmem>>, %arg8: memref<1x1x8xf32, #tpu.memory_space<vmem>>, %arg9: memref<1x1x8xf32, #tpu.memory_space<vmem>>, %arg10: memref<1x8x8x8xbf16, #tpu.memory_space<vmem>>, %arg11: memref<2x2x9x9x4xbf16, #tpu.memory_space<vmem>>) attributes {dimension_semantics = [#tpu.dimension_semantics<parallel>, #tpu.dimension_semantics<parallel>], iteration_bounds = array<i64: 2, 1>, scalar_prefetch = 0 : i64, scratch_operands = 1 : i64, tpu.core_type = #tpu.core_type<tc>, window_params = [{transform_indices = @transform_0, window_bounds = array<i64: 1, 2, 2, 9, 9, 4>}, {pipeline_mode = #tpu.pipeline_mode<synchronous>, transform_indices = @transform_1, window_bounds = array<i64: 1, 4>}, {pipeline_mode = #tpu.pipeline_mode<synchronous>, transform_indices = @transform_2, window_bounds = array<i64: 1, 4>}, {transform_indices = @transform_3, window_bounds = array<i64: 3, 3, 4, 8>}, {transform_indices = @transform_4, window_bounds = array<i64: 4, 8>}, {transform_indices = @transform_5, window_bounds = array<i64: 1, 1, 1, 10, 10, 8>}, {transform_indices = @transform_6, window_bounds = array<i64: 1, 1, 8>}, {transform_indices = @transform_7, window_bounds = array<i64: 1, 1, 8>}, {transform_indices = @transform_8, window_bounds = array<i64: 1, 8, 8, 8>}]} {
    %c0 = arith.constant 0 : index
    %c0_0 = arith.constant 0 : index
    %0 = vector.load %arg3[%c0, %c0_0] : memref<1x4xf32, #tpu.memory_space<vmem>>, vector<1x4xf32>
    %1 = vector.shape_cast %0 : vector<1x4xf32> to vector<1x1x4xf32>
    %c0_1 = arith.constant 0 : index
    %c0_2 = arith.constant 0 : index
    %2 = vector.load %arg4[%c0_1, %c0_2] : memref<1x4xf32, #tpu.memory_space<vmem>>, vector<1x4xf32>
    %3 = vector.shape_cast %2 : vector<1x4xf32> to vector<1x1x4xf32>
    %cst = arith.constant 0.000000e+00 : bf16
    %4 = vector.broadcast %cst : bf16 to vector<9x9x4xbf16>
    %c0_3 = arith.constant 0 : index
    %c0_4 = arith.constant 0 : index
    %c0_5 = arith.constant 0 : index
    %c0_6 = arith.constant 0 : index
    %c0_7 = arith.constant 0 : index
    %5 = vector.load %arg11[%c0_3, %c0_4, %c0_5, %c0_6, %c0_7] : memref<2x2x9x9x4xbf16, #tpu.memory_space<vmem>>, vector<1x1x9x9x4xbf16>
    %6 = vector.shape_cast %5 : vector<1x1x9x9x4xbf16> to vector<9x9x4xbf16>
    %7 = vector.shape_cast %4 : vector<9x9x4xbf16> to vector<1x1x9x9x4xbf16>
    tpu.vector_store %arg11[%c0_3, %c0_4, %c0_5, %c0_6, %c0_7], %7 {strides = array<i32>} : memref<2x2x9x9x4xbf16, #tpu.memory_space<vmem>>, vector<1x1x9x9x4xbf16>,
    %c0_8 = arith.constant 0 : index
    %c0_9 = arith.constant 0 : index
    %c0_10 = arith.constant 0 : index
    %c1 = arith.constant 1 : index
    %c1_11 = arith.constant 1 : index
    %c0_12 = arith.constant 0 : index
    %8 = vector.load %arg2[%c0_8, %c0_9, %c0_10, %c1, %c1_11, %c0_12] : memref<1x2x2x9x9x4xf32, #tpu.memory_space<vmem>>, vector<1x1x1x8x8x4xf32>
    %9 = vector.shape_cast %8 : vector<1x1x1x8x8x4xf32> to vector<8x8x4xf32>
    %10 = vector.broadcast %1 : vector<1x1x4xf32> to vector<8x8x4xf32>
    %11 = arith.mulf %9, %10 : vector<8x8x4xf32>
    %12 = vector.broadcast %3 : vector<1x1x4xf32> to vector<8x8x4xf32>
    %13 = arith.addf %11, %12 : vector<8x8x4xf32>
    %cst_13 = arith.constant 0.000000e+00 : f32
    %14 = vector.broadcast %cst_13 : f32 to vector<8x8x4xf32>
    %15 = arith.maximumf %13, %14 : vector<8x8x4xf32>
    %16 = arith.truncf %15 : vector<8x8x4xf32> to vector<8x8x4xbf16>
    %c0_14 = arith.constant 0 : index
    %c0_15 = arith.constant 0 : index
    %c1_16 = arith.constant 1 : index
    %c1_17 = arith.constant 1 : index
    %c0_18 = arith.constant 0 : index
    %17 = vector.load %arg11[%c0_14, %c0_15, %c1_16, %c1_17, %c0_18] : memref<2x2x9x9x4xbf16, #tpu.memory_space<vmem>>, vector<1x1x8x8x4xbf16>
    %18 = vector.shape_cast %17 : vector<1x1x8x8x4xbf16> to vector<8x8x4xbf16>
    %19 = vector.shape_cast %16 : vector<8x8x4xbf16> to vector<1x1x8x8x4xbf16>
    tpu.vector_store %arg11[%c0_14, %c0_15, %c1_16, %c1_17, %c0_18], %19 {strides = array<i32>} : memref<2x2x9x9x4xbf16, #tpu.memory_space<vmem>>, vector<1x1x8x8x4xbf16>,
    %cst_19 = arith.constant 0.000000e+00 : bf16
    %20 = vector.broadcast %cst_19 : bf16 to vector<9x9x4xbf16>
    %c0_20 = arith.constant 0 : index
    %c1_21 = arith.constant 1 : index
    %c0_22 = arith.constant 0 : index
    %c0_23 = arith.constant 0 : index
    %c0_24 = arith.constant 0 : index
    %21 = vector.load %arg11[%c0_20, %c1_21, %c0_22, %c0_23, %c0_24] : memref<2x2x9x9x4xbf16, #tpu.memory_space<vmem>>, vector<1x1x9x9x4xbf16>
    %22 = vector.shape_cast %21 : vector<1x1x9x9x4xbf16> to vector<9x9x4xbf16>
    %23 = vector.shape_cast %20 : vector<9x9x4xbf16> to vector<1x1x9x9x4xbf16>
    tpu.vector_store %arg11[%c0_20, %c1_21, %c0_22, %c0_23, %c0_24], %23 {strides = array<i32>} : memref<2x2x9x9x4xbf16, #tpu.memory_space<vmem>>, vector<1x1x9x9x4xbf16>,
    %c0_25 = arith.constant 0 : index
    %c0_26 = arith.constant 0 : index
    %c1_27 = arith.constant 1 : index
    %c1_28 = arith.constant 1 : index
    %c0_29 = arith.constant 0 : index
    %c0_30 = arith.constant 0 : index
    %24 = vector.load %arg2[%c0_25, %c0_26, %c1_27, %c1_28, %c0_29, %c0_30] : memref<1x2x2x9x9x4xf32, #tpu.memory_space<vmem>>, vector<1x1x1x8x8x4xf32>
    %25 = vector.shape_cast %24 : vector<1x1x1x8x8x4xf32> to vector<8x8x4xf32>
    %26 = vector.broadcast %1 : vector<1x1x4xf32> to vector<8x8x4xf32>
    %27 = arith.mulf %25, %26 : vector<8x8x4xf32>
    %28 = vector.broadcast %3 : vector<1x1x4xf32> to vector<8x8x4xf32>
    %29 = arith.addf %27, %28 : vector<8x8x4xf32>
    %cst_31 = arith.constant 0.000000e+00 : f32
    %30 = vector.broadcast %cst_31 : f32 to vector<8x8x4xf32>
    %31 = arith.maximumf %29, %30 : vector<8x8x4xf32>
    %32 = arith.truncf %31 : vector<8x8x4xf32> to vector<8x8x4xbf16>
    %c0_32 = arith.constant 0 : index
    %c1_33 = arith.constant 1 : index
    %c1_34 = arith.constant 1 : index
    %c0_35 = arith.constant 0 : index
    %c0_36 = arith.constant 0 : index
    %33 = vector.load %arg11[%c0_32, %c1_33, %c1_34, %c0_35, %c0_36] : memref<2x2x9x9x4xbf16, #tpu.memory_space<vmem>>, vector<1x1x8x8x4xbf16>
    %34 = vector.shape_cast %33 : vector<1x1x8x8x4xbf16> to vector<8x8x4xbf16>
    %35 = vector.shape_cast %32 : vector<8x8x4xbf16> to vector<1x1x8x8x4xbf16>
    tpu.vector_store %arg11[%c0_32, %c1_33, %c1_34, %c0_35, %c0_36], %35 {strides = array<i32>} : memref<2x2x9x9x4xbf16, #tpu.memory_space<vmem>>, vector<1x1x8x8x4xbf16>,
    %cst_37 = arith.constant 0.000000e+00 : bf16
    %36 = vector.broadcast %cst_37 : bf16 to vector<9x9x4xbf16>
    %c1_38 = arith.constant 1 : index
    %c0_39 = arith.constant 0 : index
    %c0_40 = arith.constant 0 : index
    %c0_41 = arith.constant 0 : index
    %c0_42 = arith.constant 0 : index
    %37 = vector.load %arg11[%c1_38, %c0_39, %c0_40, %c0_41, %c0_42] : memref<2x2x9x9x4xbf16, #tpu.memory_space<vmem>>, vector<1x1x9x9x4xbf16>
    %38 = vector.shape_cast %37 : vector<1x1x9x9x4xbf16> to vector<9x9x4xbf16>
    %39 = vector.shape_cast %36 : vector<9x9x4xbf16> to vector<1x1x9x9x4xbf16>
    tpu.vector_store %arg11[%c1_38, %c0_39, %c0_40, %c0_41, %c0_42], %39 {strides = array<i32>} : memref<2x2x9x9x4xbf16, #tpu.memory_space<vmem>>, vector<1x1x9x9x4xbf16>,
    %c0_43 = arith.constant 0 : index
    %c1_44 = arith.constant 1 : index
    %c0_45 = arith.constant 0 : index
    %c0_46 = arith.constant 0 : index
    %c1_47 = arith.constant 1 : index
    %c0_48 = arith.constant 0 : index
    %40 = vector.load %arg2[%c0_43, %c1_44, %c0_45, %c0_46, %c1_47, %c0_48] : memref<1x2x2x9x9x4xf32, #tpu.memory_space<vmem>>, vector<1x1x1x8x8x4xf32>
    %41 = vector.shape_cast %40 : vector<1x1x1x8x8x4xf32> to vector<8x8x4xf32>
    %42 = vector.broadcast %1 : vector<1x1x4xf32> to vector<8x8x4xf32>
    %43 = arith.mulf %41, %42 : vector<8x8x4xf32>
    %44 = vector.broadcast %3 : vector<1x1x4xf32> to vector<8x8x4xf32>
    %45 = arith.addf %43, %44 : vector<8x8x4xf32>
    %cst_49 = arith.constant 0.000000e+00 : f32
    %46 = vector.broadcast %cst_49 : f32 to vector<8x8x4xf32>
    %47 = arith.maximumf %45, %46 : vector<8x8x4xf32>
    %48 = arith.truncf %47 : vector<8x8x4xf32> to vector<8x8x4xbf16>
    %c1_50 = arith.constant 1 : index
    %c0_51 = arith.constant 0 : index
    %c0_52 = arith.constant 0 : index
    %c1_53 = arith.constant 1 : index
    %c0_54 = arith.constant 0 : index
    %49 = vector.load %arg11[%c1_50, %c0_51, %c0_52, %c1_53, %c0_54] : memref<2x2x9x9x4xbf16, #tpu.memory_space<vmem>>, vector<1x1x8x8x4xbf16>
    %50 = vector.shape_cast %49 : vector<1x1x8x8x4xbf16> to vector<8x8x4xbf16>
    %51 = vector.shape_cast %48 : vector<8x8x4xbf16> to vector<1x1x8x8x4xbf16>
    tpu.vector_store %arg11[%c1_50, %c0_51, %c0_52, %c1_53, %c0_54], %51 {strides = array<i32>} : memref<2x2x9x9x4xbf16, #tpu.memory_space<vmem>>, vector<1x1x8x8x4xbf16>,
    %cst_55 = arith.constant 0.000000e+00 : bf16
    %52 = vector.broadcast %cst_55 : bf16 to vector<9x9x4xbf16>
    %c1_56 = arith.constant 1 : index
    %c1_57 = arith.constant 1 : index
    %c0_58 = arith.constant 0 : index
    %c0_59 = arith.constant 0 : index
    %c0_60 = arith.constant 0 : index
    %53 = vector.load %arg11[%c1_56, %c1_57, %c0_58, %c0_59, %c0_60] : memref<2x2x9x9x4xbf16, #tpu.memory_space<vmem>>, vector<1x1x9x9x4xbf16>
    %54 = vector.shape_cast %53 : vector<1x1x9x9x4xbf16> to vector<9x9x4xbf16>
    %55 = vector.shape_cast %52 : vector<9x9x4xbf16> to vector<1x1x9x9x4xbf16>
    tpu.vector_store %arg11[%c1_56, %c1_57, %c0_58, %c0_59, %c0_60], %55 {strides = array<i32>} : memref<2x2x9x9x4xbf16, #tpu.memory_space<vmem>>, vector<1x1x9x9x4xbf16>,
    %c0_61 = arith.constant 0 : index
    %c1_62 = arith.constant 1 : index
    %c1_63 = arith.constant 1 : index
    %c0_64 = arith.constant 0 : index
    %c0_65 = arith.constant 0 : index
    %c0_66 = arith.constant 0 : index
    %56 = vector.load %arg2[%c0_61, %c1_62, %c1_63, %c0_64, %c0_65, %c0_66] : memref<1x2x2x9x9x4xf32, #tpu.memory_space<vmem>>, vector<1x1x1x8x8x4xf32>
    %57 = vector.shape_cast %56 : vector<1x1x1x8x8x4xf32> to vector<8x8x4xf32>
    %58 = vector.broadcast %1 : vector<1x1x4xf32> to vector<8x8x4xf32>
    %59 = arith.mulf %57, %58 : vector<8x8x4xf32>
    %60 = vector.broadcast %3 : vector<1x1x4xf32> to vector<8x8x4xf32>
    %61 = arith.addf %59, %60 : vector<8x8x4xf32>
    %cst_67 = arith.constant 0.000000e+00 : f32
    %62 = vector.broadcast %cst_67 : f32 to vector<8x8x4xf32>
    %63 = arith.maximumf %61, %62 : vector<8x8x4xf32>
    %64 = arith.truncf %63 : vector<8x8x4xf32> to vector<8x8x4xbf16>
    %c1_68 = arith.constant 1 : index
    %c1_69 = arith.constant 1 : index
    %c0_70 = arith.constant 0 : index
    %c0_71 = arith.constant 0 : index
    %c0_72 = arith.constant 0 : index
    %65 = vector.load %arg11[%c1_68, %c1_69, %c0_70, %c0_71, %c0_72] : memref<2x2x9x9x4xbf16, #tpu.memory_space<vmem>>, vector<1x1x8x8x4xbf16>
    %66 = vector.shape_cast %65 : vector<1x1x8x8x4xbf16> to vector<8x8x4xbf16>
    %67 = vector.shape_cast %64 : vector<8x8x4xbf16> to vector<1x1x8x8x4xbf16>
    tpu.vector_store %arg11[%c1_68, %c1_69, %c0_70, %c0_71, %c0_72], %67 {strides = array<i32>} : memref<2x2x9x9x4xbf16, #tpu.memory_space<vmem>>, vector<1x1x8x8x4xbf16>,
    %cst_73 = arith.constant 0.000000e+00 : f32
    %68 = vector.broadcast %cst_73 : f32 to vector<64x8xf32>
    %c0_74 = arith.constant 0 : index
    %c0_75 = arith.constant 0 : index
    %c0_76 = arith.constant 0 : index
    %c0_77 = arith.constant 0 : index
    %c0_78 = arith.constant 0 : index
    %69 = vector.load %arg11[%c0_74, %c0_75, %c0_76, %c0_77, %c0_78] : memref<2x2x9x9x4xbf16, #tpu.memory_space<vmem>>, vector<1x1x8x8x4xbf16>
    %70 = vector.shape_cast %69 : vector<1x1x8x8x4xbf16> to vector<8x8x4xbf16>
    %71 = vector.shape_cast %70 : vector<8x8x4xbf16> to vector<64x4xbf16>
    %c0_79 = arith.constant 0 : index
    %c0_80 = arith.constant 0 : index
    %c0_81 = arith.constant 0 : index
    %c0_82 = arith.constant 0 : index
    %72 = vector.load %arg5[%c0_79, %c0_80, %c0_81, %c0_82] : memref<3x3x4x8xbf16, #tpu.memory_space<vmem>>, vector<1x1x4x8xbf16>
    %73 = vector.shape_cast %72 : vector<1x1x4x8xbf16> to vector<4x8xbf16>
    %cst_83 = arith.constant dense<0.000000e+00> : vector<64x8xf32>
    %74 = tpu.matmul %71, %73, %cst_83 {dimension_numbers = #tpu.dot_dimension_numbers<[1], [0], [0], [1], [0, 0, 1, 1], [], []>} : vector<64x4xbf16>, vector<4x8xbf16>, vector<64x8xf32> -> vector<64x8xf32>
    %75 = arith.addf %68, %74 : vector<64x8xf32>
    %c0_84 = arith.constant 0 : index
    %c1_85 = arith.constant 1 : index
    %c0_86 = arith.constant 0 : index
    %c0_87 = arith.constant 0 : index
    %c0_88 = arith.constant 0 : index
    %76 = vector.load %arg11[%c0_84, %c1_85, %c0_86, %c0_87, %c0_88] : memref<2x2x9x9x4xbf16, #tpu.memory_space<vmem>>, vector<1x1x8x8x4xbf16>
    %77 = vector.shape_cast %76 : vector<1x1x8x8x4xbf16> to vector<8x8x4xbf16>
    %78 = vector.shape_cast %77 : vector<8x8x4xbf16> to vector<64x4xbf16>
    %c0_89 = arith.constant 0 : index
    %c1_90 = arith.constant 1 : index
    %c0_91 = arith.constant 0 : index
    %c0_92 = arith.constant 0 : index
    %79 = vector.load %arg5[%c0_89, %c1_90, %c0_91, %c0_92] : memref<3x3x4x8xbf16, #tpu.memory_space<vmem>>, vector<1x1x4x8xbf16>
    %80 = vector.shape_cast %79 : vector<1x1x4x8xbf16> to vector<4x8xbf16>
    %cst_93 = arith.constant dense<0.000000e+00> : vector<64x8xf32>
    %81 = tpu.matmul %78, %80, %cst_93 {dimension_numbers = #tpu.dot_dimension_numbers<[1], [0], [0], [1], [0, 0, 1, 1], [], []>} : vector<64x4xbf16>, vector<4x8xbf16>, vector<64x8xf32> -> vector<64x8xf32>
    %82 = arith.addf %75, %81 : vector<64x8xf32>
    %c0_94 = arith.constant 0 : index
    %c0_95 = arith.constant 0 : index
    %c0_96 = arith.constant 0 : index
    %c1_97 = arith.constant 1 : index
    %c0_98 = arith.constant 0 : index
    %83 = vector.load %arg11[%c0_94, %c0_95, %c0_96, %c1_97, %c0_98] : memref<2x2x9x9x4xbf16, #tpu.memory_space<vmem>>, vector<1x1x8x8x4xbf16>
    %84 = vector.shape_cast %83 : vector<1x1x8x8x4xbf16> to vector<8x8x4xbf16>
    %85 = vector.shape_cast %84 : vector<8x8x4xbf16> to vector<64x4xbf16>
    %c0_99 = arith.constant 0 : index
    %c2 = arith.constant 2 : index
    %c0_100 = arith.constant 0 : index
    %c0_101 = arith.constant 0 : index
    %86 = vector.load %arg5[%c0_99, %c2, %c0_100, %c0_101] : memref<3x3x4x8xbf16, #tpu.memory_space<vmem>>, vector<1x1x4x8xbf16>
    %87 = vector.shape_cast %86 : vector<1x1x4x8xbf16> to vector<4x8xbf16>
    %cst_102 = arith.constant dense<0.000000e+00> : vector<64x8xf32>
    %88 = tpu.matmul %85, %87, %cst_102 {dimension_numbers = #tpu.dot_dimension_numbers<[1], [0], [0], [1], [0, 0, 1, 1], [], []>} : vector<64x4xbf16>, vector<4x8xbf16>, vector<64x8xf32> -> vector<64x8xf32>
    %89 = arith.addf %82, %88 : vector<64x8xf32>
    %c1_103 = arith.constant 1 : index
    %c0_104 = arith.constant 0 : index
    %c0_105 = arith.constant 0 : index
    %c0_106 = arith.constant 0 : index
    %c0_107 = arith.constant 0 : index
    %90 = vector.load %arg11[%c1_103, %c0_104, %c0_105, %c0_106, %c0_107] : memref<2x2x9x9x4xbf16, #tpu.memory_space<vmem>>, vector<1x1x8x8x4xbf16>
    %91 = vector.shape_cast %90 : vector<1x1x8x8x4xbf16> to vector<8x8x4xbf16>
    %92 = vector.shape_cast %91 : vector<8x8x4xbf16> to vector<64x4xbf16>
    %c1_108 = arith.constant 1 : index
    %c0_109 = arith.constant 0 : index
    %c0_110 = arith.constant 0 : index
    %c0_111 = arith.constant 0 : index
    %93 = vector.load %arg5[%c1_108, %c0_109, %c0_110, %c0_111] : memref<3x3x4x8xbf16, #tpu.memory_space<vmem>>, vector<1x1x4x8xbf16>
    %94 = vector.shape_cast %93 : vector<1x1x4x8xbf16> to vector<4x8xbf16>
    %cst_112 = arith.constant dense<0.000000e+00> : vector<64x8xf32>
    %95 = tpu.matmul %92, %94, %cst_112 {dimension_numbers = #tpu.dot_dimension_numbers<[1], [0], [0], [1], [0, 0, 1, 1], [], []>} : vector<64x4xbf16>, vector<4x8xbf16>, vector<64x8xf32> -> vector<64x8xf32>
    %96 = arith.addf %89, %95 : vector<64x8xf32>
    %c1_113 = arith.constant 1 : index
    %c1_114 = arith.constant 1 : index
    %c0_115 = arith.constant 0 : index
    %c0_116 = arith.constant 0 : index
    %c0_117 = arith.constant 0 : index
    %97 = vector.load %arg11[%c1_113, %c1_114, %c0_115, %c0_116, %c0_117] : memref<2x2x9x9x4xbf16, #tpu.memory_space<vmem>>, vector<1x1x8x8x4xbf16>
    %98 = vector.shape_cast %97 : vector<1x1x8x8x4xbf16> to vector<8x8x4xbf16>
    %99 = vector.shape_cast %98 : vector<8x8x4xbf16> to vector<64x4xbf16>
    %c1_118 = arith.constant 1 : index
    %c1_119 = arith.constant 1 : index
    %c0_120 = arith.constant 0 : index
    %c0_121 = arith.constant 0 : index
    %100 = vector.load %arg5[%c1_118, %c1_119, %c0_120, %c0_121] : memref<3x3x4x8xbf16, #tpu.memory_space<vmem>>, vector<1x1x4x8xbf16>
    %101 = vector.shape_cast %100 : vector<1x1x4x8xbf16> to vector<4x8xbf16>
    %cst_122 = arith.constant dense<0.000000e+00> : vector<64x8xf32>
    %102 = tpu.matmul %99, %101, %cst_122 {dimension_numbers = #tpu.dot_dimension_numbers<[1], [0], [0], [1], [0, 0, 1, 1], [], []>} : vector<64x4xbf16>, vector<4x8xbf16>, vector<64x8xf32> -> vector<64x8xf32>
    %103 = arith.addf %96, %102 : vector<64x8xf32>
    %c1_123 = arith.constant 1 : index
    %c0_124 = arith.constant 0 : index
    %c0_125 = arith.constant 0 : index
    %c1_126 = arith.constant 1 : index
    %c0_127 = arith.constant 0 : index
    %104 = vector.load %arg11[%c1_123, %c0_124, %c0_125, %c1_126, %c0_127] : memref<2x2x9x9x4xbf16, #tpu.memory_space<vmem>>, vector<1x1x8x8x4xbf16>
    %105 = vector.shape_cast %104 : vector<1x1x8x8x4xbf16> to vector<8x8x4xbf16>
    %106 = vector.shape_cast %105 : vector<8x8x4xbf16> to vector<64x4xbf16>
    %c1_128 = arith.constant 1 : index
    %c2_129 = arith.constant 2 : index
    %c0_130 = arith.constant 0 : index
    %c0_131 = arith.constant 0 : index
    %107 = vector.load %arg5[%c1_128, %c2_129, %c0_130, %c0_131] : memref<3x3x4x8xbf16, #tpu.memory_space<vmem>>, vector<1x1x4x8xbf16>
    %108 = vector.shape_cast %107 : vector<1x1x4x8xbf16> to vector<4x8xbf16>
    %cst_132 = arith.constant dense<0.000000e+00> : vector<64x8xf32>
    %109 = tpu.matmul %106, %108, %cst_132 {dimension_numbers = #tpu.dot_dimension_numbers<[1], [0], [0], [1], [0, 0, 1, 1], [], []>} : vector<64x4xbf16>, vector<4x8xbf16>, vector<64x8xf32> -> vector<64x8xf32>
    %110 = arith.addf %103, %109 : vector<64x8xf32>
    %c0_133 = arith.constant 0 : index
    %c0_134 = arith.constant 0 : index
    %c1_135 = arith.constant 1 : index
    %c0_136 = arith.constant 0 : index
    %c0_137 = arith.constant 0 : index
    %111 = vector.load %arg11[%c0_133, %c0_134, %c1_135, %c0_136, %c0_137] : memref<2x2x9x9x4xbf16, #tpu.memory_space<vmem>>, vector<1x1x8x8x4xbf16>
    %112 = vector.shape_cast %111 : vector<1x1x8x8x4xbf16> to vector<8x8x4xbf16>
    %113 = vector.shape_cast %112 : vector<8x8x4xbf16> to vector<64x4xbf16>
    %c2_138 = arith.constant 2 : index
    %c0_139 = arith.constant 0 : index
    %c0_140 = arith.constant 0 : index
    %c0_141 = arith.constant 0 : index
    %114 = vector.load %arg5[%c2_138, %c0_139, %c0_140, %c0_141] : memref<3x3x4x8xbf16, #tpu.memory_space<vmem>>, vector<1x1x4x8xbf16>
    %115 = vector.shape_cast %114 : vector<1x1x4x8xbf16> to vector<4x8xbf16>
    %cst_142 = arith.constant dense<0.000000e+00> : vector<64x8xf32>
    %116 = tpu.matmul %113, %115, %cst_142 {dimension_numbers = #tpu.dot_dimension_numbers<[1], [0], [0], [1], [0, 0, 1, 1], [], []>} : vector<64x4xbf16>, vector<4x8xbf16>, vector<64x8xf32> -> vector<64x8xf32>
    %117 = arith.addf %110, %116 : vector<64x8xf32>
    %c0_143 = arith.constant 0 : index
    %c1_144 = arith.constant 1 : index
    %c1_145 = arith.constant 1 : index
    %c0_146 = arith.constant 0 : index
    %c0_147 = arith.constant 0 : index
    %118 = vector.load %arg11[%c0_143, %c1_144, %c1_145, %c0_146, %c0_147] : memref<2x2x9x9x4xbf16, #tpu.memory_space<vmem>>, vector<1x1x8x8x4xbf16>
    %119 = vector.shape_cast %118 : vector<1x1x8x8x4xbf16> to vector<8x8x4xbf16>
    %120 = vector.shape_cast %119 : vector<8x8x4xbf16> to vector<64x4xbf16>
    %c2_148 = arith.constant 2 : index
    %c1_149 = arith.constant 1 : index
    %c0_150 = arith.constant 0 : index
    %c0_151 = arith.constant 0 : index
    %121 = vector.load %arg5[%c2_148, %c1_149, %c0_150, %c0_151] : memref<3x3x4x8xbf16, #tpu.memory_space<vmem>>, vector<1x1x4x8xbf16>
    %122 = vector.shape_cast %121 : vector<1x1x4x8xbf16> to vector<4x8xbf16>
    %cst_152 = arith.constant dense<0.000000e+00> : vector<64x8xf32>
    %123 = tpu.matmul %120, %122, %cst_152 {dimension_numbers = #tpu.dot_dimension_numbers<[1], [0], [0], [1], [0, 0, 1, 1], [], []>} : vector<64x4xbf16>, vector<4x8xbf16>, vector<64x8xf32> -> vector<64x8xf32>
    %124 = arith.addf %117, %123 : vector<64x8xf32>
    %c0_153 = arith.constant 0 : index
    %c0_154 = arith.constant 0 : index
    %c1_155 = arith.constant 1 : index
    %c1_156 = arith.constant 1 : index
    %c0_157 = arith.constant 0 : index
    %125 = vector.load %arg11[%c0_153, %c0_154, %c1_155, %c1_156, %c0_157] : memref<2x2x9x9x4xbf16, #tpu.memory_space<vmem>>, vector<1x1x8x8x4xbf16>
    %126 = vector.shape_cast %125 : vector<1x1x8x8x4xbf16> to vector<8x8x4xbf16>
    %127 = vector.shape_cast %126 : vector<8x8x4xbf16> to vector<64x4xbf16>
    %c2_158 = arith.constant 2 : index
    %c2_159 = arith.constant 2 : index
    %c0_160 = arith.constant 0 : index
    %c0_161 = arith.constant 0 : index
    %128 = vector.load %arg5[%c2_158, %c2_159, %c0_160, %c0_161] : memref<3x3x4x8xbf16, #tpu.memory_space<vmem>>, vector<1x1x4x8xbf16>
    %129 = vector.shape_cast %128 : vector<1x1x4x8xbf16> to vector<4x8xbf16>
    %cst_162 = arith.constant dense<0.000000e+00> : vector<64x8xf32>
    %130 = tpu.matmul %127, %129, %cst_162 {dimension_numbers = #tpu.dot_dimension_numbers<[1], [0], [0], [1], [0, 0, 1, 1], [], []>} : vector<64x4xbf16>, vector<4x8xbf16>, vector<64x8xf32> -> vector<64x8xf32>
    %131 = arith.addf %124, %130 : vector<64x8xf32>
    %cst_163 = arith.constant dense<0.000000e+00> : vector<8xf32>
    %132 = vector.multi_reduction <add>, %131, %cst_163 [0] : vector<64x8xf32> to vector<8xf32>
    %133 = vector.shape_cast %132 : vector<8xf32> to vector<1x8xf32>
    %c0_164 = arith.constant 0 : index
    %c0_165 = arith.constant 0 : index
    %c0_166 = arith.constant 0 : index
    %134 = vector.load %arg8[%c0_164, %c0_165, %c0_166] : memref<1x1x8xf32, #tpu.memory_space<vmem>>, vector<1x1x8xf32>
    %135 = vector.shape_cast %134 : vector<1x1x8xf32> to vector<1x8xf32>
    %136 = vector.shape_cast %133 : vector<1x8xf32> to vector<1x1x8xf32>
    tpu.vector_store %arg8[%c0_164, %c0_165, %c0_166], %136 {strides = array<i32>} : memref<1x1x8xf32, #tpu.memory_space<vmem>>, vector<1x1x8xf32>,
    %137 = arith.mulf %131, %131 : vector<64x8xf32>
    %cst_167 = arith.constant dense<0.000000e+00> : vector<8xf32>
    %138 = vector.multi_reduction <add>, %137, %cst_167 [0] : vector<64x8xf32> to vector<8xf32>
    %139 = vector.shape_cast %138 : vector<8xf32> to vector<1x8xf32>
    %c0_168 = arith.constant 0 : index
    %c0_169 = arith.constant 0 : index
    %c0_170 = arith.constant 0 : index
    %140 = vector.load %arg9[%c0_168, %c0_169, %c0_170] : memref<1x1x8xf32, #tpu.memory_space<vmem>>, vector<1x1x8xf32>
    %141 = vector.shape_cast %140 : vector<1x1x8xf32> to vector<1x8xf32>
    %142 = vector.shape_cast %139 : vector<1x8xf32> to vector<1x1x8xf32>
    tpu.vector_store %arg9[%c0_168, %c0_169, %c0_170], %142 {strides = array<i32>} : memref<1x1x8xf32, #tpu.memory_space<vmem>>, vector<1x1x8xf32>,
    %143 = vector.shape_cast %131 : vector<64x8xf32> to vector<8x8x8xf32>
    %cst_171 = arith.constant 0.000000e+00 : bf16
    %144 = vector.broadcast %cst_171 : bf16 to vector<10x10x8xbf16>
    %c0_172 = arith.constant 0 : index
    %c0_173 = arith.constant 0 : index
    %c0_174 = arith.constant 0 : index
    %c0_175 = arith.constant 0 : index
    %c0_176 = arith.constant 0 : index
    %c0_177 = arith.constant 0 : index
    %145 = vector.load %arg7[%c0_172, %c0_173, %c0_174, %c0_175, %c0_176, %c0_177] : memref<1x1x1x10x10x8xbf16, #tpu.memory_space<vmem>>, vector<1x1x1x10x10x8xbf16>
    %146 = vector.shape_cast %145 : vector<1x1x1x10x10x8xbf16> to vector<10x10x8xbf16>
    %147 = vector.shape_cast %144 : vector<10x10x8xbf16> to vector<1x1x1x10x10x8xbf16>
    tpu.vector_store %arg7[%c0_172, %c0_173, %c0_174, %c0_175, %c0_176, %c0_177], %147 {strides = array<i32>} : memref<1x1x1x10x10x8xbf16, #tpu.memory_space<vmem>>, vector<1x1x1x10x10x8xbf16>,
    %148 = arith.truncf %143 : vector<8x8x8xf32> to vector<8x8x8xbf16>
    %c0_178 = arith.constant 0 : index
    %c0_179 = arith.constant 0 : index
    %c0_180 = arith.constant 0 : index
    %c1_181 = arith.constant 1 : index
    %c1_182 = arith.constant 1 : index
    %c0_183 = arith.constant 0 : index
    %149 = vector.load %arg7[%c0_178, %c0_179, %c0_180, %c1_181, %c1_182, %c0_183] : memref<1x1x1x10x10x8xbf16, #tpu.memory_space<vmem>>, vector<1x1x1x8x8x8xbf16>
    %150 = vector.shape_cast %149 : vector<1x1x1x8x8x8xbf16> to vector<8x8x8xbf16>
    %151 = vector.shape_cast %148 : vector<8x8x8xbf16> to vector<1x1x1x8x8x8xbf16>
    tpu.vector_store %arg7[%c0_178, %c0_179, %c0_180, %c1_181, %c1_182, %c0_183], %151 {strides = array<i32>} : memref<1x1x1x10x10x8xbf16, #tpu.memory_space<vmem>>, vector<1x1x1x8x8x8xbf16>,
    %c1_184 = arith.constant 1 : index
    %c1_185 = arith.constant 1 : index
    %c0_186 = arith.constant 0 : index
    %c0_187 = arith.constant 0 : index
    %c0_188 = arith.constant 0 : index
    %152 = vector.load %arg11[%c1_184, %c1_185, %c0_186, %c0_187, %c0_188] : memref<2x2x9x9x4xbf16, #tpu.memory_space<vmem>>, vector<1x1x8x8x4xbf16>
    %153 = vector.shape_cast %152 : vector<1x1x8x8x4xbf16> to vector<8x8x4xbf16>
    %154 = vector.shape_cast %153 : vector<8x8x4xbf16> to vector<64x4xbf16>
    %c0_189 = arith.constant 0 : index
    %c0_190 = arith.constant 0 : index
    %155 = vector.load %arg6[%c0_189, %c0_190] : memref<4x8xbf16, #tpu.memory_space<vmem>>, vector<4x8xbf16>
    %cst_191 = arith.constant dense<0.000000e+00> : vector<64x8xf32>
    %156 = tpu.matmul %154, %155, %cst_191 {dimension_numbers = #tpu.dot_dimension_numbers<[1], [0], [0], [1], [0, 0, 1, 1], [], []>} : vector<64x4xbf16>, vector<4x8xbf16>, vector<64x8xf32> -> vector<64x8xf32>
    %157 = vector.shape_cast %156 : vector<64x8xf32> to vector<8x8x8xf32>
    %158 = arith.truncf %157 : vector<8x8x8xf32> to vector<8x8x8xbf16>
    %c0_192 = arith.constant 0 : index
    %c0_193 = arith.constant 0 : index
    %c0_194 = arith.constant 0 : index
    %c0_195 = arith.constant 0 : index
    %159 = vector.load %arg10[%c0_192, %c0_193, %c0_194, %c0_195] : memref<1x8x8x8xbf16, #tpu.memory_space<vmem>>, vector<1x8x8x8xbf16>
    %160 = vector.shape_cast %159 : vector<1x8x8x8xbf16> to vector<8x8x8xbf16>
    %161 = vector.shape_cast %158 : vector<8x8x8xbf16> to vector<1x8x8x8xbf16>
    tpu.vector_store %arg10[%c0_192, %c0_193, %c0_194, %c0_195], %161 {strides = array<i32>} : memref<1x8x8x8xbf16, #tpu.memory_space<vmem>>, vector<1x8x8x8xbf16>,
    return
  }
  func.func @transform_0(%arg0: i32, %arg1: i32) -> (i32, i32, i32, i32, i32, i32) {
    %c0_i32 = arith.constant 0 : i32
    %c0_i32_0 = arith.constant 0 : i32
    %c0_i32_1 = arith.constant 0 : i32
    %c0_i32_2 = arith.constant 0 : i32
    %c0_i32_3 = arith.constant 0 : i32
    %c0_i32_4 = arith.constant 0 : i32
    return %arg0, %c0_i32, %c0_i32_0, %c0_i32_1, %c0_i32_2, %c0_i32_3 : i32, i32, i32, i32, i32, i32
  }
  func.func @transform_1(%arg0: i32, %arg1: i32) -> (i32, i32) {
    %c0_i32 = arith.constant 0 : i32
    %c0_i32_0 = arith.constant 0 : i32
    %c0_i32_1 = arith.constant 0 : i32
    return %c0_i32, %c0_i32_0 : i32, i32
  }
  func.func @transform_2(%arg0: i32, %arg1: i32) -> (i32, i32) {
    %c0_i32 = arith.constant 0 : i32
    %c0_i32_0 = arith.constant 0 : i32
    %c0_i32_1 = arith.constant 0 : i32
    return %c0_i32, %c0_i32_0 : i32, i32
  }
  func.func @transform_3(%arg0: i32, %arg1: i32) -> (i32, i32, i32, i32) {
    %c0_i32 = arith.constant 0 : i32
    %c0_i32_0 = arith.constant 0 : i32
    %c0_i32_1 = arith.constant 0 : i32
    %c0_i32_2 = arith.constant 0 : i32
    return %c0_i32, %c0_i32_0, %c0_i32_1, %arg1 : i32, i32, i32, i32
  }
  func.func @transform_4(%arg0: i32, %arg1: i32) -> (i32, i32) {
    %c0_i32 = arith.constant 0 : i32
    %c0_i32_0 = arith.constant 0 : i32
    return %c0_i32, %arg1 : i32, i32
  }
  func.func @transform_5(%arg0: i32, %arg1: i32) -> (i32, i32, i32, i32, i32, i32) {
    %c0_i32 = arith.constant 0 : i32
    %c0_i32_0 = arith.constant 0 : i32
    %c0_i32_1 = arith.constant 0 : i32
    %c0_i32_2 = arith.constant 0 : i32
    %c0_i32_3 = arith.constant 0 : i32
    return %arg0, %c0_i32, %c0_i32_0, %c0_i32_1, %c0_i32_2, %arg1 : i32, i32, i32, i32, i32, i32
  }
  func.func @transform_6(%arg0: i32, %arg1: i32) -> (i32, i32, i32) {
    %c0_i32 = arith.constant 0 : i32
    %c0_i32_0 = arith.constant 0 : i32
    return %arg0, %c0_i32, %arg1 : i32, i32, i32
  }
  func.func @transform_7(%arg0: i32, %arg1: i32) -> (i32, i32, i32) {
    %c0_i32 = arith.constant 0 : i32
    %c0_i32_0 = arith.constant 0 : i32
    return %arg0, %c0_i32, %arg1 : i32, i32, i32
  }
  func.func @transform_8(%arg0: i32, %arg1: i32) -> (i32, i32, i32, i32) {
    %c0_i32 = arith.constant 0 : i32
    %c0_i32_0 = arith.constant 0 : i32
    %c0_i32_1 = arith.constant 0 : i32
    return %arg0, %c0_i32, %c0_i32_0, %arg1 : i32, i32, i32, i32
  }
}

module attributes {stable_mosaic.version = 11 : i64} {
  func.func @_sample_kl_kernel(%arg0: i32, %arg1: memref<72x8xf32, #tpu.memory_space<vmem>>, %arg2: memref<72x8xf32, #tpu.memory_space<vmem>>, %arg3: memref<72x8xf32, #tpu.memory_space<vmem>>, %arg4: memref<72x8xbf16, #tpu.memory_space<vmem>>, %arg5: memref<1x1xf32, #tpu.memory_space<vmem>>) attributes {dimension_semantics = [#tpu.dimension_semantics<arbitrary>], iteration_bounds = array<i64: 1>, scalar_prefetch = 0 : i64, scratch_operands = 0 : i64, tpu.core_type = #tpu.core_type<tc>, window_params = [{transform_indices = @transform_0, window_bounds = array<i64: 72, 8>}, {transform_indices = @transform_1, window_bounds = array<i64: 72, 8>}, {transform_indices = @transform_2, window_bounds = array<i64: 72, 8>}, {transform_indices = @transform_3, window_bounds = array<i64: 72, 8>}, {pipeline_mode = #tpu.pipeline_mode<synchronous>, transform_indices = @transform_4, window_bounds = array<i64: 1, 1>}]} {
    %c0_i32 = arith.constant 0 : i32
    %0 = arith.cmpi eq, %arg0, %c0_i32 : i32
    %1 = arith.extui %0 : i1 to i32
    %c0_i32_0 = arith.constant 0 : i32
    %2 = arith.cmpi ne, %1, %c0_i32_0 : i32
    scf.if %2 {
      %cst_17 = arith.constant 0.000000e+00 : f32
      %37 = vector.broadcast %cst_17 : f32 to vector<1x1xf32>
      %c0_18 = arith.constant 0 : index
      %c0_19 = arith.constant 0 : index
      %38 = vector.load %arg5[%c0_18, %c0_19] : memref<1x1xf32, #tpu.memory_space<vmem>>, vector<1x1xf32>
      tpu.vector_store %arg5[%c0_18, %c0_19], %37 {strides = array<i32>} : memref<1x1xf32, #tpu.memory_space<vmem>>, vector<1x1xf32>,
    } else {
    }
    %c0 = arith.constant 0 : index
    %c0_1 = arith.constant 0 : index
    %3 = vector.load %arg1[%c0, %c0_1] : memref<72x8xf32, #tpu.memory_space<vmem>>, vector<72x8xf32>
    %c0_2 = arith.constant 0 : index
    %c0_3 = arith.constant 0 : index
    %4 = vector.load %arg2[%c0_2, %c0_3] : memref<72x8xf32, #tpu.memory_space<vmem>>, vector<72x8xf32>
    %cst = arith.constant 0.000000e+00 : f32
    %5 = vector.broadcast %cst : f32 to vector<72x8xf32>
    %6 = arith.maximumf %4, %5 : vector<72x8xf32>
    %7 = math.absf %4 : vector<72x8xf32>
    %cst_4 = arith.constant 0.000000e+00 : f32
    %8 = vector.broadcast %cst_4 : f32 to vector<72x8xf32>
    %9 = arith.subf %8, %7 : vector<72x8xf32>
    %10 = math.exp %9 : vector<72x8xf32>
    %11 = math.log1p %10 : vector<72x8xf32>
    %12 = arith.addf %6, %11 : vector<72x8xf32>
    %c0_5 = arith.constant 0 : index
    %c0_6 = arith.constant 0 : index
    %13 = vector.load %arg3[%c0_5, %c0_6] : memref<72x8xf32, #tpu.memory_space<vmem>>, vector<72x8xf32>
    %14 = arith.mulf %12, %13 : vector<72x8xf32>
    %15 = arith.addf %3, %14 : vector<72x8xf32>
    %16 = arith.truncf %15 : vector<72x8xf32> to vector<72x8xbf16>
    %c0_7 = arith.constant 0 : index
    %c0_8 = arith.constant 0 : index
    %17 = vector.load %arg4[%c0_7, %c0_8] : memref<72x8xbf16, #tpu.memory_space<vmem>>, vector<72x8xbf16>
    tpu.vector_store %arg4[%c0_7, %c0_8], %16 {strides = array<i32>} : memref<72x8xbf16, #tpu.memory_space<vmem>>, vector<72x8xbf16>,
    %18 = math.log %12 : vector<72x8xf32>
    %cst_9 = arith.constant 0.000000e+00 : f32
    %19 = vector.broadcast %cst_9 : f32 to vector<72x8xf32>
    %20 = arith.subf %19, %18 : vector<72x8xf32>
    %21 = arith.mulf %12, %12 : vector<72x8xf32>
    %22 = arith.mulf %3, %3 : vector<72x8xf32>
    %23 = arith.addf %21, %22 : vector<72x8xf32>
    %cst_10 = arith.constant 5.000000e-01 : f32
    %24 = vector.broadcast %cst_10 : f32 to vector<72x8xf32>
    %25 = arith.mulf %23, %24 : vector<72x8xf32>
    %26 = arith.addf %20, %25 : vector<72x8xf32>
    %cst_11 = arith.constant 5.000000e-01 : f32
    %27 = vector.broadcast %cst_11 : f32 to vector<72x8xf32>
    %28 = arith.subf %26, %27 : vector<72x8xf32>
    %c0_12 = arith.constant 0 : index
    %c0_13 = arith.constant 0 : index
    %29 = vector.load %arg5[%c0_12, %c0_13] : memref<1x1xf32, #tpu.memory_space<vmem>>, vector<1x1xf32>
    %30 = vector.shape_cast %28 : vector<72x8xf32> to vector<1x72x8xf32>
    %cst_14 = arith.constant dense<0.000000e+00> : vector<1xf32>
    %31 = vector.multi_reduction <add>, %30, %cst_14 [1, 2] : vector<1x72x8xf32> to vector<1xf32>
    %32 = vector.shape_cast %31 : vector<1xf32> to vector<1x1x1xf32>
    %33 = vector.extract %32[0, 0, 0] : f32 from vector<1x1x1xf32>
    %34 = vector.broadcast %33 : f32 to vector<1x1xf32>
    %35 = arith.addf %29, %34 : vector<1x1xf32>
    %c0_15 = arith.constant 0 : index
    %c0_16 = arith.constant 0 : index
    %36 = vector.load %arg5[%c0_15, %c0_16] : memref<1x1xf32, #tpu.memory_space<vmem>>, vector<1x1xf32>
    tpu.vector_store %arg5[%c0_15, %c0_16], %35 {strides = array<i32>} : memref<1x1xf32, #tpu.memory_space<vmem>>, vector<1x1xf32>,
    return
  }
  func.func @transform_0(%arg0: i32) -> (i32, i32) {
    %c0_i32 = arith.constant 0 : i32
    %c0_i32_0 = arith.constant 0 : i32
    return %arg0, %c0_i32 : i32, i32
  }
  func.func @transform_1(%arg0: i32) -> (i32, i32) {
    %c0_i32 = arith.constant 0 : i32
    %c0_i32_0 = arith.constant 0 : i32
    return %arg0, %c0_i32 : i32, i32
  }
  func.func @transform_2(%arg0: i32) -> (i32, i32) {
    %c0_i32 = arith.constant 0 : i32
    %c0_i32_0 = arith.constant 0 : i32
    return %arg0, %c0_i32 : i32, i32
  }
  func.func @transform_3(%arg0: i32) -> (i32, i32) {
    %c0_i32 = arith.constant 0 : i32
    %c0_i32_0 = arith.constant 0 : i32
    return %arg0, %c0_i32 : i32, i32
  }
  func.func @transform_4(%arg0: i32) -> (i32, i32) {
    %c0_i32 = arith.constant 0 : i32
    %c0_i32_0 = arith.constant 0 : i32
    %c0_i32_1 = arith.constant 0 : i32
    return %c0_i32, %c0_i32_0 : i32, i32
  }
}

module attributes {stable_mosaic.version = 11 : i64} {
  func.func @_conv3x3_bn_kernel(%arg0: i32, %arg1: i32, %arg2: memref<1x1x1x10x10x8xbf16, #tpu.memory_space<vmem>>, %arg3: memref<1x8xf32, #tpu.memory_space<vmem>>, %arg4: memref<1x8xf32, #tpu.memory_space<vmem>>, %arg5: memref<3x3x8x8xbf16, #tpu.memory_space<vmem>>, %arg6: memref<1x8x8x8xbf16, #tpu.memory_space<vmem>>, %arg7: memref<1x8x8x8xf32, #tpu.memory_space<vmem>>, %arg8: memref<1x1x8xf32, #tpu.memory_space<vmem>>, %arg9: memref<1x1x8xf32, #tpu.memory_space<vmem>>, %arg10: memref<1x1x10x10x8xbf16, #tpu.memory_space<vmem>>) attributes {dimension_semantics = [#tpu.dimension_semantics<parallel>, #tpu.dimension_semantics<parallel>], iteration_bounds = array<i64: 2, 1>, scalar_prefetch = 0 : i64, scratch_operands = 1 : i64, tpu.core_type = #tpu.core_type<tc>, window_params = [{transform_indices = @transform_0, window_bounds = array<i64: 1, 1, 1, 10, 10, 8>}, {pipeline_mode = #tpu.pipeline_mode<synchronous>, transform_indices = @transform_1, window_bounds = array<i64: 1, 8>}, {pipeline_mode = #tpu.pipeline_mode<synchronous>, transform_indices = @transform_2, window_bounds = array<i64: 1, 8>}, {transform_indices = @transform_3, window_bounds = array<i64: 3, 3, 8, 8>}, {transform_indices = @transform_4, window_bounds = array<i64: 1, 8, 8, 8>}, {transform_indices = @transform_5, window_bounds = array<i64: 1, 8, 8, 8>}, {transform_indices = @transform_6, window_bounds = array<i64: 1, 1, 8>}, {transform_indices = @transform_7, window_bounds = array<i64: 1, 1, 8>}]} {
    %c0 = arith.constant 0 : index
    %c0_0 = arith.constant 0 : index
    %0 = vector.load %arg3[%c0, %c0_0] : memref<1x8xf32, #tpu.memory_space<vmem>>, vector<1x8xf32>
    %1 = vector.shape_cast %0 : vector<1x8xf32> to vector<1x1x8xf32>
    %c0_1 = arith.constant 0 : index
    %c0_2 = arith.constant 0 : index
    %2 = vector.load %arg4[%c0_1, %c0_2] : memref<1x8xf32, #tpu.memory_space<vmem>>, vector<1x8xf32>
    %3 = vector.shape_cast %2 : vector<1x8xf32> to vector<1x1x8xf32>
    %cst = arith.constant 0.000000e+00 : bf16
    %4 = vector.broadcast %cst : bf16 to vector<10x10x8xbf16>
    %c0_3 = arith.constant 0 : index
    %c0_4 = arith.constant 0 : index
    %c0_5 = arith.constant 0 : index
    %c0_6 = arith.constant 0 : index
    %c0_7 = arith.constant 0 : index
    %5 = vector.load %arg10[%c0_3, %c0_4, %c0_5, %c0_6, %c0_7] : memref<1x1x10x10x8xbf16, #tpu.memory_space<vmem>>, vector<1x1x10x10x8xbf16>
    %6 = vector.shape_cast %5 : vector<1x1x10x10x8xbf16> to vector<10x10x8xbf16>
    %7 = vector.shape_cast %4 : vector<10x10x8xbf16> to vector<1x1x10x10x8xbf16>
    tpu.vector_store %arg10[%c0_3, %c0_4, %c0_5, %c0_6, %c0_7], %7 {strides = array<i32>} : memref<1x1x10x10x8xbf16, #tpu.memory_space<vmem>>, vector<1x1x10x10x8xbf16>,
    %c0_8 = arith.constant 0 : index
    %c0_9 = arith.constant 0 : index
    %c0_10 = arith.constant 0 : index
    %c1 = arith.constant 1 : index
    %c1_11 = arith.constant 1 : index
    %c0_12 = arith.constant 0 : index
    %8 = vector.load %arg2[%c0_8, %c0_9, %c0_10, %c1, %c1_11, %c0_12] : memref<1x1x1x10x10x8xbf16, #tpu.memory_space<vmem>>, vector<1x1x1x8x8x8xbf16>
    %9 = vector.shape_cast %8 : vector<1x1x1x8x8x8xbf16> to vector<8x8x8xbf16>
    %10 = arith.extf %9 : vector<8x8x8xbf16> to vector<8x8x8xf32>
    %11 = vector.broadcast %1 : vector<1x1x8xf32> to vector<8x8x8xf32>
    %12 = arith.mulf %10, %11 : vector<8x8x8xf32>
    %13 = vector.broadcast %3 : vector<1x1x8xf32> to vector<8x8x8xf32>
    %14 = arith.addf %12, %13 : vector<8x8x8xf32>
    %cst_13 = arith.constant 0.000000e+00 : f32
    %15 = vector.broadcast %cst_13 : f32 to vector<8x8x8xf32>
    %16 = arith.maximumf %14, %15 : vector<8x8x8xf32>
    %17 = arith.truncf %16 : vector<8x8x8xf32> to vector<8x8x8xbf16>
    %c0_14 = arith.constant 0 : index
    %c0_15 = arith.constant 0 : index
    %c1_16 = arith.constant 1 : index
    %c1_17 = arith.constant 1 : index
    %c0_18 = arith.constant 0 : index
    %18 = vector.load %arg10[%c0_14, %c0_15, %c1_16, %c1_17, %c0_18] : memref<1x1x10x10x8xbf16, #tpu.memory_space<vmem>>, vector<1x1x8x8x8xbf16>
    %19 = vector.shape_cast %18 : vector<1x1x8x8x8xbf16> to vector<8x8x8xbf16>
    %20 = vector.shape_cast %17 : vector<8x8x8xbf16> to vector<1x1x8x8x8xbf16>
    tpu.vector_store %arg10[%c0_14, %c0_15, %c1_16, %c1_17, %c0_18], %20 {strides = array<i32>} : memref<1x1x10x10x8xbf16, #tpu.memory_space<vmem>>, vector<1x1x8x8x8xbf16>,
    %cst_19 = arith.constant 0.000000e+00 : f32
    %21 = vector.broadcast %cst_19 : f32 to vector<64x8xf32>
    %c0_20 = arith.constant 0 : index
    %c0_21 = arith.constant 0 : index
    %c0_22 = arith.constant 0 : index
    %c0_23 = arith.constant 0 : index
    %c0_24 = arith.constant 0 : index
    %22 = vector.load %arg10[%c0_20, %c0_21, %c0_22, %c0_23, %c0_24] : memref<1x1x10x10x8xbf16, #tpu.memory_space<vmem>>, vector<1x1x8x8x8xbf16>
    %23 = vector.shape_cast %22 : vector<1x1x8x8x8xbf16> to vector<8x8x8xbf16>
    %24 = vector.shape_cast %23 : vector<8x8x8xbf16> to vector<64x8xbf16>
    %c0_25 = arith.constant 0 : index
    %c0_26 = arith.constant 0 : index
    %c0_27 = arith.constant 0 : index
    %c0_28 = arith.constant 0 : index
    %25 = vector.load %arg5[%c0_25, %c0_26, %c0_27, %c0_28] : memref<3x3x8x8xbf16, #tpu.memory_space<vmem>>, vector<1x1x8x8xbf16>
    %26 = vector.shape_cast %25 : vector<1x1x8x8xbf16> to vector<8x8xbf16>
    %cst_29 = arith.constant dense<0.000000e+00> : vector<64x8xf32>
    %27 = tpu.matmul %24, %26, %cst_29 {dimension_numbers = #tpu.dot_dimension_numbers<[1], [0], [0], [1], [0, 0, 1, 1], [], []>} : vector<64x8xbf16>, vector<8x8xbf16>, vector<64x8xf32> -> vector<64x8xf32>
    %28 = arith.addf %21, %27 : vector<64x8xf32>
    %c0_30 = arith.constant 0 : index
    %c0_31 = arith.constant 0 : index
    %c0_32 = arith.constant 0 : index
    %c1_33 = arith.constant 1 : index
    %c0_34 = arith.constant 0 : index
    %29 = vector.load %arg10[%c0_30, %c0_31, %c0_32, %c1_33, %c0_34] : memref<1x1x10x10x8xbf16, #tpu.memory_space<vmem>>, vector<1x1x8x8x8xbf16>
    %30 = vector.shape_cast %29 : vector<1x1x8x8x8xbf16> to vector<8x8x8xbf16>
    %31 = vector.shape_cast %30 : vector<8x8x8xbf16> to vector<64x8xbf16>
    %c0_35 = arith.constant 0 : index
    %c1_36 = arith.constant 1 : index
    %c0_37 = arith.constant 0 : index
    %c0_38 = arith.constant 0 : index
    %32 = vector.load %arg5[%c0_35, %c1_36, %c0_37, %c0_38] : memref<3x3x8x8xbf16, #tpu.memory_space<vmem>>, vector<1x1x8x8xbf16>
    %33 = vector.shape_cast %32 : vector<1x1x8x8xbf16> to vector<8x8xbf16>
    %cst_39 = arith.constant dense<0.000000e+00> : vector<64x8xf32>
    %34 = tpu.matmul %31, %33, %cst_39 {dimension_numbers = #tpu.dot_dimension_numbers<[1], [0], [0], [1], [0, 0, 1, 1], [], []>} : vector<64x8xbf16>, vector<8x8xbf16>, vector<64x8xf32> -> vector<64x8xf32>
    %35 = arith.addf %28, %34 : vector<64x8xf32>
    %c0_40 = arith.constant 0 : index
    %c0_41 = arith.constant 0 : index
    %c0_42 = arith.constant 0 : index
    %c2 = arith.constant 2 : index
    %c0_43 = arith.constant 0 : index
    %36 = vector.load %arg10[%c0_40, %c0_41, %c0_42, %c2, %c0_43] : memref<1x1x10x10x8xbf16, #tpu.memory_space<vmem>>, vector<1x1x8x8x8xbf16>
    %37 = vector.shape_cast %36 : vector<1x1x8x8x8xbf16> to vector<8x8x8xbf16>
    %38 = vector.shape_cast %37 : vector<8x8x8xbf16> to vector<64x8xbf16>
    %c0_44 = arith.constant 0 : index
    %c2_45 = arith.constant 2 : index
    %c0_46 = arith.constant 0 : index
    %c0_47 = arith.constant 0 : index
    %39 = vector.load %arg5[%c0_44, %c2_45, %c0_46, %c0_47] : memref<3x3x8x8xbf16, #tpu.memory_space<vmem>>, vector<1x1x8x8xbf16>
    %40 = vector.shape_cast %39 : vector<1x1x8x8xbf16> to vector<8x8xbf16>
    %cst_48 = arith.constant dense<0.000000e+00> : vector<64x8xf32>
    %41 = tpu.matmul %38, %40, %cst_48 {dimension_numbers = #tpu.dot_dimension_numbers<[1], [0], [0], [1], [0, 0, 1, 1], [], []>} : vector<64x8xbf16>, vector<8x8xbf16>, vector<64x8xf32> -> vector<64x8xf32>
    %42 = arith.addf %35, %41 : vector<64x8xf32>
    %c0_49 = arith.constant 0 : index
    %c0_50 = arith.constant 0 : index
    %c1_51 = arith.constant 1 : index
    %c0_52 = arith.constant 0 : index
    %c0_53 = arith.constant 0 : index
    %43 = vector.load %arg10[%c0_49, %c0_50, %c1_51, %c0_52, %c0_53] : memref<1x1x10x10x8xbf16, #tpu.memory_space<vmem>>, vector<1x1x8x8x8xbf16>
    %44 = vector.shape_cast %43 : vector<1x1x8x8x8xbf16> to vector<8x8x8xbf16>
    %45 = vector.shape_cast %44 : vector<8x8x8xbf16> to vector<64x8xbf16>
    %c1_54 = arith.constant 1 : index
    %c0_55 = arith.constant 0 : index
    %c0_56 = arith.constant 0 : index
    %c0_57 = arith.constant 0 : index
    %46 = vector.load %arg5[%c1_54, %c0_55, %c0_56, %c0_57] : memref<3x3x8x8xbf16, #tpu.memory_space<vmem>>, vector<1x1x8x8xbf16>
    %47 = vector.shape_cast %46 : vector<1x1x8x8xbf16> to vector<8x8xbf16>
    %cst_58 = arith.constant dense<0.000000e+00> : vector<64x8xf32>
    %48 = tpu.matmul %45, %47, %cst_58 {dimension_numbers = #tpu.dot_dimension_numbers<[1], [0], [0], [1], [0, 0, 1, 1], [], []>} : vector<64x8xbf16>, vector<8x8xbf16>, vector<64x8xf32> -> vector<64x8xf32>
    %49 = arith.addf %42, %48 : vector<64x8xf32>
    %c0_59 = arith.constant 0 : index
    %c0_60 = arith.constant 0 : index
    %c1_61 = arith.constant 1 : index
    %c1_62 = arith.constant 1 : index
    %c0_63 = arith.constant 0 : index
    %50 = vector.load %arg10[%c0_59, %c0_60, %c1_61, %c1_62, %c0_63] : memref<1x1x10x10x8xbf16, #tpu.memory_space<vmem>>, vector<1x1x8x8x8xbf16>
    %51 = vector.shape_cast %50 : vector<1x1x8x8x8xbf16> to vector<8x8x8xbf16>
    %52 = vector.shape_cast %51 : vector<8x8x8xbf16> to vector<64x8xbf16>
    %c1_64 = arith.constant 1 : index
    %c1_65 = arith.constant 1 : index
    %c0_66 = arith.constant 0 : index
    %c0_67 = arith.constant 0 : index
    %53 = vector.load %arg5[%c1_64, %c1_65, %c0_66, %c0_67] : memref<3x3x8x8xbf16, #tpu.memory_space<vmem>>, vector<1x1x8x8xbf16>
    %54 = vector.shape_cast %53 : vector<1x1x8x8xbf16> to vector<8x8xbf16>
    %cst_68 = arith.constant dense<0.000000e+00> : vector<64x8xf32>
    %55 = tpu.matmul %52, %54, %cst_68 {dimension_numbers = #tpu.dot_dimension_numbers<[1], [0], [0], [1], [0, 0, 1, 1], [], []>} : vector<64x8xbf16>, vector<8x8xbf16>, vector<64x8xf32> -> vector<64x8xf32>
    %56 = arith.addf %49, %55 : vector<64x8xf32>
    %c0_69 = arith.constant 0 : index
    %c0_70 = arith.constant 0 : index
    %c1_71 = arith.constant 1 : index
    %c2_72 = arith.constant 2 : index
    %c0_73 = arith.constant 0 : index
    %57 = vector.load %arg10[%c0_69, %c0_70, %c1_71, %c2_72, %c0_73] : memref<1x1x10x10x8xbf16, #tpu.memory_space<vmem>>, vector<1x1x8x8x8xbf16>
    %58 = vector.shape_cast %57 : vector<1x1x8x8x8xbf16> to vector<8x8x8xbf16>
    %59 = vector.shape_cast %58 : vector<8x8x8xbf16> to vector<64x8xbf16>
    %c1_74 = arith.constant 1 : index
    %c2_75 = arith.constant 2 : index
    %c0_76 = arith.constant 0 : index
    %c0_77 = arith.constant 0 : index
    %60 = vector.load %arg5[%c1_74, %c2_75, %c0_76, %c0_77] : memref<3x3x8x8xbf16, #tpu.memory_space<vmem>>, vector<1x1x8x8xbf16>
    %61 = vector.shape_cast %60 : vector<1x1x8x8xbf16> to vector<8x8xbf16>
    %cst_78 = arith.constant dense<0.000000e+00> : vector<64x8xf32>
    %62 = tpu.matmul %59, %61, %cst_78 {dimension_numbers = #tpu.dot_dimension_numbers<[1], [0], [0], [1], [0, 0, 1, 1], [], []>} : vector<64x8xbf16>, vector<8x8xbf16>, vector<64x8xf32> -> vector<64x8xf32>
    %63 = arith.addf %56, %62 : vector<64x8xf32>
    %c0_79 = arith.constant 0 : index
    %c0_80 = arith.constant 0 : index
    %c2_81 = arith.constant 2 : index
    %c0_82 = arith.constant 0 : index
    %c0_83 = arith.constant 0 : index
    %64 = vector.load %arg10[%c0_79, %c0_80, %c2_81, %c0_82, %c0_83] : memref<1x1x10x10x8xbf16, #tpu.memory_space<vmem>>, vector<1x1x8x8x8xbf16>
    %65 = vector.shape_cast %64 : vector<1x1x8x8x8xbf16> to vector<8x8x8xbf16>
    %66 = vector.shape_cast %65 : vector<8x8x8xbf16> to vector<64x8xbf16>
    %c2_84 = arith.constant 2 : index
    %c0_85 = arith.constant 0 : index
    %c0_86 = arith.constant 0 : index
    %c0_87 = arith.constant 0 : index
    %67 = vector.load %arg5[%c2_84, %c0_85, %c0_86, %c0_87] : memref<3x3x8x8xbf16, #tpu.memory_space<vmem>>, vector<1x1x8x8xbf16>
    %68 = vector.shape_cast %67 : vector<1x1x8x8xbf16> to vector<8x8xbf16>
    %cst_88 = arith.constant dense<0.000000e+00> : vector<64x8xf32>
    %69 = tpu.matmul %66, %68, %cst_88 {dimension_numbers = #tpu.dot_dimension_numbers<[1], [0], [0], [1], [0, 0, 1, 1], [], []>} : vector<64x8xbf16>, vector<8x8xbf16>, vector<64x8xf32> -> vector<64x8xf32>
    %70 = arith.addf %63, %69 : vector<64x8xf32>
    %c0_89 = arith.constant 0 : index
    %c0_90 = arith.constant 0 : index
    %c2_91 = arith.constant 2 : index
    %c1_92 = arith.constant 1 : index
    %c0_93 = arith.constant 0 : index
    %71 = vector.load %arg10[%c0_89, %c0_90, %c2_91, %c1_92, %c0_93] : memref<1x1x10x10x8xbf16, #tpu.memory_space<vmem>>, vector<1x1x8x8x8xbf16>
    %72 = vector.shape_cast %71 : vector<1x1x8x8x8xbf16> to vector<8x8x8xbf16>
    %73 = vector.shape_cast %72 : vector<8x8x8xbf16> to vector<64x8xbf16>
    %c2_94 = arith.constant 2 : index
    %c1_95 = arith.constant 1 : index
    %c0_96 = arith.constant 0 : index
    %c0_97 = arith.constant 0 : index
    %74 = vector.load %arg5[%c2_94, %c1_95, %c0_96, %c0_97] : memref<3x3x8x8xbf16, #tpu.memory_space<vmem>>, vector<1x1x8x8xbf16>
    %75 = vector.shape_cast %74 : vector<1x1x8x8xbf16> to vector<8x8xbf16>
    %cst_98 = arith.constant dense<0.000000e+00> : vector<64x8xf32>
    %76 = tpu.matmul %73, %75, %cst_98 {dimension_numbers = #tpu.dot_dimension_numbers<[1], [0], [0], [1], [0, 0, 1, 1], [], []>} : vector<64x8xbf16>, vector<8x8xbf16>, vector<64x8xf32> -> vector<64x8xf32>
    %77 = arith.addf %70, %76 : vector<64x8xf32>
    %c0_99 = arith.constant 0 : index
    %c0_100 = arith.constant 0 : index
    %c2_101 = arith.constant 2 : index
    %c2_102 = arith.constant 2 : index
    %c0_103 = arith.constant 0 : index
    %78 = vector.load %arg10[%c0_99, %c0_100, %c2_101, %c2_102, %c0_103] : memref<1x1x10x10x8xbf16, #tpu.memory_space<vmem>>, vector<1x1x8x8x8xbf16>
    %79 = vector.shape_cast %78 : vector<1x1x8x8x8xbf16> to vector<8x8x8xbf16>
    %80 = vector.shape_cast %79 : vector<8x8x8xbf16> to vector<64x8xbf16>
    %c2_104 = arith.constant 2 : index
    %c2_105 = arith.constant 2 : index
    %c0_106 = arith.constant 0 : index
    %c0_107 = arith.constant 0 : index
    %81 = vector.load %arg5[%c2_104, %c2_105, %c0_106, %c0_107] : memref<3x3x8x8xbf16, #tpu.memory_space<vmem>>, vector<1x1x8x8xbf16>
    %82 = vector.shape_cast %81 : vector<1x1x8x8xbf16> to vector<8x8xbf16>
    %cst_108 = arith.constant dense<0.000000e+00> : vector<64x8xf32>
    %83 = tpu.matmul %80, %82, %cst_108 {dimension_numbers = #tpu.dot_dimension_numbers<[1], [0], [0], [1], [0, 0, 1, 1], [], []>} : vector<64x8xbf16>, vector<8x8xbf16>, vector<64x8xf32> -> vector<64x8xf32>
    %84 = arith.addf %77, %83 : vector<64x8xf32>
    %cst_109 = arith.constant dense<0.000000e+00> : vector<8xf32>
    %85 = vector.multi_reduction <add>, %84, %cst_109 [0] : vector<64x8xf32> to vector<8xf32>
    %86 = vector.shape_cast %85 : vector<8xf32> to vector<1x8xf32>
    %c0_110 = arith.constant 0 : index
    %c0_111 = arith.constant 0 : index
    %c0_112 = arith.constant 0 : index
    %87 = vector.load %arg8[%c0_110, %c0_111, %c0_112] : memref<1x1x8xf32, #tpu.memory_space<vmem>>, vector<1x1x8xf32>
    %88 = vector.shape_cast %87 : vector<1x1x8xf32> to vector<1x8xf32>
    %89 = vector.shape_cast %86 : vector<1x8xf32> to vector<1x1x8xf32>
    tpu.vector_store %arg8[%c0_110, %c0_111, %c0_112], %89 {strides = array<i32>} : memref<1x1x8xf32, #tpu.memory_space<vmem>>, vector<1x1x8xf32>,
    %90 = arith.mulf %84, %84 : vector<64x8xf32>
    %cst_113 = arith.constant dense<0.000000e+00> : vector<8xf32>
    %91 = vector.multi_reduction <add>, %90, %cst_113 [0] : vector<64x8xf32> to vector<8xf32>
    %92 = vector.shape_cast %91 : vector<8xf32> to vector<1x8xf32>
    %c0_114 = arith.constant 0 : index
    %c0_115 = arith.constant 0 : index
    %c0_116 = arith.constant 0 : index
    %93 = vector.load %arg9[%c0_114, %c0_115, %c0_116] : memref<1x1x8xf32, #tpu.memory_space<vmem>>, vector<1x1x8xf32>
    %94 = vector.shape_cast %93 : vector<1x1x8xf32> to vector<1x8xf32>
    %95 = vector.shape_cast %92 : vector<1x8xf32> to vector<1x1x8xf32>
    tpu.vector_store %arg9[%c0_114, %c0_115, %c0_116], %95 {strides = array<i32>} : memref<1x1x8xf32, #tpu.memory_space<vmem>>, vector<1x1x8xf32>,
    %c0_117 = arith.constant 0 : index
    %c0_118 = arith.constant 0 : index
    %c0_119 = arith.constant 0 : index
    %c0_120 = arith.constant 0 : index
    %96 = vector.load %arg6[%c0_117, %c0_118, %c0_119, %c0_120] : memref<1x8x8x8xbf16, #tpu.memory_space<vmem>>, vector<1x8x8x8xbf16>
    %97 = vector.shape_cast %96 : vector<1x8x8x8xbf16> to vector<8x8x8xbf16>
    %98 = vector.shape_cast %97 : vector<8x8x8xbf16> to vector<64x8xbf16>
    %99 = arith.extf %98 : vector<64x8xbf16> to vector<64x8xf32>
    %100 = arith.addf %84, %99 : vector<64x8xf32>
    %101 = vector.shape_cast %100 : vector<64x8xf32> to vector<8x8x8xf32>
    %c0_121 = arith.constant 0 : index
    %c0_122 = arith.constant 0 : index
    %c0_123 = arith.constant 0 : index
    %c0_124 = arith.constant 0 : index
    %102 = vector.load %arg7[%c0_121, %c0_122, %c0_123, %c0_124] : memref<1x8x8x8xf32, #tpu.memory_space<vmem>>, vector<1x8x8x8xf32>
    %103 = vector.shape_cast %102 : vector<1x8x8x8xf32> to vector<8x8x8xf32>
    %104 = vector.shape_cast %101 : vector<8x8x8xf32> to vector<1x8x8x8xf32>
    tpu.vector_store %arg7[%c0_121, %c0_122, %c0_123, %c0_124], %104 {strides = array<i32>} : memref<1x8x8x8xf32, #tpu.memory_space<vmem>>, vector<1x8x8x8xf32>,
    return
  }
  func.func @transform_0(%arg0: i32, %arg1: i32) -> (i32, i32, i32, i32, i32, i32) {
    %c0_i32 = arith.constant 0 : i32
    %c0_i32_0 = arith.constant 0 : i32
    %c0_i32_1 = arith.constant 0 : i32
    %c0_i32_2 = arith.constant 0 : i32
    %c0_i32_3 = arith.constant 0 : i32
    %c0_i32_4 = arith.constant 0 : i32
    return %arg0, %c0_i32, %c0_i32_0, %c0_i32_1, %c0_i32_2, %c0_i32_3 : i32, i32, i32, i32, i32, i32
  }
  func.func @transform_1(%arg0: i32, %arg1: i32) -> (i32, i32) {
    %c0_i32 = arith.constant 0 : i32
    %c0_i32_0 = arith.constant 0 : i32
    %c0_i32_1 = arith.constant 0 : i32
    return %c0_i32, %c0_i32_0 : i32, i32
  }
  func.func @transform_2(%arg0: i32, %arg1: i32) -> (i32, i32) {
    %c0_i32 = arith.constant 0 : i32
    %c0_i32_0 = arith.constant 0 : i32
    %c0_i32_1 = arith.constant 0 : i32
    return %c0_i32, %c0_i32_0 : i32, i32
  }
  func.func @transform_3(%arg0: i32, %arg1: i32) -> (i32, i32, i32, i32) {
    %c0_i32 = arith.constant 0 : i32
    %c0_i32_0 = arith.constant 0 : i32
    %c0_i32_1 = arith.constant 0 : i32
    %c0_i32_2 = arith.constant 0 : i32
    return %c0_i32, %c0_i32_0, %c0_i32_1, %arg1 : i32, i32, i32, i32
  }
  func.func @transform_4(%arg0: i32, %arg1: i32) -> (i32, i32, i32, i32) {
    %c0_i32 = arith.constant 0 : i32
    %c0_i32_0 = arith.constant 0 : i32
    %c0_i32_1 = arith.constant 0 : i32
    return %arg0, %c0_i32, %c0_i32_0, %arg1 : i32, i32, i32, i32
  }
  func.func @transform_5(%arg0: i32, %arg1: i32) -> (i32, i32, i32, i32) {
    %c0_i32 = arith.constant 0 : i32
    %c0_i32_0 = arith.constant 0 : i32
    %c0_i32_1 = arith.constant 0 : i32
    return %arg0, %c0_i32, %c0_i32_0, %arg1 : i32, i32, i32, i32
  }
  func.func @transform_6(%arg0: i32, %arg1: i32) -> (i32, i32, i32) {
    %c0_i32 = arith.constant 0 : i32
    %c0_i32_0 = arith.constant 0 : i32
    return %arg0, %c0_i32, %arg1 : i32, i32, i32
  }
  func.func @transform_7(%arg0: i32, %arg1: i32) -> (i32, i32, i32) {
    %c0_i32 = arith.constant 0 : i32
    %c0_i32_0 = arith.constant 0 : i32
    return %arg0, %c0_i32, %arg1 : i32, i32, i32
  }
}

</mosaic_0001>

<bundles_post_ra>
// kernel: _lambda_.5
= control target key start
LH: loop header
LB: loop body
LE: loop exit
PB: predicated region body
PF: predicated region fallthrough
CT: control target
= control target key end

     0   :  { %s468_s9 = smov 0   ;;  %s591_s0 = inlined_call_operand.vmem [shape: f32[2,16,16,4], index: 0, kind: input, shape index: {}]   ;;  %s592_s1 = inlined_call_operand.vmem [shape: f32[2,1,4], index: 1, kind: output, shape index: {0}]   ;;  %s593_s2 = inlined_call_operand.vmem [shape: f32[2,1,4], index: 2, kind: output, shape index: {1}]  }
   0x1 LB: > { %s427_s10 = sadd.s32 4294967295, %s451_s9   ;;  %p431_p0 = scmp.ge.s32.totalorder %s451_s9, 1  ;;  %s451_s9 = sphi %s468_s9, %s13_s9  }
   0x2   : > { %p115_p1 = scmp.lt.s32.totalorder %s451_s9, 3 }
   0x4   : > { %p116_p2 = pnand %p431_p0, %p115_p1 }
   0x5   : > { %p138_p3 = scmp.lt.s32.totalorder (!%p116_p2), %s427_s10, 1 }
   0x6   : > { %119 = sbr.rel (%p116_p2) target bundleno = 95 (0x5f), region = 24 }
   0xb   : > { %s595_s10 = smov (!%p138_p3, %s427_s10), 1  ;;  %vm181_vm0 = vcmask 31744   ;;  %vm251_vm1 = vcmask 24576  }
   0xc   : > { %s436_s11 = sshll.u32 %s595_s10, 8  ;;  %s145_s17 = scalar_lea.vmem %s592_s1, %s595_s10 }
   0xd   : > { %s482_s14 = scalar_lea.vmem %s591_s0, %s436_s11  ;;  %s148_s20 = scalar_lea.vmem %s593_s2, %s595_s10 }
   0xe   : > { %v149_v0 = vld [vmem:[%s482_s14] sm:$0xff]  ;;  %v150_v1 = vld [vmem:[%s482_s14 + $0x8] sm:$0xff]  ;;  %v151_v2 = vld [vmem:[%s482_s14 + $0x10] sm:$0xff] }
   0xf   : > { %v182_v3 = vsel %vm181_vm0, %v149_v0, 0.0  ;;  %v183_v4 = vsel %vm181_vm0, %v150_v1, 0.0  ;;  %v185_v5 = vsel %vm181_vm0, %v151_v2, 0.0  ;;  %v152_v6 = vld [vmem:[%s482_s14 + $0x18] sm:$0xff]  ;;  %v153_v9 = vld [vmem:[%s482_s14 + $0x20] sm:$0xff]  ;;  %v154_v12 = vld [vmem:[%s482_s14 + $0x28] sm:$0xff]  ;;  %v253_v20 = vmul.f32 %v149_v0, %v149_v0 }
  0x10   : > { %v184_v7 = vadd.f32 %v183_v4, %v182_v3  ;;  %v187_v8 = vsel %vm181_vm0, %v152_v6, 0.0  ;;  %v189_v11 = vsel %vm181_vm0, %v153_v9, 0.0  ;;  %v191_v14 = vsel %vm181_vm0, %v154_v12, 0.0  ;;  %v155_v15 = vld [vmem:[%s482_s14 + $0x30] sm:$0xff]  ;;  %v156_v18 = vld [vmem:[%s482_s14 + $0x38] sm:$0xff]  ;;  %v157_v24 = vld [vmem:[%s482_s14 + $0x40] sm:$0xff] }
  0x11   : > { %v193_v17 = vsel %vm181_vm0, %v155_v15, 0.0  ;;  %v195_v21 = vsel %vm181_vm0, %v156_v18, 0.0  ;;  %v254_v22 = vmul.f32 %v150_v1, %v150_v1  ;;  %v255_v23 = vmul.f32 %v151_v2, %v151_v2  ;;  %v158_v28 = vld [vmem:[%s482_s14 + $0x48] sm:$0xff]  ;;  %v159_v35 = vld [vmem:[%s482_s14 + $0x50] sm:$0xff]  ;;  %v160_v41 = vld [vmem:[%s482_s14 + $0x58] sm:$0xff] }
  0x12   : > { %v186_v10 = vadd.f32 %v185_v5, %v184_v7  ;;  %v197_v26 = vsel %vm181_vm0, %v157_v24, 0.0  ;;  %v256_v27 = vmul.f32 %v152_v6, %v152_v6  ;;  %v285_v30 = vsel %vm181_vm0, %v253_v20, 0.0  ;;  %v161_v47 = vld [vmem:[%s482_s14 + $0x60] sm:$0xff]  ;;  %v162_v53 = vld [vmem:[%s482_s14 + $0x68] sm:$0xff]  ;;  %v163_v59 = vld [vmem:[%s482_s14 + $0x70] sm:$0xff] }
  0x13   : > { %v199_v31 = vsel %vm181_vm0, %v158_v28, 0.0  ;;  %v257_v32 = vmul.f32 %v153_v9, %v153_v9  ;;  %v286_v33 = vsel %vm181_vm0, %v254_v22, 0.0  ;;  %v288_v34 = vsel %vm181_vm0, %v255_v23, 0.0  ;;  %v164_v1 = vld [vmem:[%s482_s14 + $0x78] sm:$0xff]  ;;  %v165_v7 = vld [vmem:[%s482_s14 + $0x80] sm:$0xff] }
  0x14   : > { %v188_v13 = vadd.f32 %v187_v8, %v186_v10  ;;  %v287_v37 = vadd.f32 %v286_v33, %v285_v30  ;;  %v201_v38 = vsel %vm181_vm0, %v159_v35, 0.0  ;;  %v258_v39 = vmul.f32 %v154_v12, %v154_v12 }
  0x15   : > { %v290_v40 = vsel %vm181_vm0, %v256_v27, 0.0  ;;  %v203_v44 = vsel %vm181_vm0, %v160_v41, 0.0  ;;  %v259_v45 = vmul.f32 %v155_v15, %v155_v15  ;;  %v292_v46 = vsel %vm181_vm0, %v257_v32, 0.0 }
  0x16   : > { %v190_v16 = vadd.f32 %v189_v11, %v188_v13  ;;  %v289_v43 = vadd.f32 %v288_v34, %v287_v37  ;;  %v205_v50 = vsel %vm181_vm0, %v161_v47, 0.0  ;;  %v260_v51 = vmul.f32 %v156_v18, %v156_v18  ;;  %v166_v13 = vld [vmem:[%s482_s14 + $0x88] sm:$0xff] }
  0x17   : > { %v294_v52 = vsel %vm181_vm0, %v258_v39, 0.0  ;;  %v207_v56 = vsel %vm181_vm0, %v162_v53, 0.0  ;;  %v261_v57 = vmul.f32 %v157_v24, %v157_v24  ;;  %v296_v58 = vsel %vm181_vm0, %v259_v45, 0.0  ;;  %v170_v37 = vld [vmem:[%s482_s14 + $0xa8] sm:$0xff] }
  0x18   : > { %v192_v19 = vadd.f32 %v191_v14, %v190_v16  ;;  %v291_v49 = vadd.f32 %v290_v40, %v289_v43  ;;  %v209_v62 = vsel %vm181_vm0, %v163_v59, 0.0  ;;  %v262_v63 = vmul.f32 %v158_v28, %v158_v28  ;;  %v171_v43 = vld [vmem:[%s482_s14 + $0xb0] sm:$0xff] }
  0x19   : > { %v298_v0 = vsel %vm181_vm0, %v260_v51, 0.0  ;;  %v211_v4 = vsel %vm181_vm0, %v164_v1, 0.0  ;;  %v263_v5 = vmul.f32 %v159_v35, %v159_v35  ;;  %v300_v6 = vsel %vm181_vm0, %v261_v57, 0.0 }
  0x1a   : > { %v194_v25 = vadd.f32 %v193_v17, %v192_v19  ;;  %v293_v55 = vadd.f32 %v292_v46, %v291_v49  ;;  %v213_v10 = vsel %vm181_vm0, %v165_v7, 0.0  ;;  %v264_v11 = vmul.f32 %v160_v41, %v160_v41  ;;  %v167_v19 = vld [vmem:[%s482_s14 + $0x90] sm:$0xff]  ;;  %v172_v49 = vld [vmem:[%s482_s14 + $0xb8] sm:$0xff] }
  0x1b   : > { %v302_v12 = vsel %vm181_vm0, %v262_v63, 0.0  ;;  %v215_v16 = vsel %vm181_vm0, %v166_v13, 0.0  ;;  %v265_v17 = vmul.f32 %v161_v47, %v161_v47  ;;  %v304_v18 = vsel %vm181_vm0, %v263_v5, 0.0 }
  0x1c   : > { %v196_v29 = vadd.f32 %v195_v21, %v194_v25  ;;  %v295_v61 = vadd.f32 %v294_v52, %v293_v55  ;;  %v217_v22 = vsel %vm181_vm0, %v167_v19, 0.0  ;;  %v266_v23 = vmul.f32 %v162_v53, %v162_v53  ;;  %v168_v25 = vld [vmem:[%s482_s14 + $0x98] sm:$0xff]  ;;  %v173_v55 = vld [vmem:[%s482_s14 + $0xc0] sm:$0xff] }
  0x1d   : > { %v306_v24 = vsel %vm181_vm0, %v264_v11, 0.0  ;;  %v219_v28 = vsel %vm181_vm0, %v168_v25, 0.0  ;;  %v308_v30 = vsel %vm181_vm0, %v265_v17, 0.0  ;;  %v268_v35 = vmul.f32 %v164_v1, %v164_v1 }
  0x1e   : > { %v198_v36 = vadd.f32 %v197_v26, %v196_v29  ;;  %v297_v3 = vadd.f32 %v296_v58, %v295_v61  ;;  %v267_v29 = vmul.f32 %v163_v59, %v163_v59  ;;  %v223_v40 = vsel %vm181_vm0, %v170_v37, 0.0  ;;  %v174_v61 = vld [vmem:[%s482_s14 + $0xc8] sm:$0xff] }
  0x1f   : > { %v269_v41 = vmul.f32 %v165_v7, %v165_v7  ;;  %v225_v46 = vsel %vm181_vm0, %v171_v43, 0.0  ;;  %v270_v47 = vmul.f32 %v166_v13, %v166_v13  ;;  %v227_v52 = vsel %vm181_vm0, %v172_v49, 0.0 }
  0x20   : > { %v200_v42 = vadd.f32 %v199_v31, %v198_v36  ;;  %v299_v9 = vadd.f32 %v298_v0, %v297_v3  ;;  %v169_v31 = vld [vmem:[%s482_s14 + $0xa0] sm:$0xff]  ;;  %v310_v36 = vsel %vm181_vm0, %v266_v23, 0.0  ;;  %v271_v53 = vmul.f32 %v167_v19, %v167_v19  ;;  %v175_v3 = vld [vmem:[%s482_s14 + $0xd0] sm:$0xff] }
  0x21   : > { %v221_v34 = vsel %vm181_vm0, %v169_v31, 0.0  ;;  %v229_v58 = vsel %vm181_vm0, %v173_v55, 0.0  ;;  %v272_v59 = vmul.f32 %v168_v25, %v168_v25  ;;  %v231_v0 = vsel %vm181_vm0, %v174_v61, 0.0 }
  0x22   : > { %v202_v48 = vadd.f32 %v201_v38, %v200_v42  ;;  %v301_v15 = vadd.f32 %v300_v6, %v299_v9  ;;  %v312_v42 = vsel %vm181_vm0, %v267_v29, 0.0  ;;  %v273_v1 = vmul.f32 %v169_v31, %v169_v31  ;;  %v176_v9 = vld [vmem:[%s482_s14 + $0xd8] sm:$0xff] }
  0x23   : > { %v233_v6 = vsel %vm181_vm0, %v175_v3, 0.0  ;;  %v274_v7 = vmul.f32 %v170_v37, %v170_v37  ;;  %v275_v13 = vmul.f32 %v171_v43, %v171_v43  ;;  %v276_v19 = vmul.f32 %v172_v49, %v172_v49 }
  0x24   : > { %v204_v54 = vadd.f32 %v203_v44, %v202_v48  ;;  %v303_v21 = vadd.f32 %v302_v12, %v301_v15  ;;  %v314_v48 = vsel %vm181_vm0, %v268_v35, 0.0  ;;  %v235_v12 = vsel %vm181_vm0, %v176_v9, 0.0  ;;  %v177_v15 = vld [vmem:[%s482_s14 + $0xe0] sm:$0xff] }
  0x25   : > { %v277_v25 = vmul.f32 %v173_v55, %v173_v55  ;;  %v278_v31 = vmul.f32 %v174_v61, %v174_v61  ;;  %v279_v37 = vmul.f32 %v175_v3, %v175_v3 }
  0x26   : > { %v206_v60 = vadd.f32 %v205_v50, %v204_v54  ;;  %v305_v27 = vadd.f32 %v304_v18, %v303_v21  ;;  %v316_v54 = vsel %vm181_vm0, %v269_v41, 0.0  ;;  %v237_v18 = vsel %vm181_vm0, %v177_v15, 0.0  ;;  %v178_v21 = vld [vmem:[%s482_s14 + $0xe8] sm:$0xff] }
  0x27   : > { %v280_v41 = vmul.f32 %v176_v9, %v176_v9  ;;  %v282_v49 = vmul.f32 %v178_v21, %v178_v21 }
  0x28   : > { %v208_v2 = vadd.f32 %v207_v56, %v206_v60  ;;  %v307_v33 = vadd.f32 %v306_v24, %v305_v27  ;;  %v318_v60 = vsel %vm181_vm0, %v270_v47, 0.0  ;;  %v239_v24 = vsel %vm181_vm0, %v178_v21, 0.0  ;;  %v179_v27 = vld [vmem:[%s482_s14 + $0xf0] sm:$0xff] }
  0x2a   : > { %v210_v8 = vadd.f32 %v209_v62, %v208_v2  ;;  %v309_v39 = vadd.f32 %v308_v30, %v307_v33  ;;  %v320_v2 = vsel %vm181_vm0, %v271_v53, 0.0  ;;  %v241_v30 = vsel %vm181_vm0, %v179_v27, 0.0  ;;  %v180_v33 = vld [vmem:[%s482_s14 + $0xf8] sm:$0xff] }
  0x2b   : > { %v283_v53 = vmul.f32 %v179_v27, %v179_v27 }
  0x2c   : > { %v212_v14 = vadd.f32 %v211_v4, %v210_v8  ;;  %v311_v45 = vadd.f32 %v310_v36, %v309_v39  ;;  %v322_v8 = vsel %vm181_vm0, %v272_v59, 0.0  ;;  %v243_v36 = vsel %vm181_vm0, %v180_v33, 0.0 }
  0x2d   : > { %v344_v61 = vsel %vm181_vm0, %v283_v53, 0.0 }
  0x2e   : > { %v214_v20 = vadd.f32 %v213_v10, %v212_v14  ;;  %v313_v51 = vadd.f32 %v312_v42, %v311_v45  ;;  %v324_v14 = vsel %vm181_vm0, %v273_v1, 0.0  ;;  %v334_v42 = vsel %vm181_vm0, %v278_v31, 0.0 }
  0x2f   : > { %v281_v45 = vmul.f32 %v177_v15, %v177_v15 }
  0x30   : > { %v216_v26 = vadd.f32 %v215_v16, %v214_v20  ;;  %v315_v57 = vadd.f32 %v314_v48, %v313_v51  ;;  %v326_v20 = vsel %vm181_vm0, %v274_v7, 0.0 }
  0x32   : > { %v218_v32 = vadd.f32 %v217_v22, %v216_v26  ;;  %v317_v63 = vadd.f32 %v316_v54, %v315_v57  ;;  %v328_v26 = vsel %vm181_vm0, %v275_v13, 0.0  ;;  %v340_v54 = vsel %vm181_vm0, %v281_v45, 0.0 }
  0x33   : > { %v284_v57 = vmul.f32 %v180_v33, %v180_v33 }
  0x34   : > { %v220_v38 = vadd.f32 %v219_v28, %v218_v32  ;;  %v319_v5 = vadd.f32 %v318_v60, %v317_v63  ;;  %v330_v32 = vsel %vm181_vm0, %v276_v19, 0.0 }
  0x36   : > { %v222_v44 = vadd.f32 %v221_v34, %v220_v38  ;;  %v321_v11 = vadd.f32 %v320_v2, %v319_v5  ;;  %v332_v38 = vsel %vm181_vm0, %v277_v25, 0.0 }
  0x38   : > { %v224_v50 = vadd.f32 %v223_v40, %v222_v44  ;;  %v323_v17 = vadd.f32 %v322_v8, %v321_v11 }
  0x3a   : > { %v226_v56 = vadd.f32 %v225_v46, %v224_v50  ;;  %v325_v23 = vadd.f32 %v324_v14, %v323_v17  ;;  %v336_v46 = vsel %vm181_vm0, %v279_v37, 0.0  ;;  %v338_v50 = vsel %vm181_vm0, %v280_v41, 0.0 }
  0x3c   : > { %v228_v62 = vadd.f32 %v227_v52, %v226_v56  ;;  %v327_v29 = vadd.f32 %v326_v20, %v325_v23 }
  0x3e   : > { %v230_v4 = vadd.f32 %v229_v58, %v228_v62  ;;  %v329_v35 = vadd.f32 %v328_v26, %v327_v29  ;;  %v342_v58 = vsel %vm181_vm0, %v282_v49, 0.0 }
  0x40   : > { %v232_v10 = vadd.f32 %v231_v0, %v230_v4  ;;  %v331_v40 = vadd.f32 %v330_v32, %v329_v35  ;;  %v346_v0 = vsel %vm181_vm0, %v284_v57, 0.0 }
  0x42   : > { %v234_v16 = vadd.f32 %v233_v6, %v232_v10  ;;  %v333_v44 = vadd.f32 %v332_v38, %v331_v40 }
  0x44   : > { %v236_v22 = vadd.f32 %v235_v12, %v234_v16  ;;  %v335_v48 = vadd.f32 %v334_v42, %v333_v44 }
  0x46   : > { %v238_v28 = vadd.f32 %v237_v18, %v236_v22  ;;  %v337_v52 = vadd.f32 %v336_v46, %v335_v48 }
  0x48   : > { %v240_v34 = vadd.f32 %v239_v24, %v238_v28  ;;  %v339_v56 = vadd.f32 %v338_v50, %v337_v52 }
  0x4a   : > { %v242_v39 = vadd.f32 %v241_v30, %v240_v34  ;;  %v341_v60 = vadd.f32 %v340_v54, %v339_v56 }
  0x4c   : > { %v244_v43 = vadd.f32 %v243_v36, %v242_v39  ;;  %v343_v63 = vadd.f32 %v342_v58, %v341_v60 }
  0x4e   : > { %v245_v47 = vrot.slane %v244_v43, 4  ;;  %v345_v2 = vadd.f32 %v344_v61, %v343_v63 }
  0x50   : > { %v246_v51 = vadd.f32 %v245_v47, %v244_v43  ;;  %v347_v3 = vadd.f32 %v346_v0, %v345_v2 }
  0x52   : > { %v247_v55 = vrot.slane %v246_v51, 2  ;;  %v348_v4 = vrot.slane %v347_v3, 4 }
  0x54   : > { %v248_v59 = vadd.f32 %v247_v55, %v246_v51  ;;  %v349_v5 = vadd.f32 %v348_v4, %v347_v3 }
  0x56   : > { %v249_v62 = vrot.slane %v248_v59, 1  ;;  %v350_v6 = vrot.slane %v349_v5, 2 }
  0x58   : > { %v250_v1 = vadd.f32 %v249_v62, %v248_v59  ;;  %v351_v7 = vadd.f32 %v350_v6, %v349_v5 }
  0x5a   : > { %252 = vst.msk [vmem:[%s145_s17] sm:$0x1] %vm251_vm1, %v250_v1  ;;  %v352_v8 = vrot.slane %v351_v7, 1 }
  0x5c   : > { %v353_v9 = vadd.f32 %v352_v8, %v351_v7 }
  0x5e   : > { %354 = vst.msk [vmem:[%s148_s20] sm:$0x1] %vm251_vm1, %v353_v9 }
  0x5f PF: > { %s13_s9 = sadd.s32 1, %s451_s9  }
  0x60   : > { %p10_p4 = scmp.ge.s32.totalorder %s13_s9, 4  }
  0x62   :  { %12 = sbr.rel (!%p10_p4) target bundleno = 1 (0x1), region = 66 }

// kernel: _lambda_.6
= control target key start
LH: loop header
LB: loop body
LE: loop exit
PB: predicated region body
PF: predicated region fallthrough
CT: control target
= control target key end

     0   :  { %s474_s0 = inlined_call_operand.vmem [shape: f32[36,8], index: 0, kind: input, shape index: {}]   ;;  %s475_s1 = inlined_call_operand.vmem [shape: f32[36,8], index: 1, kind: input, shape index: {}]   ;;  %s476_s2 = inlined_call_operand.vmem [shape: f32[36,8], index: 2, kind: input, shape index: {}]   ;;  %s477_s3 = inlined_call_operand.vmem [shape: bf16[36,8], index: 3, kind: output, shape index: {0}]   ;;  %s478_s4 = inlined_call_operand.hbm [shape: f32[1,1], index: 4, kind: output, shape index: {1}]  }
   0x1   :  { %v319_v0 = vld [vmem:[%s475_s1] sm:$0xff]  ;;  %v324_v1 = vld [vmem:[%s475_s1 + $0x8] sm:$0xff]  ;;  %v329_v2 = vld [vmem:[%s475_s1 + $0x10] sm:$0xff] }
   0x2   :  { %v334_v3 = vld [vmem:[%s475_s1 + $0x18] sm:$0xff]  ;;  %v38_v4 = vand.u32 2147483647, %v319_v0  ;;  %v340_v5 = vld [vmem:[%s475_s1 + $0x20] sm:$0xf] }
   0x3   :  { %v39_v6 = vand.u32 2147483647, %v324_v1  ;;  %v40_v7 = vand.u32 2147483647, %v329_v2  ;;  %v41_v9 = vand.u32 2147483647, %v334_v3 }
   0x4   :  { %v43_v8 = vsub.f32 0.0, %v38_v4  ;;  %v42_v10 = vand.u32 2147483647, %v340_v5 }
   0x5   :  { %v44_v11 = vsub.f32 0.0, %v39_v6  ;;  %v45_v12 = vsub.f32 0.0, %v40_v7  ;;  %v46_v14 = vsub.f32 0.0, %v41_v9 }
   0x6   :  { %v48_v13 = vmul.f32 1.442695, %v43_v8  ;;  %v47_v15 = vsub.f32 0.0, %v42_v10 }
   0x7   :  { %10 = vsyncpa [#allocation3], 0  ;;  %v50_v16 = vmul.f32 1.442695, %v44_v11  ;;  %v52_v17 = vmul.f32 1.442695, %v45_v12 }
   0x8   :  { %233 = vpow2.f32 %v48_v13  ;;  %v54_v18 = vmul.f32 1.442695, %v46_v14  ;;  %v56_v19 = vmul.f32 1.442695, %v47_v15  ;;  %v33_v24 = vmax.f32 %v319_v0, 0.0  ;;  %v352_v35 = vld [vmem:[%s474_s0] sm:$0xff] }
   0x9   :  { %235 = vpow2.f32 %v50_v16  ;;  %v34_v26 = vmax.f32 %v324_v1, 0.0  ;;  %v35_v27 = vmax.f32 %v329_v2, 0.0  ;;  %v36_v36 = vmax.f32 %v334_v3, 0.0  ;;  %v358_v39 = vld [vmem:[%s474_s0 + $0x8] sm:$0xff]  ;;  %v364_v46 = vld [vmem:[%s474_s0 + $0x10] sm:$0xff]  ;;  %v26_v56 = vld [vmem:[%s474_s0 + $0x18] sm:$0xff] }
   0xa   :  { %237 = vpow2.f32 %v52_v17  ;;  %v37_v40 = vmax.f32 %v340_v5, 0.0  ;;  %v368_v50 = vmul.f32 %v352_v35, %v352_v35  ;;  %v376_v55 = vmul.f32 %v358_v39, %v358_v39  ;;  %v384_v61 = vld [vmem:[%s474_s0 + $0x20] sm:$0xf]  ;;  %v111_v1 = vld [vmem:[%s476_s2 + $0x18] sm:$0xff]  ;;  %s213_s28 = sshll.u32 %s478_s4, 4  ;;  %s214_s28 = int_to_ptr.hbm [resolvable:$true] %s213_s28 }
   0xb   :  { %239 = vpow2.f32 %v54_v18  ;;  %v157_v4 = vmul.f32 %v364_v46, %v364_v46  ;;  %v108_v11 = vld [vmem:[%s476_s2] sm:$0xff]  ;;  %vm128_vm3 = vcmask 60416   ;;  %v158_v16 = vmul.f32 %v26_v56, %v26_v56 }
   0xc   :  { %241 = vpow2.f32 %v56_v19  ;;  %vm133_vm6 = vcmask 58368   ;;  %vm181_vm7 = vcmask 64512   ;;  %vm21_vm8 = vcmask 0  }
   0xe   :  { %v234_v20 = vpop.eup %233 }
   0xf   :  { %v58_v21 = vadd.f32 1.0, %v234_v20  ;;  %v61_v22 = vmul.f32 -0.5, %v234_v20  ;;  %v236_v23 = vpop.eup %235  ;;  %v64_v37 = vand.u32 2147483647, %v234_v20 }
  0x10   :  { %v238_v25 = vpop.eup %237  ;;  %v67_v28 = vadd.f32 1.0, %v236_v23  ;;  %v70_v31 = vmul.f32 -0.5, %v236_v23  ;;  %v73_v42 = vand.u32 2147483647, %v236_v23 }
  0x11   :  { %243 = vlog2.f32 %v58_v21  ;;  %v240_v29 = vpop.eup %239  ;;  %v62_v30 = vadd.f32 1.0, %v61_v22  ;;  %v76_v32 = vadd.f32 1.0, %v238_v25  ;;  %v79_v33 = vmul.f32 -0.5, %v238_v25 }
  0x12   :  { %v242_v34 = vpop.eup %241  ;;  %245 = vlog2.f32 %v67_v28  ;;  %v85_v38 = vadd.f32 1.0, %v240_v29  ;;  %v71_v41 = vadd.f32 1.0, %v70_v31  ;;  %v82_v44 = vand.u32 2147483647, %v238_v25 }
  0x13   :  { %247 = vlog2.f32 %v76_v32  ;;  %v80_v43 = vadd.f32 1.0, %v79_v33  ;;  %v88_v45 = vmul.f32 -0.5, %v240_v29  ;;  %v63_v47 = vmul.f32 %v234_v20, %v62_v30  ;;  %v109_v20 = vld [vmem:[%s476_s2 + $0x8] sm:$0xff] }
  0x14   :  { %249 = vlog2.f32 %v85_v38  ;;  %v94_v48 = vadd.f32 1.0, %v242_v34  ;;  %v97_v49 = vmul.f32 -0.5, %v242_v34  ;;  %vm370_vm0 = vcmp.lt.f32.partialorder %v64_v37, 0.0004427343 }
  0x15   :  { %v89_v53 = vadd.f32 1.0, %v88_v45  ;;  %v91_v54 = vand.u32 2147483647, %v240_v29  ;;  %v72_v58 = vmul.f32 %v236_v23, %v71_v41  ;;  %vm386_vm1 = vcmp.lt.f32.partialorder %v73_v42, 0.0004427343 }
  0x16   :  { %251 = vlog2.f32 %v94_v48  ;;  %v98_v59 = vadd.f32 1.0, %v97_v49  ;;  %v81_v63 = vmul.f32 %v238_v25, %v80_v43  ;;  %vm390_vm2 = vcmp.lt.f32.partialorder %v82_v44, 0.0004427343 }
  0x17   :  { %v244_v51 = vpop.eup %243  ;;  %v90_v9 = vmul.f32 %v240_v29, %v89_v53  ;;  %v100_v10 = vand.u32 2147483647, %v242_v34  ;;  %vm401_vm4 = vcmp.lt.f32.partialorder %v91_v54, 0.0004427343  ;;  %v159_v21 = vmul.f32 %v384_v61, %v384_v61 }
  0x18   :  { %v60_v57 = vmul.f32 0.6931472, %v244_v51  ;;  %v246_v60 = vpop.eup %245  ;;  %v99_v19 = vmul.f32 %v242_v34, %v98_v59 }
  0x19   :  { %v248_v6 = vpop.eup %247  ;;  %v69_v8 = vmul.f32 0.6931472, %v246_v60  ;;  %vm421_vm5 = vcmp.lt.f32.partialorder %v100_v10, 0.0004427343 }
  0x1a   :  { %v66_v7 = vsel %vm370_vm0, %v63_v47, %v60_v57  ;;  %v250_v12 = vpop.eup %249  ;;  %v78_v13 = vmul.f32 0.6931472, %v248_v6 }
  0x1b   :  { %v103_v15 = vadd.f32 %v66_v7, %v33_v24  ;;  %v75_v17 = vsel %vm386_vm1, %v72_v58, %v69_v8  ;;  %v87_v18 = vmul.f32 0.6931472, %v250_v12  ;;  %v110_v24 = vld [vmem:[%s476_s2 + $0x10] sm:$0xff] }
  0x1c   :  { %v84_v22 = vsel %vm390_vm2, %v81_v63, %v78_v13  ;;  %v104_v23 = vadd.f32 %v75_v17, %v34_v26  ;;  %v252_v28 = vpop.eup %251 }
  0x1d   :  { %v113_v25 = vmul.f32 %v108_v11, %v103_v15  ;;  %253 = vlog2.f32 %v103_v15  ;;  %v93_v29 = vsel %vm401_vm4, %v90_v9, %v87_v18  ;;  %v105_v31 = vadd.f32 %v84_v22, %v35_v27  ;;  %v112_v27 = vld [vmem:[%s476_s2 + $0x20] sm:$0xf] }
  0x1e   :  { %v150_v26 = vmul.f32 %v103_v15, %v103_v15  ;;  %v96_v32 = vmul.f32 0.6931472, %v252_v28  ;;  %v106_v33 = vadd.f32 %v93_v29, %v36_v36  ;;  %v114_v34 = vmul.f32 %v109_v20, %v104_v23 }
  0x1f   :  { %v118_v37 = vadd.f32 %v113_v25, %v352_v35  ;;  %v115_v38 = vmul.f32 %v110_v24, %v105_v31  ;;  %255 = vlog2.f32 %v104_v23  ;;  %v151_v41 = vmul.f32 %v104_v23, %v104_v23 }
  0x20   :  { %v152_v42 = vmul.f32 %v105_v31, %v105_v31  ;;  %v102_v2 = vsel %vm421_vm5, %v99_v19, %v96_v32  ;;  %v116_v43 = vmul.f32 %v111_v1, %v106_v33  ;;  %v119_v44 = vadd.f32 %v114_v34, %v358_v39 }
  0x21   :  { %v123_v45 = vpack.c.bf16 %v118_v37, %v118_v37  ;;  %v107_v3 = vadd.f32 %v102_v2, %v37_v40  ;;  %v120_v35 = vadd.f32 %v115_v38, %v364_v46  ;;  %257 = vlog2.f32 %v105_v31 }
  0x22   :  { %v153_v36 = vmul.f32 %v106_v33, %v106_v33  ;;  %v121_v48 = vadd.f32 %v116_v43, %v26_v56  ;;  %v124_v49 = vpack.c.bf16 %v119_v44, %v119_v44  ;;  %259 = vlog2.f32 %v106_v33 }
  0x23   :  { %v254_v47 = vpop.eup %253  ;;  %129 = vst.msk [vmem:[%s477_s3] sm:$0xf] %vm128_vm3, %v123_v45  ;;  %v160_v51 = vadd.f32 %v368_v50, %v150_v26  ;;  %v117_v39 = vmul.f32 %v112_v27, %v107_v3  ;;  %v125_v52 = vpack.c.bf16 %v120_v35, %v120_v35  ;;  %261 = vlog2.f32 %v107_v3 }
  0x24   :  { %v136_v53 = vmul.f32 0.6931472, %v254_v47  ;;  %v126_v5 = vpack.c.bf16 %v121_v48, %v121_v48  ;;  %130 = vst.msk [vmem:[%s477_s3 + $0x4] sm:$0xf] %vm128_vm3, %v124_v49  ;;  %v154_v40 = vmul.f32 %v107_v3, %v107_v3  ;;  %v161_v46 = vadd.f32 %v376_v55, %v151_v41 }
  0x25   :  { %v162_v54 = vadd.f32 %v157_v4, %v152_v42  ;;  %v256_v56 = vpop.eup %255  ;;  %v122_v57 = vadd.f32 %v117_v39, %v384_v61  ;;  %131 = vst.msk [vmem:[%s477_s3 + $0x8] sm:$0xf] %vm128_vm3, %v125_v52  ;;  %v163_v58 = vadd.f32 %v158_v16, %v153_v36  ;;  %v165_v59 = vmul.f32 0.5, %v160_v51 }
  0x26   :  { %v145_v50 = vsub.f32 0.0, %v136_v53  ;;  %132 = vst.msk [vmem:[%s477_s3 + $0xc] sm:$0xf] %vm128_vm3, %v126_v5  ;;  %v138_v60 = vmul.f32 0.6931472, %v256_v56  ;;  %v164_v55 = vadd.f32 %v159_v21, %v154_v40  ;;  %v166_v62 = vmul.f32 0.5, %v161_v46 }
  0x27   :  { %v258_v63 = vpop.eup %257  ;;  %v127_v0 = vpack.c.bf16 %v122_v57, %v122_v57  ;;  %v167_v8 = vmul.f32 0.5, %v162_v54  ;;  %v168_v11 = vmul.f32 0.5, %v163_v58  ;;  %v289_v37 = vmov 0.0  }
  0x28   :  { %v170_v61 = vadd.f32 %v165_v59, %v145_v50  ;;  %v260_v4 = vpop.eup %259  ;;  %v140_v6 = vmul.f32 0.6931472, %v258_v63  ;;  %v146_v7 = vsub.f32 0.0, %v138_v60  ;;  %v169_v15 = vmul.f32 0.5, %v164_v55  ;;  %22 = vst.msk [vmem:[#allocation2] sm:$0x1] %vm21_vm8, %v289_v37 }
  0x29   :  { %v262_v9 = vpop.eup %261  ;;  %134 = vst.msk [vmem:[%s477_s3 + $0x10] sm:$0x3] %vm133_vm6, %v127_v0  ;;  %v142_v10 = vmul.f32 0.6931472, %v260_v4  ;;  %s290_s3 = smov [#allocation2]  }
  0x2a   :  { %v224_v12 = vadd.f32 -0.5, %v170_v61  ;;  %v144_v13 = vmul.f32 0.6931472, %v262_v9  ;;  %v147_v14 = vsub.f32 0.0, %v140_v6  ;;  %v171_v16 = vadd.f32 %v166_v62, %v146_v7  ;;  %s211_s25 = sshll.u32 %s290_s3, 4  ;;  %s212_s25 = int_to_ptr.vmem [resolvable:$true] %s211_s25 }
  0x2b   :  { %v148_v17 = vsub.f32 0.0, %v142_v10 }
  0x2c   :  { %v149_v18 = vsub.f32 0.0, %v144_v13  ;;  %v172_v19 = vadd.f32 %v167_v8, %v147_v14  ;;  %v225_v20 = vadd.f32 -0.5, %v171_v16  ;;  %v182_v21 = vsel %vm181_vm7, %v224_v12, 0.0 }
  0x2d   :  { %v173_v22 = vadd.f32 %v168_v11, %v148_v17 }
  0x2e   :  { %v174_v23 = vadd.f32 %v169_v15, %v149_v18  ;;  %v226_v24 = vadd.f32 -0.5, %v172_v19  ;;  %v183_v25 = vsel %vm181_vm7, %v225_v20, 0.0 }
  0x2f   :  { %v227_v28 = vadd.f32 -0.5, %v173_v22  ;;  %v184_v29 = vadd.f32 %v183_v25, %v182_v21  ;;  %v180_v45 = vld [vmem:[#allocation2] sm:$0x1] }
  0x30   :  { %v228_v30 = vadd.f32 -0.5, %v174_v23  ;;  %v185_v31 = vsel %vm181_vm7, %v226_v24, 0.0 }
  0x31   :  { %v186_v1 = vadd.f32 %v185_v31, %v184_v29  ;;  %v187_v26 = vsel %vm181_vm7, %v227_v28, 0.0 }
  0x32   :  { %v189_v32 = vsel %vm128_vm3, %v228_v30, 0.0 }
  0x33   :  { %v188_v33 = vadd.f32 %v187_v26, %v186_v1 }
  0x35   :  { %v190_v34 = vadd.f32 %v189_v32, %v188_v33 }
  0x37   :  { %191 = vadd.xlane.f32.xlu0 %v190_v34 }
  0xaa   :  { %v192_v38 = vpop.xlane.xlu0 %191 }
  0xab   :  { %v193_v41 = vrot.slane %v192_v38, 4 }
  0xad   :  { %v194_v42 = vadd.f32 %v193_v41, %v192_v38 }
  0xaf   :  { %v195_v2 = vrot.slane %v194_v42, 2 }
  0xb1   :  { %v196_v27 = vadd.f32 %v195_v2, %v194_v42 }
  0xb3   :  { %v197_v43 = vrot.slane %v196_v27, 1 }
  0xb5   :  { %v198_v44 = vadd.f32 %v197_v43, %v196_v27 }
  0xb7   :  { %229 = vpush %v198_v44 }
  0xe8   :  { %s230_s29 = spop %229 }
  0xe9   :  { %v200_v3 = vstv %s230_s29 }
  0xea   :  { %v201_v35 = vadd.f32 %v200_v3, %v180_v45 }
  0xec   :  { %203 = vst.msk [vmem:[#allocation2] sm:$0x1] %vm21_vm8, %v201_v35 }
  0xed   :  { %216 = dma.vmem_to_hbm [thread:$0]  %s212_s25, 16, %s214_s28, [#allocation3]  }
  0xee   :  { %287 = dma.done.wait [#allocation3], 16  }
  0xef   :  { %288 = vsyncadd [#allocation3], 4294967280 }
  0xf0   :  { %223 = vsyncpa [#allocation3], 1 }

// kernel: _lambda_.7
= control target key start
LH: loop header
LB: loop body
LE: loop exit
PB: predicated region body
PF: predicated region fallthrough
CT: control target
= control target key end

     0   :  { %10 = vsyncpa [#allocation3], 0  ;;  %vm21_vm0 = vcmask 0   ;;  %v448_v0 = vmov 0.0   ;;  %vm212_vm10 = vcmask 60416   ;;  %vm304_vm11 = vcmask 64512   ;;  %s792_s0 = inlined_call_operand.vmem [shape: f32[72,8], index: 0, kind: input, shape index: {}]   ;;  %s793_s1 = inlined_call_operand.vmem [shape: f32[72,8], index: 1, kind: input, shape index: {}]   ;;  %s794_s2 = inlined_call_operand.vmem [shape: f32[72,8], index: 2, kind: input, shape index: {}]   ;;  %s795_s3 = inlined_call_operand.vmem [shape: bf16[72,8], index: 3, kind: output, shape index: {0}]   ;;  %s796_s4 = inlined_call_operand.hbm [shape: f32[1,1], index: 4, kind: output, shape index: {1}]  }
   0x1   :  { %22 = vst.msk [vmem:[#allocation2] sm:$0x1] %vm21_vm0, %v448_v0  ;;  %v479_v1 = vld [vmem:[%s793_s1] sm:$0xff]  ;;  %v484_v2 = vld [vmem:[%s793_s1 + $0x8] sm:$0xff]  ;;  %v489_v3 = vld [vmem:[%s793_s1 + $0x10] sm:$0xff]  ;;  %s344_s7 = sshll.u32 %s796_s4, 4  ;;  %s345_s7 = int_to_ptr.hbm [resolvable:$true] %s344_s7 }
   0x2   :  { %v494_v4 = vld [vmem:[%s793_s1 + $0x18] sm:$0xff]  ;;  %v499_v5 = vld [vmem:[%s793_s1 + $0x20] sm:$0xff]  ;;  %v504_v6 = vld [vmem:[%s793_s1 + $0x28] sm:$0xff]  ;;  %v50_v10 = vand.u32 2147483647, %v479_v1  ;;  %v41_v35 = vmax.f32 %v479_v1, 0.0 }
   0x3   :  { %v509_v7 = vld [vmem:[%s793_s1 + $0x30] sm:$0xff]  ;;  %v514_v8 = vld [vmem:[%s793_s1 + $0x38] sm:$0xff]  ;;  %v519_v9 = vld [vmem:[%s793_s1 + $0x40] sm:$0xff]  ;;  %v51_v11 = vand.u32 2147483647, %v484_v2  ;;  %v42_v37 = vmax.f32 %v484_v2, 0.0 }
   0x4   :  { %v52_v12 = vand.u32 2147483647, %v489_v3  ;;  %v53_v13 = vand.u32 2147483647, %v494_v4  ;;  %v54_v14 = vand.u32 2147483647, %v499_v5 }
   0x5   :  { %v55_v15 = vand.u32 2147483647, %v504_v6  ;;  %v56_v16 = vand.u32 2147483647, %v509_v7  ;;  %v57_v17 = vand.u32 2147483647, %v514_v8 }
   0x6   :  { %v58_v18 = vand.u32 2147483647, %v519_v9  ;;  %v59_v19 = vsub.f32 0.0, %v50_v10  ;;  %v60_v20 = vsub.f32 0.0, %v51_v11  ;;  %v61_v21 = vsub.f32 0.0, %v52_v12 }
   0x7   :  { %v62_v22 = vsub.f32 0.0, %v53_v13  ;;  %v63_v23 = vsub.f32 0.0, %v54_v14  ;;  %v64_v24 = vsub.f32 0.0, %v55_v15  ;;  %v65_v25 = vsub.f32 0.0, %v56_v16 }
   0x8   :  { %v68_v26 = vmul.f32 1.442695, %v59_v19  ;;  %v70_v27 = vmul.f32 1.442695, %v60_v20  ;;  %v66_v28 = vsub.f32 0.0, %v57_v17  ;;  %v67_v31 = vsub.f32 0.0, %v58_v18 }
   0x9   :  { %v72_v29 = vmul.f32 1.442695, %v61_v21  ;;  %v74_v30 = vmul.f32 1.442695, %v62_v22  ;;  %v76_v32 = vmul.f32 1.442695, %v63_v23 }
   0xa   :  { %368 = vpow2.f32 %v68_v26  ;;  %v78_v33 = vmul.f32 1.442695, %v64_v24  ;;  %v80_v34 = vmul.f32 1.442695, %v65_v25  ;;  %v82_v36 = vmul.f32 1.442695, %v66_v28 }
   0xb   :  { %370 = vpow2.f32 %v70_v27  ;;  %v43_v38 = vmax.f32 %v489_v3, 0.0  ;;  %v84_v39 = vmul.f32 1.442695, %v67_v31  ;;  %v44_v40 = vmax.f32 %v494_v4, 0.0  ;;  %v176_v24 = vld [vmem:[%s794_s2] sm:$0xff]  ;;  %v30_v18 = vld [vmem:[%s792_s0 + $0x38] sm:$0xff] }
   0xc   :  { %372 = vpow2.f32 %v72_v29  ;;  %v45_v41 = vmax.f32 %v499_v5, 0.0  ;;  %v46_v42 = vmax.f32 %v504_v6, 0.0  ;;  %v47_v44 = vmax.f32 %v509_v7, 0.0  ;;  %v653_v6 = vld [vmem:[%s792_s0 + $0x8] sm:$0xff]  ;;  %v183_v7 = vld [vmem:[%s794_s2 + $0x38] sm:$0xff] }
   0xd   :  { %374 = vpow2.f32 %v74_v30  ;;  %v48_v45 = vmax.f32 %v514_v8, 0.0  ;;  %v49_v46 = vmax.f32 %v519_v9, 0.0  ;;  %v31_v9 = vld [vmem:[%s792_s0 + $0x40] sm:$0xff] }
   0xe   :  { %376 = vpow2.f32 %v76_v32 }
   0xf   :  { %378 = vpow2.f32 %v78_v33 }
  0x10   :  { %v369_v43 = vpop.eup %368  ;;  %380 = vpow2.f32 %v80_v34 }
  0x11   :  { %v371_v47 = vpop.eup %370  ;;  %382 = vpow2.f32 %v82_v36  ;;  %v86_v48 = vadd.f32 1.0, %v369_v43  ;;  %v89_v49 = vmul.f32 -0.5, %v369_v43  ;;  %v92_v50 = vand.u32 2147483647, %v369_v43 }
  0x12   :  { %v373_v51 = vpop.eup %372  ;;  %384 = vpow2.f32 %v84_v39  ;;  %v95_v52 = vadd.f32 1.0, %v371_v47  ;;  %v98_v53 = vmul.f32 -0.5, %v371_v47  ;;  %v101_v54 = vand.u32 2147483647, %v371_v47 }
  0x13   :  { %v375_v55 = vpop.eup %374  ;;  %386 = vlog2.f32 %v86_v48  ;;  %v90_v56 = vadd.f32 1.0, %v89_v49  ;;  %vm539_vm1 = vcmp.lt.f32.partialorder %v92_v50, 0.0004427343  ;;  %v104_v58 = vadd.f32 1.0, %v373_v51 }
  0x14   :  { %v377_v59 = vpop.eup %376  ;;  %388 = vlog2.f32 %v95_v52  ;;  %v99_v60 = vadd.f32 1.0, %v98_v53  ;;  %vm543_vm2 = vcmp.lt.f32.partialorder %v101_v54, 0.0004427343  ;;  %v107_v62 = vmul.f32 -0.5, %v373_v51 }
  0x15   :  { %v379_v63 = vpop.eup %378  ;;  %v547_v0 = vmul.f32 %v369_v43, %v90_v56  ;;  %390 = vlog2.f32 %v104_v58  ;;  %v110_v10 = vand.u32 2147483647, %v373_v51  ;;  %v113_v11 = vadd.f32 1.0, %v375_v55 }
  0x16   :  { %v381_v12 = vpop.eup %380  ;;  %v549_v13 = vmul.f32 %v371_v47, %v99_v60  ;;  %v108_v14 = vadd.f32 1.0, %v107_v62  ;;  %v116_v15 = vmul.f32 -0.5, %v375_v55  ;;  %v119_v16 = vand.u32 2147483647, %v375_v55 }
  0x17   :  { %v383_v17 = vpop.eup %382  ;;  %vm551_vm3 = vcmp.lt.f32.partialorder %v110_v10, 0.0004427343  ;;  %392 = vlog2.f32 %v113_v11  ;;  %v122_v19 = vadd.f32 1.0, %v377_v59  ;;  %v125_v20 = vmul.f32 -0.5, %v377_v59 }
  0x18   :  { %v555_v21 = vpop.eup %384  ;;  %v109_v22 = vmul.f32 %v373_v51, %v108_v14  ;;  %v117_v23 = vadd.f32 1.0, %v116_v15  ;;  %vm557_vm4 = vcmp.lt.f32.partialorder %v119_v16, 0.0004427343  ;;  %v128_v25 = vand.u32 2147483647, %v377_v59 }
  0x19   :  { %v387_v26 = vpop.eup %386  ;;  %394 = vlog2.f32 %v122_v19  ;;  %v126_v27 = vadd.f32 1.0, %v125_v20  ;;  %v131_v28 = vadd.f32 1.0, %v379_v63  ;;  %v134_v29 = vmul.f32 -0.5, %v379_v63 }
  0x1a   :  { %v389_v30 = vpop.eup %388  ;;  %v88_v31 = vmul.f32 0.6931472, %v387_v26  ;;  %v118_v32 = vmul.f32 %v375_v55, %v117_v23  ;;  %vm561_vm5 = vcmp.lt.f32.partialorder %v128_v25, 0.0004427343  ;;  %v137_v34 = vand.u32 2147483647, %v379_v63 }
  0x1b   :  { %v391_v36 = vpop.eup %390  ;;  %v97_v39 = vmul.f32 0.6931472, %v389_v30  ;;  %v127_v43 = vmul.f32 %v377_v59, %v126_v27  ;;  %396 = vlog2.f32 %v131_v28  ;;  %v135_v47 = vadd.f32 1.0, %v134_v29  ;;  %v177_v28 = vld [vmem:[%s794_s2 + $0x8] sm:$0xff]  ;;  %v178_v29 = vld [vmem:[%s794_s2 + $0x10] sm:$0xff] }
  0x1c   :  { %v94_v48 = vsel %vm539_vm1, %v547_v0, %v88_v31  ;;  %v106_v49 = vmul.f32 0.6931472, %v391_v36  ;;  %vm568_vm6 = vcmp.lt.f32.partialorder %v137_v34, 0.0004427343  ;;  %v140_v51 = vadd.f32 1.0, %v381_v12  ;;  %v180_v31 = vld [vmem:[%s794_s2 + $0x20] sm:$0xff] }
  0x1d   :  { %v393_v52 = vpop.eup %392  ;;  %v103_v53 = vsel %vm543_vm2, %v549_v13, %v97_v39  ;;  %v136_v54 = vmul.f32 %v379_v63, %v135_v47  ;;  %v143_v55 = vmul.f32 -0.5, %v381_v12  ;;  %v146_v56 = vand.u32 2147483647, %v381_v12  ;;  %v182_v47 = vld [vmem:[%s794_s2 + $0x30] sm:$0xff] }
  0x1e   :  { %v112_v58 = vsel %vm551_vm3, %v109_v22, %v106_v49  ;;  %v115_v59 = vmul.f32 0.6931472, %v393_v52  ;;  %398 = vlog2.f32 %v140_v51  ;;  %v149_v57 = vadd.f32 1.0, %v383_v17  ;;  %v670_v51 = vld [vmem:[%s792_s0 + $0x18] sm:$0xff] }
  0x1f   :  { %v395_v60 = vpop.eup %394  ;;  %v144_v62 = vadd.f32 1.0, %v143_v55  ;;  %vm577_vm7 = vcmp.lt.f32.partialorder %v146_v56, 0.0004427343  ;;  %v152_v10 = vmul.f32 -0.5, %v383_v17  ;;  %v155_v11 = vand.u32 2147483647, %v383_v17 }
  0x20   :  { %v121_v61 = vsel %vm557_vm4, %v118_v32, %v115_v59  ;;  %v124_v63 = vmul.f32 0.6931472, %v395_v60  ;;  %400 = vlog2.f32 %v149_v57  ;;  %v158_v13 = vadd.f32 1.0, %v555_v21  ;;  %v181_v32 = vld [vmem:[%s794_s2 + $0x28] sm:$0xff]  ;;  %v680_v56 = vld [vmem:[%s792_s0 + $0x20] sm:$0xff] }
  0x21   :  { %v397_v14 = vpop.eup %396  ;;  %v145_v15 = vmul.f32 %v381_v12, %v144_v62  ;;  %v153_v16 = vadd.f32 1.0, %v152_v10  ;;  %vm584_vm8 = vcmp.lt.f32.partialorder %v155_v11, 0.0004427343  ;;  %v161_v19 = vmul.f32 -0.5, %v555_v21  ;;  %v691_v57 = vld [vmem:[%s792_s0 + $0x28] sm:$0xff]  ;;  %v29_v11 = vld [vmem:[%s792_s0 + $0x30] sm:$0xff] }
  0x22   :  { %v130_v20 = vsel %vm561_vm5, %v127_v43, %v124_v63  ;;  %v133_v22 = vmul.f32 0.6931472, %v397_v14  ;;  %402 = vlog2.f32 %v158_v13  ;;  %v164_v23 = vand.u32 2147483647, %v555_v21  ;;  %v184_v63 = vld [vmem:[%s794_s2 + $0x40] sm:$0xff] }
  0x23   :  { %v154_v25 = vmul.f32 %v383_v17, %v153_v16  ;;  %v162_v12 = vadd.f32 1.0, %v161_v19  ;;  %v597_v26 = vadd.f32 %v94_v48, %v41_v35  ;;  %v601_v27 = vadd.f32 %v103_v53, %v42_v37  ;;  %v179_v17 = vld [vmem:[%s794_s2 + $0x18] sm:$0xff] }
  0x24   :  { %v399_v30 = vpop.eup %398  ;;  %v139_v1 = vsel %vm568_vm6, %v136_v54, %v133_v22  ;;  %vm614_vm9 = vcmp.lt.f32.partialorder %v164_v23, 0.0004427343  ;;  %v620_v35 = vadd.f32 %v112_v58, %v43_v38  ;;  %v624_v37 = vadd.f32 %v121_v61, %v44_v40  ;;  %v644_v40 = vld [vmem:[%s792_s0] sm:$0xff] }
  0x25   :  { %v142_v33 = vmul.f32 0.6931472, %v399_v30  ;;  %v163_v34 = vmul.f32 %v555_v21, %v162_v12  ;;  %v635_v3 = vadd.f32 %v130_v20, %v45_v41  ;;  %v639_v4 = vadd.f32 %v139_v1, %v46_v42  ;;  %v658_v41 = vld [vmem:[%s792_s0 + $0x10] sm:$0xff] }
  0x26   :  { %v401_v38 = vpop.eup %400  ;;  %v185_v36 = vmul.f32 %v176_v24, %v597_v26  ;;  %v186_v39 = vmul.f32 %v177_v28, %v601_v27  ;;  %v187_v21 = vmul.f32 %v178_v29, %v620_v35  ;;  %v188_v5 = vmul.f32 %v179_v17, %v624_v37 }
  0x27   :  { %v148_v42 = vsel %vm577_vm7, %v145_v15, %v142_v33  ;;  %v151_v43 = vmul.f32 0.6931472, %v401_v38  ;;  %v189_v48 = vmul.f32 %v180_v31, %v635_v3  ;;  %v190_v49 = vmul.f32 %v181_v32, %v639_v4 }
  0x28   :  { %v403_v50 = vpop.eup %402  ;;  %v173_v52 = vadd.f32 %v148_v42, %v47_v44  ;;  %v194_v53 = vadd.f32 %v185_v36, %v644_v40  ;;  %v195_v54 = vadd.f32 %v186_v39, %v653_v6  ;;  %v196_v55 = vadd.f32 %v187_v21, %v658_v41 }
  0x29   :  { %v157_v58 = vsel %vm584_vm8, %v154_v25, %v151_v43  ;;  %v160_v59 = vmul.f32 0.6931472, %v403_v50  ;;  %v197_v44 = vadd.f32 %v188_v5, %v670_v51  ;;  %v198_v0 = vadd.f32 %v189_v48, %v680_v56 }
  0x2a   :  { %v174_v60 = vadd.f32 %v157_v58, %v48_v45  ;;  %v191_v62 = vmul.f32 %v182_v47, %v173_v52  ;;  %v203_v10 = vpack.c.bf16 %v194_v53, %v194_v53  ;;  %v199_v13 = vadd.f32 %v190_v49, %v691_v57 }
  0x2b   :  { %v166_v61 = vsel %vm614_vm9, %v163_v34, %v160_v59  ;;  %v204_v14 = vpack.c.bf16 %v195_v54, %v195_v54  ;;  %v205_v16 = vpack.c.bf16 %v196_v55, %v196_v55  ;;  %v206_v19 = vpack.c.bf16 %v197_v44, %v197_v44 }
  0x2c   :  { %v175_v8 = vadd.f32 %v166_v61, %v49_v46  ;;  %v192_v45 = vmul.f32 %v183_v7, %v174_v60  ;;  %v200_v15 = vadd.f32 %v191_v62, %v29_v11  ;;  %404 = vlog2.f32 %v597_v26  ;;  %213 = vst.msk [vmem:[%s795_s3] sm:$0xf] %vm212_vm10, %v203_v10 }
  0x2d   :  { %v207_v23 = vpack.c.bf16 %v198_v0, %v198_v0  ;;  %406 = vlog2.f32 %v601_v27  ;;  %v208_v46 = vpack.c.bf16 %v199_v13, %v199_v13  ;;  %214 = vst.msk [vmem:[%s795_s3 + $0x4] sm:$0xf] %vm212_vm10, %v204_v14  ;;  %v249_v12 = vmul.f32 %v597_v26, %v597_v26 }
  0x2e   :  { %v193_v20 = vmul.f32 %v184_v63, %v175_v8  ;;  %v201_v22 = vadd.f32 %v192_v45, %v30_v18  ;;  %408 = vlog2.f32 %v620_v35  ;;  %v209_v25 = vpack.c.bf16 %v200_v15, %v200_v15  ;;  %215 = vst.msk [vmem:[%s795_s3 + $0x8] sm:$0xf] %vm212_vm10, %v205_v16 }
  0x2f   :  { %410 = vlog2.f32 %v624_v37  ;;  %216 = vst.msk [vmem:[%s795_s3 + $0xc] sm:$0xf] %vm212_vm10, %v206_v19  ;;  %v250_v29 = vmul.f32 %v601_v27, %v601_v27  ;;  %v251_v17 = vmul.f32 %v620_v35, %v620_v35  ;;  %v252_v26 = vmul.f32 %v624_v37, %v624_v37 }
  0x30   :  { %v202_v24 = vadd.f32 %v193_v20, %v31_v9  ;;  %v210_v28 = vpack.c.bf16 %v201_v22, %v201_v22  ;;  %412 = vlog2.f32 %v635_v3  ;;  %217 = vst.msk [vmem:[%s795_s3 + $0x10] sm:$0xf] %vm212_vm10, %v207_v23  ;;  %v253_v1 = vmul.f32 %v635_v3, %v635_v3 }
  0x31   :  { %414 = vlog2.f32 %v639_v4  ;;  %218 = vst.msk [vmem:[%s795_s3 + $0x14] sm:$0xf] %vm212_vm10, %v208_v46  ;;  %v254_v27 = vmul.f32 %v639_v4, %v639_v4  ;;  %v258_v35 = vmul.f32 %v644_v40, %v644_v40  ;;  %v259_v31 = vmul.f32 %v653_v6, %v653_v6 }
  0x32   :  { %v211_v30 = vpack.c.bf16 %v202_v24, %v202_v24  ;;  %v405_v2 = vpop.eup %404  ;;  %416 = vlog2.f32 %v173_v52  ;;  %219 = vst.msk [vmem:[%s795_s3 + $0x18] sm:$0xf] %vm212_vm10, %v209_v25  ;;  %v255_v32 = vmul.f32 %v173_v52, %v173_v52  ;;  %v260_v33 = vmul.f32 %v658_v41, %v658_v41 }
  0x33   :  { %v407_v37 = vpop.eup %406  ;;  %418 = vlog2.f32 %v174_v60  ;;  %v261_v34 = vmul.f32 %v670_v51, %v670_v51  ;;  %220 = vst.msk [vmem:[%s795_s3 + $0x1c] sm:$0xf] %vm212_vm10, %v210_v28  ;;  %v223_v4 = vmul.f32 0.6931472, %v405_v2  ;;  %v256_v38 = vmul.f32 %v174_v60, %v174_v60 }
  0x34   :  { %v409_v3 = vpop.eup %408  ;;  %420 = vlog2.f32 %v175_v8  ;;  %v262_v40 = vmul.f32 %v680_v56, %v680_v56  ;;  %221 = vst.msk [vmem:[%s795_s3 + $0x20] sm:$0xf] %vm212_vm10, %v211_v30  ;;  %v225_v39 = vmul.f32 0.6931472, %v407_v37  ;;  %v257_v5 = vmul.f32 %v175_v8, %v175_v8  ;;  %s449_s3 = smov [#allocation2]  }
  0x35   :  { %v411_v36 = vpop.eup %410  ;;  %v227_v21 = vmul.f32 0.6931472, %v409_v3  ;;  %v263_v6 = vmul.f32 %v691_v57, %v691_v57  ;;  %v264_v43 = vmul.f32 %v29_v11, %v29_v11  ;;  %v267_v47 = vadd.f32 %v258_v35, %v249_v12  ;;  %s342_s5 = sshll.u32 %s449_s3, 4  ;;  %s343_s5 = int_to_ptr.vmem [resolvable:$true] %s342_s5 }
  0x36   :  { %v413_v41 = vpop.eup %412  ;;  %v229_v42 = vmul.f32 0.6931472, %v411_v36  ;;  %v268_v48 = vadd.f32 %v259_v31, %v250_v29  ;;  %v265_v51 = vmul.f32 %v30_v18, %v30_v18  ;;  %v269_v52 = vadd.f32 %v260_v33, %v251_v17 }
  0x37   :  { %v415_v49 = vpop.eup %414  ;;  %v231_v50 = vmul.f32 0.6931472, %v413_v41  ;;  %v270_v53 = vadd.f32 %v261_v34, %v252_v26  ;;  %v240_v56 = vsub.f32 0.0, %v223_v4  ;;  %v266_v58 = vmul.f32 %v31_v9, %v31_v9 }
  0x38   :  { %v417_v54 = vpop.eup %416  ;;  %v233_v55 = vmul.f32 0.6931472, %v415_v49  ;;  %v271_v59 = vadd.f32 %v262_v40, %v253_v1  ;;  %v241_v60 = vsub.f32 0.0, %v225_v39  ;;  %v242_v62 = vsub.f32 0.0, %v227_v21 }
  0x39   :  { %v419_v7 = vpop.eup %418  ;;  %v235_v44 = vmul.f32 0.6931472, %v417_v54  ;;  %v272_v57 = vadd.f32 %v263_v6, %v254_v27  ;;  %v243_v10 = vsub.f32 0.0, %v229_v42  ;;  %v273_v11 = vadd.f32 %v264_v43, %v255_v32 }
  0x3a   :  { %v421_v0 = vpop.eup %420  ;;  %v276_v61 = vmul.f32 0.5, %v267_v47  ;;  %v277_v63 = vmul.f32 0.5, %v268_v48  ;;  %v244_v13 = vsub.f32 0.0, %v231_v50  ;;  %v274_v14 = vadd.f32 %v265_v51, %v256_v38 }
  0x3b   :  { %v278_v8 = vmul.f32 0.5, %v269_v52  ;;  %v279_v45 = vmul.f32 0.5, %v270_v53  ;;  %v237_v15 = vmul.f32 0.6931472, %v419_v7  ;;  %v245_v16 = vsub.f32 0.0, %v233_v55 }
  0x3c   :  { %v275_v18 = vadd.f32 %v266_v58, %v257_v5  ;;  %v280_v19 = vmul.f32 0.5, %v271_v59  ;;  %v239_v20 = vmul.f32 0.6931472, %v421_v0  ;;  %v246_v22 = vsub.f32 0.0, %v235_v44 }
  0x3d   :  { %v281_v23 = vmul.f32 0.5, %v272_v57  ;;  %v285_v9 = vadd.f32 %v276_v61, %v240_v56  ;;  %v282_v46 = vmul.f32 0.5, %v273_v11  ;;  %v286_v24 = vadd.f32 %v277_v63, %v241_v60  ;;  %v303_v57 = vld [vmem:[#allocation2] sm:$0x1] }
  0x3e   :  { %v287_v25 = vadd.f32 %v278_v8, %v242_v62  ;;  %v288_v12 = vadd.f32 %v279_v45, %v243_v10  ;;  %v289_v28 = vadd.f32 %v280_v19, %v244_v13  ;;  %v247_v26 = vsub.f32 0.0, %v237_v15 }
  0x3f   :  { %v355_v29 = vadd.f32 -0.5, %v285_v9  ;;  %v356_v17 = vadd.f32 -0.5, %v286_v24  ;;  %v283_v1 = vmul.f32 0.5, %v274_v14  ;;  %v290_v2 = vadd.f32 %v281_v23, %v245_v16 }
  0x40   :  { %v357_v30 = vadd.f32 -0.5, %v287_v25  ;;  %v358_v27 = vadd.f32 -0.5, %v288_v12  ;;  %v248_v35 = vsub.f32 0.0, %v239_v20  ;;  %v284_v31 = vmul.f32 0.5, %v275_v18 }
  0x41   :  { %v291_v37 = vadd.f32 %v282_v46, %v246_v22  ;;  %v359_v32 = vadd.f32 -0.5, %v289_v28  ;;  %v305_v33 = vsel %vm304_vm11, %v355_v29, 0.0  ;;  %v306_v34 = vsel %vm304_vm11, %v356_v17, 0.0 }
  0x42   :  { %v308_v3 = vsel %vm304_vm11, %v357_v30, 0.0  ;;  %v307_v4 = vadd.f32 %v306_v34, %v305_v33  ;;  %v292_v38 = vadd.f32 %v283_v1, %v247_v26  ;;  %v360_v40 = vadd.f32 -0.5, %v290_v2 }
  0x43   :  { %v310_v36 = vsel %vm304_vm11, %v358_v27, 0.0  ;;  %v293_v21 = vadd.f32 %v284_v31, %v248_v35  ;;  %v361_v5 = vadd.f32 -0.5, %v291_v37  ;;  %v312_v6 = vsel %vm304_vm11, %v359_v32, 0.0 }
  0x44   :  { %v309_v39 = vadd.f32 %v308_v3, %v307_v4  ;;  %v362_v42 = vadd.f32 -0.5, %v292_v38  ;;  %v314_v43 = vsel %vm304_vm11, %v360_v40, 0.0 }
  0x45   :  { %v363_v48 = vadd.f32 -0.5, %v293_v21  ;;  %v316_v49 = vsel %vm304_vm11, %v361_v5, 0.0 }
  0x46   :  { %v311_v41 = vadd.f32 %v310_v36, %v309_v39  ;;  %v318_v51 = vsel %vm304_vm11, %v362_v42, 0.0 }
  0x47   :  { %v320_v53 = vsel %vm304_vm11, %v363_v48, 0.0 }
  0x48   :  { %v313_v47 = vadd.f32 %v312_v6, %v311_v41 }
  0x4a   :  { %v315_v50 = vadd.f32 %v314_v43, %v313_v47 }
  0x4c   :  { %v317_v52 = vadd.f32 %v316_v49, %v315_v50 }
  0x4e   :  { %v319_v54 = vadd.f32 %v318_v51, %v317_v52 }
  0x50   :  { %v321_v55 = vadd.f32 %v320_v53, %v319_v54 }
  0x52   :  { %322 = vadd.xlane.f32.xlu0 %v321_v55 }
  0xc5   :  { %v323_v56 = vpop.xlane.xlu0 %322 }
  0xc6   :  { %v324_v58 = vrot.slane %v323_v56, 4 }
  0xc8   :  { %v325_v59 = vadd.f32 %v324_v58, %v323_v56 }
  0xca   :  { %v326_v7 = vrot.slane %v325_v59, 2 }
  0xcc   :  { %v327_v44 = vadd.f32 %v326_v7, %v325_v59 }
  0xce   :  { %v328_v60 = vrot.slane %v327_v44, 1 }
  0xd0   :  { %v329_v62 = vadd.f32 %v328_v60, %v327_v44 }
  0xd2   :  { %364 = vpush %v329_v62 }
 0x103   :  { %s365_s8 = spop %364 }
 0x104   :  { %v331_v0 = vstv %s365_s8 }
 0x105   :  { %v332_v10 = vadd.f32 %v331_v0, %v303_v57 }
 0x107   :  { %334 = vst.msk [vmem:[#allocation2] sm:$0x1] %vm21_vm0, %v332_v10 }
 0x108   :  { %347 = dma.vmem_to_hbm [thread:$0]  %s343_s5, 16, %s345_s7, [#allocation3]  }
 0x109   :  { %446 = dma.done.wait [#allocation3], 16  }
 0x10a   :  { %447 = vsyncadd [#allocation3], 4294967280 }
 0x10b   :  { %354 = vsyncpa [#allocation3], 1 }

// kernel: _lambda_.9
= control target key start
LH: loop header
LB: loop body
LE: loop exit
PB: predicated region body
PF: predicated region fallthrough
CT: control target
= control target key end

     0   :  { %s3067_s0 = inlined_call_operand.vmem [shape: bf16[2,1,1,10,10,8], index: 0, kind: input, shape index: {}]   ;;  %s3068_s1 = inlined_call_operand.vmem [shape: f32[1,8], index: 1, kind: input, shape index: {}]   ;;  %s3069_s2 = inlined_call_operand.vmem [shape: f32[1,8], index: 2, kind: input, shape index: {}]   ;;  %s3070_s3 = inlined_call_operand.vmem [shape: bf16[3,3,8,8], index: 3, kind: input, shape index: {}]   ;;  %s3071_s4 = inlined_call_operand.vmem [shape: bf16[2,8,8,8], index: 4, kind: input, shape index: {}]   ;;  %s3072_s5 = inlined_call_operand.vmem [shape: f32[2,8,8,8], index: 5, kind: output, shape index: {0}]   ;;  %s3073_s6 = inlined_call_operand.hbm [shape: f32[2,1,8], index: 6, kind: output, shape index: {1}]   ;;  %s3074_s7 = inlined_call_operand.hbm [shape: f32[2,1,8], index: 7, kind: output, shape index: {2}]  }
   0x1   :  { %3075 = sst [smem:[#allocation9_spill]] %s3067_s0 }
   0x2   :  { %13 = vsyncpa [#allocation4], 0 }
   0x3   :  { %15 = vsyncpa [#allocation4 + $0x1], 0 }
   0x4   :  { %16 = vsyncpa [#allocation6], 0 }
   0x5   :  { %18 = vsyncpa [#allocation6 + $0x1], 0  ;;  %s2416_s24 = smov 0   ;;  %s2418_s25 = smov 0  }
   0x6   :  { %s2420_s26 = smov 0   ;;  %s2422_s27 = smov 0  }
   0x7   :  { %s2424_s28 = smov 0   ;;  %s2426_s29 = smov 0  }
   0x8 LB: > { %s2020_s30 = sadd.s32 4294967295, %s2373_s29   ;;  %s2021_s8 = sadd.s32 4294967294, %s2373_s29   ;;  %s2373_s29 = sphi %s2426_s29, %s24_s29   ;;  %s2369_s28 = sphi %s2424_s28, %s3091_s28   ;;  %s2365_s27 = sphi %s2422_s27, %s3090_s27   ;;  %s2361_s26 = sphi %s2420_s26, %s3089_s26   ;;  %s2357_s25 = sphi %s2418_s25, %s3088_s25   ;;  %s2353_s24 = sphi %s2416_s24, %s3087_s24  }
   0x9   : > { %s36_s9 = sadd.s32 1, %s2369_s28  ;;  %s195_s10 = sadd.s32 1, %s2361_s26 }
   0xa   : > { %p38_p0 = scmp.ge.s32.totalorder %s36_s9, 2  ;;  %p205_p1 = scmp.ne.s32.totalorder %s2361_s26, %s2357_s25 }
   0xb   : > { %p206_p2 = scmp.eq.s32.totalorder %s2020_s30, 1  ;;  %p211_p3 = scmp.ne.s32.totalorder %s2357_s25, %s2353_s24 }
   0xc   : > { %s3093_s9 = smov (%p38_p0, %s36_s9), 0  ;;  %p212_p5 = scmp.eq.s32.totalorder %s2021_s8, 1 }
   0xd   : > { %p2456_p4 = por %p206_p2, %p205_p1  ;;  %s190_s12 = ssub.s32 %s2369_s28, %s3093_s9 }
   0xe   : > { %p2025_p6 = scmp.ge.s32.totalorder %s2373_s29, 1  ;;  %p193_p7 = scmp.eq.s32.totalorder %s190_s12, 0 }
   0xf   : > { %p2463_p8 = por %p212_p5, %p211_p3  ;;  %p290_p9 = scmp.lt.s32.totalorder %s2373_s29, 3 }
  0x10   : > { %s2469_s14 = scalar_select %p193_p7, %s2361_s26, %s195_s10  }
  0x11   : > { %p291_p10 = pnand %p2025_p6, %p290_p9 }
  0x12   : > { %p345_p11 = scmp.lt.s32.totalorder (!%p291_p10), %s2365_s27, 1  ;;  %s3078_s0 = sld [smem:[#allocation9_spill]] (!%p291_p10) }
  0x13   : > { %294 = sbr.rel (%p291_p10) target bundleno = 380 (0x17c), region = 40  ;;  %s1840_s16 = scalar_lea.hbm (!%p291_p10), %s3073_s6, %s2365_s27 }
  0x14   : > { %s1854_s19 = scalar_lea.hbm (!%p291_p10), %s3074_s7, %s2365_s27 }
  0x18   : > { %v2047_v0 = vld [vmem:[%s3070_s3 + $0x4] sm:$0xf]  ;;  %vm712_vm0 = vcmask 1043456   ;;  %vm373_vm1 = vcmask 60416   ;;  %vm375_vm2 = vcmask 57344   ;;  %s2477_s17 = scalar_select %p345_p11, %s2365_s27, 1 }
  0x19   : > { %v714_v1 = vsel %vm712_vm0, %v2047_v0, 0  ;;  %v2375_v2 = vmov 0   ;;  %v371_v3 = vld [vmem:[%s3068_s1] sm:$0x1]  ;;  %vm500_vm3 = vsmask.f32 7938 }
  0x1a   : > { %2198 = vmatpush.bf16.msra.mxu1 %v714_v1  ;;  %2199 = vmatpush.bf16.msra.mxu2 %v714_v1  ;;  %379 = vst.msk [vmem:[#allocation2 + $0x10] sm:$0xf] %vm373_vm1, %v2375_v2  ;;  %s2201_s20 = smul.u32 80, %s2477_s17  ;;  %v372_v4 = vld [vmem:[%s3069_s2] sm:$0x1]  ;;  %v2499_v5 = vperm.slane %v371_v3, 0  ;;  %vm2537_vm5 = vmand %vm373_vm1, %vm500_vm3 }
  0x1b   : > { %2200 = vmatpush.bf16.msra.mxu3 %v714_v1  ;;  %723 = vmatpush.bf16.msra.mxu0 %v714_v1  ;;  %380 = vst.msk [vmem:[#allocation2 + $0x14] sm:$0x1] %vm375_vm2, %v2375_v2  ;;  %v2507_v13 = vperm.slane %v372_v4, 0  ;;  %vm506_vm4 = vsmask.f32 256  ;;  %vm699_vm9 = vcmask 64512  }
  0x1c   : > { %381 = vst.msk [vmem:[#allocation2 + $0x18] sm:$0xf] %vm373_vm1, %v2375_v2  ;;  %s2497_s8 = scalar_lea.vmem %s3078_s0, %s2201_s20  ;;  %vm2546_vm6 = vmand %vm375_vm2, %vm506_vm4  ;;  %vm570_vm7 = vsmask.f32 3328  ;;  %vm571_vm8 = vsmask.f32 7440 }
  0x1d   : > { %382 = vst.msk [vmem:[#allocation2 + $0x1c] sm:$0x1] %vm375_vm2, %v2375_v2  ;;  %v2033_v6 = vld [vmem:[%s2497_s8 + $0x10] sm:$0xf]  ;;  %v2034_v7 = vld [vmem:[%s2497_s8 + $0x14] sm:$0x1]  ;;  %vm2621_vm10 = vmor %vm570_vm7, %vm571_vm8 }
  0x1e   : > { %374 = vst.msk [vmem:[#allocation2] sm:$0xf] %vm373_vm1, %v2375_v2  ;;  %v2035_v8 = vld [vmem:[%s2497_s8 + $0x18] sm:$0xf]  ;;  %v2036_v9 = vld [vmem:[%s2497_s8 + $0x1c] sm:$0x1]  ;;  %v414_v10 = vunpack.c.l.bf16 %v2033_v6  ;;  %v415_v11 = vunpack.c.l.bf16 %v2034_v7 }
  0x1f   : > { %v416_v12 = vunpack.c.l.bf16 %v2035_v8  ;;  %376 = vst.msk [vmem:[#allocation2 + $0x4] sm:$0x1] %vm375_vm2, %v2375_v2  ;;  %v417_v14 = vunpack.c.l.bf16 %v2036_v9  ;;  %v2037_v15 = vld [vmem:[%s2497_s8 + $0x20] sm:$0xf]  ;;  %v2038_v19 = vld [vmem:[%s2497_s8 + $0x24] sm:$0x1] }
  0x20   : > { %377 = vst.msk [vmem:[#allocation2 + $0x8] sm:$0xf] %vm373_vm1, %v2375_v2  ;;  %v433_v16 = vmul.f32 %v2499_v5, %v414_v10  ;;  %v434_v17 = vmul.f32 %v2499_v5, %v415_v11  ;;  %v418_v20 = vunpack.c.l.bf16 %v2037_v15  ;;  %v2039_v22 = vld [vmem:[%s2497_s8 + $0x28] sm:$0xf]  ;;  %v419_v23 = vunpack.c.l.bf16 %v2038_v19  ;;  %v2040_v27 = vld [vmem:[%s2497_s8 + $0x2c] sm:$0x1] }
  0x21   : > { %v435_v18 = vmul.f32 %v2499_v5, %v416_v12  ;;  %378 = vst.msk [vmem:[#allocation2 + $0xc] sm:$0x1] %vm375_vm2, %v2375_v2  ;;  %v436_v21 = vmul.f32 %v2499_v5, %v417_v14  ;;  %v420_v28 = vunpack.c.l.bf16 %v2039_v22  ;;  %v511_v30 = vld [vmem:[#allocation2 + $0x10] sm:$0xf]  ;;  %v421_v33 = vunpack.c.l.bf16 %v2040_v27  ;;  %v2042_v52 = vld [vmem:[%s2497_s8 + $0x34] sm:$0x1] }
  0x22   : > { %383 = vst.msk [vmem:[#allocation2 + $0x20] sm:$0xf] %vm373_vm1, %v2375_v2  ;;  %v452_v24 = vadd.f32 %v2507_v13, %v433_v16  ;;  %v453_v25 = vadd.f32 %v2507_v13, %v434_v17  ;;  %v514_v31 = vld [vmem:[#allocation2 + $0x14] sm:$0x1]  ;;  %v437_v34 = vmul.f32 %v2499_v5, %v418_v20  ;;  %v438_v35 = vmul.f32 %v2499_v5, %v419_v23  ;;  %v2041_v47 = vld [vmem:[%s2497_s8 + $0x30] sm:$0xf] }
  0x23   : > { %v454_v26 = vadd.f32 %v2507_v13, %v435_v18  ;;  %384 = vst.msk [vmem:[#allocation2 + $0x24] sm:$0x1] %vm375_vm2, %v2375_v2  ;;  %v455_v29 = vadd.f32 %v2507_v13, %v436_v21  ;;  %v517_v32 = vld [vmem:[#allocation2 + $0x18] sm:$0xf]  ;;  %v439_v41 = vmul.f32 %v2499_v5, %v420_v28  ;;  %v440_v44 = vmul.f32 %v2499_v5, %v421_v33  ;;  %v2044_v58 = vld [vmem:[%s2497_s8 + $0x3c] sm:$0x1] }
  0x24   : > { %385 = vst.msk [vmem:[#allocation2 + $0x28] sm:$0xf] %vm373_vm1, %v2375_v2  ;;  %v468_v36 = vmax.f32 %v452_v24, 0.0  ;;  %v469_v37 = vmax.f32 %v453_v25, 0.0  ;;  %v520_v40 = vld [vmem:[#allocation2 + $0x1c] sm:$0x1]  ;;  %v456_v45 = vadd.f32 %v2507_v13, %v437_v34  ;;  %v457_v46 = vadd.f32 %v2507_v13, %v438_v35 }
  0x25   : > { %v470_v38 = vmax.f32 %v454_v26, 0.0  ;;  %386 = vst.msk [vmem:[#allocation2 + $0x2c] sm:$0x1] %vm375_vm2, %v2375_v2  ;;  %v471_v42 = vmax.f32 %v455_v29, 0.0  ;;  %v458_v51 = vadd.f32 %v2507_v13, %v439_v41  ;;  %v2043_v53 = vld [vmem:[%s2497_s8 + $0x38] sm:$0xf]  ;;  %v459_v55 = vadd.f32 %v2507_v13, %v440_v44 }
  0x26   : > { %387 = vst.msk [vmem:[#allocation2 + $0x30] sm:$0xf] %vm373_vm1, %v2375_v2  ;;  %v484_v48 = vpack.c.bf16 %v468_v36, %v468_v36  ;;  %v485_v49 = vpack.c.bf16 %v469_v37, %v469_v37  ;;  %v472_v56 = vmax.f32 %v456_v45, 0.0  ;;  %v473_v57 = vmax.f32 %v457_v46, 0.0  ;;  %v2031_v63 = vld [vmem:[%s2497_s8 + $0x8] sm:$0xf] }
  0x27   : > { %v486_v50 = vpack.c.bf16 %v470_v38, %v470_v38  ;;  %388 = vst.msk [vmem:[#allocation2 + $0x34] sm:$0x1] %vm375_vm2, %v2375_v2  ;;  %v487_v54 = vpack.c.bf16 %v471_v42, %v471_v42  ;;  %v474_v62 = vmax.f32 %v458_v51, 0.0  ;;  %v475_v1 = vmax.f32 %v459_v55, 0.0  ;;  %v2032_v11 = vld [vmem:[%s2497_s8 + $0xc] sm:$0x1] }
  0x28   : > { %389 = vst.msk [vmem:[#allocation2 + $0x38] sm:$0xf] %vm373_vm1, %v2375_v2  ;;  %v512_v59 = vsel %vm2537_vm5, %v484_v48, %v511_v30  ;;  %v515_v60 = vsel %vm2546_vm6, %v485_v49, %v514_v31  ;;  %v488_v3 = vpack.c.bf16 %v472_v56, %v472_v56  ;;  %v489_v4 = vpack.c.bf16 %v473_v57, %v473_v57  ;;  %v2080_v24 = vld [vmem:[%s3070_s3 + $0x8] sm:$0xf]  ;;  %s2166_s22 = sshll.u32 %s2477_s17, 6 }
  0x29   : > { %v518_v61 = vsel %vm2537_vm5, %v486_v50, %v517_v32  ;;  %390 = vst.msk [vmem:[#allocation2 + $0x3c] sm:$0x1] %vm375_vm2, %v2375_v2  ;;  %v521_v0 = vsel %vm2546_vm6, %v487_v54, %v520_v40  ;;  %v523_v6 = vld [vmem:[#allocation2 + $0x20] sm:$0xf]  ;;  %v422_v8 = vunpack.c.l.bf16 %v2041_v47  ;;  %v423_v9 = vunpack.c.l.bf16 %v2042_v52  ;;  %s2931_s10 = scalar_lea.vmem %s3072_s5, %s2166_s22  ;;  %s3004_s22 = sshll.u32 %s1840_s16, 4  ;;  %s1845_s22 = int_to_ptr.hbm [resolvable:$true] %s3004_s22 }
  0x2a   : > { %513 = vst [vmem:[#allocation2 + $0x10] sm:$0xf] %v512_v59  ;;  %v526_v7 = vld [vmem:[#allocation2 + $0x24] sm:$0x1]  ;;  %v424_v10 = vunpack.c.l.bf16 %v2043_v53  ;;  %v490_v12 = vpack.c.bf16 %v474_v62, %v474_v62  ;;  %v491_v14 = vpack.c.bf16 %v475_v1, %v475_v1  ;;  %v425_v15 = vunpack.c.l.bf16 %v2044_v58  ;;  %v2614_v58 = vld [vmem:[#allocation2] sm:$0xf] }
  0x2b   : > { %516 = vst [vmem:[#allocation2 + $0x14] sm:$0x1] %v515_v60  ;;  %v524_v16 = vsel %vm2537_vm5, %v488_v3, %v523_v6  ;;  %v529_v17 = vld [vmem:[#allocation2 + $0x28] sm:$0xf]  ;;  %v441_v18 = vmul.f32 %v2499_v5, %v422_v8  ;;  %v442_v19 = vmul.f32 %v2499_v5, %v423_v9  ;;  %v527_v21 = vsel %vm2546_vm6, %v489_v4, %v526_v7  ;;  %s2277_s12 = sshra.s32 %s1845_s22, 4  ;;  %s2278_s12 = int_to_ptr.hbm [resolvable:$true] %s2277_s12 }
  0x2c   : > { %519 = vst [vmem:[#allocation2 + $0x18] sm:$0xf] %v518_v61  ;;  %v443_v20 = vmul.f32 %v2499_v5, %v424_v10  ;;  %v532_v22 = vld [vmem:[#allocation2 + $0x2c] sm:$0x1]  ;;  %v444_v23 = vmul.f32 %v2499_v5, %v425_v15  ;;  %v412_v25 = vunpack.c.l.bf16 %v2031_v63  ;;  %v413_v26 = vunpack.c.l.bf16 %v2032_v11  ;;  %s2279_s15 = scalar_lea.hbm %s2278_s12, 1  ;;  %p2284_p1 = scmp.lt.s32.totalorder %s2278_s12, %s3073_s6 }
  0x2d   : > { %522 = vst [vmem:[#allocation2 + $0x1c] sm:$0x1] %v521_v0  ;;  %v460_v27 = vadd.f32 %v2507_v13, %v441_v18  ;;  %v461_v28 = vadd.f32 %v2507_v13, %v442_v19  ;;  %v895_v30 = vsel %vm712_vm0, %v2080_v24, 0  ;;  %v530_v31 = vsel %vm2537_vm5, %v490_v12, %v529_v17  ;;  %v535_v40 = vld [vmem:[#allocation2 + $0x30] sm:$0xf]  ;;  %p2280_p12 = scmp.ne.s32.totalorder %s2278_s12, %s2279_s15 }
  0x2e   : > { %391 = vst.msk [vmem:[#allocation2 + $0x40] sm:$0xf] %vm373_vm1, %v2375_v2  ;;  %v462_v29 = vadd.f32 %v2507_v13, %v443_v20  ;;  %904 = vmatpush.bf16.msrb.mxu2 %v895_v30  ;;  %v431_v32 = vmul.f32 %v2499_v5, %v412_v25  ;;  %v432_v33 = vmul.f32 %v2499_v5, %v413_v26  ;;  %v538_v45 = vld [vmem:[#allocation2 + $0x34] sm:$0x1]  ;;  %v502_v18 = vld [vmem:[#allocation2 + $0x8] sm:$0xf] }
  0x2f   : > { %392 = vst.msk [vmem:[#allocation2 + $0x44] sm:$0x1] %vm375_vm2, %v2375_v2  ;;  %v533_v35 = vsel %vm2546_vm6, %v491_v14, %v532_v22  ;;  %v463_v36 = vadd.f32 %v2507_v13, %v444_v23  ;;  %v476_v37 = vmax.f32 %v460_v27, 0.0  ;;  %v477_v38 = vmax.f32 %v461_v28, 0.0  ;;  %v541_v46 = vld [vmem:[#allocation2 + $0x38] sm:$0xf]  ;;  %p2281_p13 = pnand %p2280_p12, %p2456_p4 }
  0x30   : > { %393 = vst.msk [vmem:[#allocation2 + $0x48] sm:$0xf] %vm373_vm1, %v2375_v2  ;;  %v450_v47 = vadd.f32 %v2507_v13, %v431_v32  ;;  %v451_v48 = vadd.f32 %v2507_v13, %v432_v33  ;;  %v478_v50 = vmax.f32 %v462_v29, 0.0  ;;  %v544_v4 = vld [vmem:[#allocation2 + $0x3c] sm:$0x1]  ;;  %v574_v19 = vshrl.u32 %v2614_v58, 16 }
  0x31   : > { %v555_v34 = vld [vmem:[#allocation2 + $0x10] sm:$0xf]  ;;  %394 = vst.msk [vmem:[#allocation2 + $0x4c] sm:$0x1] %vm375_vm2, %v2375_v2  ;;  %v492_v51 = vpack.c.bf16 %v476_v37, %v476_v37  ;;  %v493_v52 = vpack.c.bf16 %v477_v38, %v477_v38  ;;  %v479_v61 = vmax.f32 %v463_v36, 0.0  ;;  %v577_v20 = vshll.u32 %v2614_v58, 16  ;;  %p2282_p0 = pneg %p2281_p13 }
  0x32   : > { %v2607_v41 = vld [vmem:[#allocation2 + $0x14] sm:$0x1]  ;;  %v602_v42 = vshrl.u32 %v555_v34, 16  ;;  %v605_v44 = vshll.u32 %v555_v34, 16  ;;  %525 = vst [vmem:[#allocation2 + $0x20] sm:$0xf] %v524_v16  ;;  %v494_v62 = vpack.c.bf16 %v478_v50, %v478_v50 }
  0x33   : > { %v556_v2 = vld [vmem:[#allocation2 + $0x18] sm:$0xf]  ;;  %v611_v49 = vshll.u32 %v2607_v41, 16  ;;  %528 = vst [vmem:[#allocation2 + $0x24] sm:$0x1] %v527_v21  ;;  %v536_v3 = vsel %vm2537_vm5, %v492_v51, %v535_v40  ;;  %v495_v8 = vpack.c.bf16 %v479_v61, %v479_v61  ;;  %v539_v9 = vsel %vm2546_vm6, %v493_v52, %v538_v45 }
  0x34   : > { %v2612_v53 = vld [vmem:[#allocation2 + $0x1c] sm:$0x1]  ;;  %v604_v54 = vrot.slane %v602_v42, 4  ;;  %v607_v55 = vrot.slane %v605_v44, 5  ;;  %v616_v56 = vshrl.u32 %v556_v2, 16  ;;  %v619_v57 = vshll.u32 %v556_v2, 16 }
  0x35   : > { %v613_v59 = vrot.slane %v611_v49, 5  ;;  %v625_v60 = vshll.u32 %v2612_v53, 16  ;;  %531 = vst [vmem:[#allocation2 + $0x28] sm:$0xf] %v530_v31  ;;  %v542_v10 = vsel %vm2537_vm5, %v494_v62, %v541_v46  ;;  %v466_v14 = vmax.f32 %v450_v47, 0.0 }
  0x36   : > { %v608_v63 = vor.u32 %v607_v55, %v604_v54  ;;  %v618_v0 = vrot.slane %v616_v56, 4  ;;  %v621_v1 = vrot.slane %v619_v57, 5  ;;  %534 = vst [vmem:[#allocation2 + $0x2c] sm:$0x1] %v533_v35  ;;  %v467_v15 = vmax.f32 %v451_v48, 0.0 }
  0x37   : > { %v627_v7 = vrot.slane %v625_v60, 5  ;;  %537 = vst [vmem:[#allocation2 + $0x30] sm:$0xf] %v536_v3  ;;  %v545_v17 = vsel %vm2546_vm6, %v495_v8, %v544_v4  ;;  %v482_v28 = vpack.c.bf16 %v466_v14, %v466_v14  ;;  %v508_v30 = vld [vmem:[#allocation2 + $0xc] sm:$0x1]  ;;  %v576_v35 = vrot.slane %v574_v19, 4 }
  0x38   : > { %v609_v11 = vrot.slane %v608_v63, 4  ;;  %v622_v12 = vor.u32 %v621_v1, %v618_v0  ;;  %540 = vst [vmem:[#allocation2 + $0x34] sm:$0x1] %v539_v9  ;;  %v483_v29 = vpack.c.bf16 %v467_v15, %v467_v15  ;;  %v2649_v54 = vld [vmem:[#allocation2 + $0x4] sm:$0x1]  ;;  %vm833_vm11 = vcmask 1042432  }
  0x39   : > { %v557_v16 = vld [vmem:[#allocation2 + $0x20] sm:$0xf]  ;;  %543 = vst [vmem:[#allocation2 + $0x38] sm:$0xf] %v542_v10  ;;  %v503_v47 = vsel %vm2537_vm5, %v482_v28, %v502_v18  ;;  %v2085_v60 = vld [vmem:[%s3070_s3 + $0xc] sm:$0xf] }
  0x3a   : > { %v614_v21 = vsel %vm2621_vm10, %v609_v11, %v613_v59  ;;  %v623_v22 = vrot.slane %v622_v12, 4  ;;  %v2635_v23 = vld [vmem:[#allocation2 + $0x24] sm:$0x1]  ;;  %v630_v24 = vshrl.u32 %v557_v16, 16  ;;  %v633_v25 = vshll.u32 %v557_v16, 16 }
  0x3b   : > { %v689_v26 = vunpack.c.l.b16 %v614_v21  ;;  %v639_v27 = vshll.u32 %v2635_v23, 16  ;;  %546 = vst [vmem:[#allocation2 + $0x3c] sm:$0x1] %v545_v17  ;;  %v509_v48 = vsel %vm2546_vm6, %v483_v29, %v508_v30  ;;  %v561_v12 = vld [vmem:[%s3070_s3] sm:$0xf]  ;;  %v579_v16 = vrot.slane %v577_v20, 5 }
  0x3c   : > { %v628_v31 = vsel %vm2621_vm10, %v623_v22, %v627_v7  ;;  %v558_v32 = vld [vmem:[#allocation2 + $0x28] sm:$0xf]  ;;  %v632_v33 = vrot.slane %v630_v24, 4  ;;  %v635_v34 = vrot.slane %v633_v25, 5  ;;  %504 = vst [vmem:[#allocation2 + $0x8] sm:$0xf] %v503_v47 }
  0x3d   : > { %v690_v36 = vunpack.c.l.b16 %v628_v31  ;;  %v2640_v37 = vld [vmem:[#allocation2 + $0x2c] sm:$0x1]  ;;  %v641_v38 = vrot.slane %v639_v27, 5  ;;  %v644_v40 = vshrl.u32 %v558_v32, 16  ;;  %v647_v42 = vshll.u32 %v558_v32, 16 }
  0x3e   : > { %v636_v44 = vor.u32 %v635_v34, %v632_v33  ;;  %v653_v45 = vshll.u32 %v2640_v37, 16  ;;  %v559_v46 = vld [vmem:[#allocation2 + $0x30] sm:$0xf]  ;;  %510 = vst [vmem:[#allocation2 + $0xc] sm:$0x1] %v509_v48  ;;  %v583_v17 = vshll.u32 %v2649_v54, 16  ;;  %v580_v27 = vor.u32 %v579_v16, %v576_v35 }
  0x3f   : > { %v696_v2 = vpack.c.b16 %v690_v36, %v689_v26  ;;  %v646_v49 = vrot.slane %v644_v40, 4  ;;  %v649_v50 = vrot.slane %v647_v42, 5  ;;  %v2647_v51 = vld [vmem:[#allocation2 + $0x34] sm:$0x1]  ;;  %v658_v52 = vshrl.u32 %v559_v46, 16 }
  0x40   : > { %v637_v55 = vrot.slane %v636_v44, 4  ;;  %v655_v56 = vrot.slane %v653_v45, 5  ;;  %v560_v57 = vld [vmem:[#allocation2 + $0x38] sm:$0xf]  ;;  %v661_v58 = vshll.u32 %v559_v46, 16  ;;  %v667_v59 = vshll.u32 %v2647_v51, 16 }
  0x41   : > { %2049 = vmatmul.msk.bf16.vlgmr.msra.gmra.mxu1 %vm699_vm9, %v696_v2  ;;  %v650_v61 = vor.u32 %v649_v50, %v646_v49  ;;  %v660_v62 = vrot.slane %v658_v52, 4  ;;  %v672_v63 = vshrl.u32 %v560_v57, 16  ;;  %v675_v0 = vshll.u32 %v560_v57, 16  ;;  %v2106_v18 = vld [vmem:[%s3070_s3 + $0x10] sm:$0xf] }
  0x42   : > { %v642_v1 = vsel %vm2621_vm10, %v637_v55, %v641_v38  ;;  %v2658_v3 = vld [vmem:[#allocation2 + $0x3c] sm:$0x1]  ;;  %v663_v4 = vrot.slane %v661_v58, 5  ;;  %v669_v7 = vrot.slane %v667_v59, 5  ;;  %v977_v22 = vsel %vm712_vm0, %v2085_v60, 0 }
  0x43   : > { %v651_v8 = vrot.slane %v650_v61, 4  ;;  %v691_v9 = vunpack.c.l.b16 %v642_v1  ;;  %v674_v10 = vrot.slane %v672_v63, 4  ;;  %v677_v11 = vrot.slane %v675_v0, 5  ;;  %986 = vmatpush.bf16.msrb.mxu3 %v977_v22  ;;  %v2054_v31 = vld [vmem:[#allocation2] sm:$0xf] }
  0x44   : > { %v664_v14 = vor.u32 %v663_v4, %v660_v62  ;;  %v681_v15 = vshll.u32 %v2658_v3, 16  ;;  %v585_v29 = vrot.slane %v583_v17, 5  ;;  %v778_v20 = vsel %vm712_vm0, %v561_v12, 0  ;;  %v554_v34 = vld [vmem:[#allocation2 + $0x8] sm:$0xf] }
  0x45   : > { %v656_v19 = vsel %vm2621_vm10, %v651_v8, %v655_v56  ;;  %v678_v21 = vor.u32 %v677_v11, %v674_v10  ;;  %v1171_v30 = vsel %vm712_vm0, %v2106_v18, 0  ;;  %v581_v36 = vrot.slane %v580_v27, 4  ;;  %787 = vmatpush.bf16.msrb.mxu1 %v778_v20  ;;  %v809_v40 = vld [vmem:[#allocation2] sm:$0xe]  ;;  %v563_v44 = vld [vmem:[#allocation2 + $0xc] sm:$0x1] }
  0x46   : > { %v692_v24 = vunpack.c.l.b16 %v656_v19  ;;  %v665_v25 = vrot.slane %v664_v14, 4  ;;  %v683_v26 = vrot.slane %v681_v15, 5  ;;  %v838_v38 = vrot.slane %v2649_v54, 5  ;;  %1180 = vmatpush.bf16.msrb.mxu0 %v1171_v30  ;;  %v2167_v47 = vld [vmem:[#allocation2 + $0x4] sm:$0xf0] }
  0x47   : > { %v679_v28 = vrot.slane %v678_v21, 4  ;;  %v588_v45 = vshrl.u32 %v554_v34, 16  ;;  %v591_v46 = vshll.u32 %v554_v34, 16  ;;  %v597_v2 = vshll.u32 %v563_v44, 16  ;;  %v810_v49 = vld [vmem:[#allocation2 + $0x8] sm:$0xe] }
  0x48   : > { %v697_v32 = vpack.c.b16 %v692_v24, %v691_v9  ;;  %v670_v33 = vsel %vm2621_vm10, %v665_v25, %v669_v7  ;;  %v2124_v50 = vld [vmem:[%s3070_s3 + $0x18] sm:$0xf]  ;;  %v586_v52 = vsel %vm2621_vm10, %v581_v36, %v585_v29  ;;  %v842_v56 = vrot.slane %v563_v44, 5  ;;  %v1016_v57 = vld [vmem:[#allocation2 + $0x8] sm:$0xf] }
  0x49   : > { %v684_v35 = vsel %vm2621_vm10, %v679_v28, %v683_v26  ;;  %v693_v42 = vunpack.c.l.b16 %v670_v33  ;;  %v590_v54 = vrot.slane %v588_v45, 4  ;;  %v593_v55 = vrot.slane %v591_v46, 5  ;;  %v1018_v61 = vld [vmem:[#allocation2 + $0x10] sm:$0xf]  ;;  %v2690_v7 = vld [vmem:[#allocation2 + $0xc] sm:$0x1] }
  0x4a   : > { %2050 = vmatmul.msk.bf16.vlgmr.msra.gmra.mxu2 %vm699_vm9, %v697_v32  ;;  %v694_v48 = vunpack.c.l.b16 %v684_v35  ;;  %v2055_v59 = vor.u32 %v2167_v47, %v2054_v31  ;;  %vm834_vm12 = vcmask 1046532   ;;  %v2072_v60 = vrot.slane %v809_v40, 9  ;;  %v2696_v14 = vld [vmem:[#allocation2 + $0x14] sm:$0x1]  ;;  %v2145_v19 = vld [vmem:[%s3070_s3 + $0x1c] sm:$0xf] }
  0x4b   : > { %v594_v62 = vor.u32 %v593_v55, %v590_v54  ;;  %v599_v63 = vrot.slane %v597_v2, 5  ;;  %vm2684_vm13 = vmor %vm833_vm11, %vm834_vm12  ;;  %v2073_v1 = vrot.slane %v810_v49, 9  ;;  %v1376_v4 = vsel %vm712_vm0, %v2124_v50, 0  ;;  %v2119_v21 = vld [vmem:[%s3070_s3 + $0x14] sm:$0xf] }
  0x4c   : > { %v698_v58 = vpack.c.b16 %v694_v48, %v693_v42  ;;  %1385 = vmatpush.bf16.msra.mxu2 %v1376_v4  ;;  %v1033_v8 = vshrl.u32 %v1016_v57, 16  ;;  %v1036_v9 = vshll.u32 %v1016_v57, 16  ;;  %v839_v11 = vsel %vm2684_vm13, %v2072_v60, %v838_v38  ;;  %v2158_v27 = vld [vmem:[%s3070_s3 + $0x20] sm:$0xf]  ;;  %v2088_v40 = vld [vmem:[#allocation2 + $0x8] sm:$0xf] }
  0x4d   : > { %v595_v10 = vrot.slane %v594_v62, 4  ;;  %v843_v12 = vsel %vm2684_vm13, %v2073_v1, %v842_v56  ;;  %v1047_v15 = vshrl.u32 %v1018_v61, 16  ;;  %v687_v16 = vunpack.c.l.b16 %v586_v52  ;;  %v2171_v35 = vld [vmem:[#allocation2 + $0xc] sm:$0xf0]  ;;  %v812_v48 = vld [vmem:[#allocation2 + $0x18] sm:$0xe] }
  0x4e   : > { %2051 = vmatmul.msk.bf16.vlgmr.msra.gmra.mxu3 %vm699_vm9, %v698_v58  ;;  %v1035_v17 = vrot.slane %v1033_v8, 4  ;;  %v1038_v18 = vrot.slane %v1036_v9, 5  ;;  %v1042_v24 = vshll.u32 %v2690_v7, 16  ;;  %v1050_v26 = vshll.u32 %v1018_v61, 16  ;;  %v811_v44 = vld [vmem:[#allocation2 + $0x10] sm:$0xe] }
  0x4f   : > { %v600_v22 = vsel %vm2621_vm10, %v595_v10, %v599_v63  ;;  %v1049_v25 = vrot.slane %v1047_v15, 4  ;;  %v870_v29 = vunpack.c.l.b16 %v839_v11  ;;  %v871_v20 = vunpack.c.l.b16 %v843_v12  ;;  %v1020_v2 = vld [vmem:[#allocation2 + $0x18] sm:$0xf]  ;;  %v1022_v52 = vld [vmem:[#allocation2 + $0x20] sm:$0xf] }
  0x50   : > { %v688_v28 = vunpack.c.l.b16 %v600_v22  ;;  %v1039_v30 = vor.u32 %v1038_v18, %v1035_v17  ;;  %v1052_v31 = vrot.slane %v1050_v26, 5  ;;  %v1056_v32 = vshll.u32 %v2696_v14, 16  ;;  %v2058_v55 = vld [vmem:[#allocation2 + $0x10] sm:$0xf]  ;;  %v2168_v57 = vld [vmem:[#allocation2 + $0x14] sm:$0xf0] }
  0x51   : > { %2068 = vmatmul.msk.bf16.vlgmr.msrb.gmra.mxu1 %vm699_vm9, %v2055_v59  ;;  %v1570_v33 = vsel %vm712_vm0, %v2145_v19, 0  ;;  %v1293_v36 = vsel %vm712_vm0, %v2119_v21, 0  ;;  %v1692_v38 = vsel %vm712_vm0, %v2158_v27, 0  ;;  %v878_v45 = vpack.c.b16 %v871_v20, %v870_v29  ;;  %v2728_v15 = vld [vmem:[#allocation2 + $0x1c] sm:$0x1] }
  0x52   : > { %v695_v34 = vpack.c.b16 %v688_v28, %v687_v16  ;;  %1579 = vmatpush.bf16.msra.mxu3 %v1570_v33  ;;  %v1053_v42 = vor.u32 %v1052_v31, %v1049_v25  ;;  %1302 = vmatpush.bf16.msra.mxu1 %v1293_v36  ;;  %v1040_v46 = vrot.slane %v1039_v30, 4  ;;  %v1044_v47 = vrot.slane %v1042_v24, 5  ;;  %v2730_v19 = vld [vmem:[#allocation2 + $0x24] sm:$0x1]  ;;  %v2045_v21 = vld [vmem:[%s2497_s8 + $0x40] sm:$0xf] }
  0x53   : > { %v1058_v50 = vrot.slane %v1056_v32, 5  ;;  %v2089_v54 = vor.u32 %v2171_v35, %v2088_v40  ;;  %v2074_v56 = vrot.slane %v811_v44, 9  ;;  %v846_v58 = vrot.slane %v2607_v41, 5  ;;  %v2046_v26 = vld [vmem:[%s2497_s8 + $0x44] sm:$0x1]  ;;  %s2165_s8 = sshll.u32 %s2477_s17, 5 }
  0x54   : > { %2048 = vmatmul.msk.bf16.vlgmr.msra.gmra.mxu0 %vm699_vm9, %v695_v34  ;;  %v1054_v49 = vrot.slane %v1053_v42, 4  ;;  %v2075_v59 = vrot.slane %v812_v48, 9  ;;  %v850_v60 = vrot.slane %v2612_v53, 5  ;;  %v1061_v61 = vshrl.u32 %v1020_v2, 16  ;;  %v2092_v31 = vld [vmem:[#allocation2 + $0x18] sm:$0xf]  ;;  %s2923_s21 = scalar_lea.vmem %s3071_s4, %s2165_s8 }
  0x55   : > { %1701 = vmatpush.bf16.msra.mxu0 %v1692_v38  ;;  %v1045_v62 = vsel %vm2621_vm10, %v1040_v46, %v1044_v47  ;;  %v1064_v63 = vshll.u32 %v1020_v2, 16  ;;  %v1075_v1 = vshrl.u32 %v1022_v52, 16  ;;  %v1078_v4 = vshll.u32 %v1022_v52, 16  ;;  %v2172_v34 = vld [vmem:[#allocation2 + $0x1c] sm:$0xf0]  ;;  %s2991_s17 = sand.u32 1, %s2357_s25  }
  0x56   : > { %v1059_v8 = vsel %vm2621_vm10, %v1054_v49, %v1058_v50  ;;  %v2059_v9 = vor.u32 %v2168_v57, %v2058_v55  ;;  %v1146_v10 = vunpack.c.l.b16 %v1045_v62  ;;  %v847_v41 = vsel %vm2684_vm13, %v2074_v56, %v846_v58  ;;  %v813_v38 = vld [vmem:[#allocation2 + $0x20] sm:$0xe]  ;;  %v1024_v47 = vld [vmem:[#allocation2 + $0x28] sm:$0xf]  ;;  %v1026_v50 = vld [vmem:[#allocation2 + $0x30] sm:$0xf] }
  0x57   : > { %v851_v53 = vsel %vm2684_vm13, %v2075_v59, %v850_v60  ;;  %v1063_v11 = vrot.slane %v1061_v61, 4  ;;  %v1147_v12 = vunpack.c.l.b16 %v1059_v8  ;;  %v1066_v16 = vrot.slane %v1064_v63, 5  ;;  %v2062_v52 = vld [vmem:[#allocation2 + $0x20] sm:$0xf]  ;;  %v550_v8 = vld [vmem:[#allocation2 + $0x44] sm:$0x1] }
  0x58   : > { %v1077_v17 = vrot.slane %v1075_v1, 4  ;;  %v1080_v18 = vrot.slane %v1078_v4, 5  ;;  %v872_v22 = vunpack.c.l.b16 %v847_v41  ;;  %v873_v24 = vunpack.c.l.b16 %v851_v53  ;;  %v1028_v43 = vld [vmem:[#allocation2 + $0x38] sm:$0xf]  ;;  %s338_s20 = scalar_lea.vmem [#allocation3], %s2991_s17  ;;  %s344_s23 = scalar_lea.vmem [#allocation5], %s2991_s17 }
  0x59   : > { %v1070_v25 = vshll.u32 %v2728_v15, 16  ;;  %v1154_v27 = vpack.c.b16 %v1147_v12, %v1146_v10  ;;  %v1067_v28 = vor.u32 %v1066_v16, %v1063_v11  ;;  %v1084_v20 = vshll.u32 %v2730_v19, 16  ;;  %s3007_s30 = sshll.u32 %s344_s23, 4  ;;  %s1824_s27 = scalar_lea.sflag [#allocation4], %s2991_s17  ;;  %s1857_s30 = int_to_ptr.vmem [resolvable:$true] %s3007_s30 }
  0x5a   : > { %2081 = vmatmul.msk.bf16.vlgmr.msrb.gmra.mxu2 %vm699_vm9, %v878_v45  ;;  %v1081_v29 = vor.u32 %v1080_v18, %v1077_v17  ;;  %v426_v30 = vunpack.c.l.bf16 %v2045_v21  ;;  %v427_v32 = vunpack.c.l.bf16 %v2046_v26  ;;  %v879_v33 = vpack.c.b16 %v873_v24, %v872_v22  ;;  %v814_v45 = vld [vmem:[#allocation2 + $0x28] sm:$0xe]  ;;  %v2758_v24 = vld [vmem:[#allocation2 + $0x2c] sm:$0x1]  ;;  %s2283_s8 = scalar_lea.hbm %s3073_s6, 2 }
  0x5b   : > { %v1072_v36 = vrot.slane %v1070_v25, 5  ;;  %v1068_v35 = vrot.slane %v1067_v28, 4  ;;  %v1086_v44 = vrot.slane %v1084_v20, 5  ;;  %v2093_v48 = vor.u32 %v2172_v34, %v2092_v31  ;;  %v2760_v25 = vld [vmem:[#allocation2 + $0x34] sm:$0x1]  ;;  %p2285_p2 = scmp.lt.s32.totalorder %s2283_s8, %s2279_s15 }
  0x5c   : > { %v445_v40 = vmul.f32 %v2499_v5, %v426_v30  ;;  %v1082_v42 = vrot.slane %v1081_v29, 4  ;;  %v446_v46 = vmul.f32 %v2499_v5, %v427_v32  ;;  %v2076_v2 = vrot.slane %v813_v38, 9  ;;  %v815_v31 = vld [vmem:[#allocation2 + $0x30] sm:$0xe] }
  0x5d   : > { %v854_v49 = vrot.slane %v2635_v23, 5  ;;  %v2077_v55 = vrot.slane %v814_v45, 9  ;;  %v858_v56 = vrot.slane %v2640_v37, 5  ;;  %v1073_v5 = vsel %vm2621_vm10, %v1068_v35, %v1072_v36  ;;  %v547_v37 = vld [vmem:[#allocation2 + $0x40] sm:$0xf]  ;;  %p2286_p3 = por %p2285_p2, %p2284_p1 }
  0x5e   : > { %2102 = vmatmul.msk.bf16.vlgmr.msrb.gmra.mxu3 %vm699_vm9, %v2089_v54  ;;  %v2169_v54 = vld [vmem:[#allocation2 + $0x24] sm:$0xf0]  ;;  %v464_v57 = vadd.f32 %v2507_v13, %v445_v40  ;;  %v465_v58 = vadd.f32 %v2507_v13, %v446_v46  ;;  %v1087_v59 = vsel %vm2621_vm10, %v1082_v42, %v1086_v44  ;;  %v1089_v60 = vshrl.u32 %v1024_v47, 16  ;;  %v2173_v34 = vld [vmem:[#allocation2 + $0x2c] sm:$0xf0] }
  0x5f   : > { %v1092_v23 = vshll.u32 %v1024_v47, 16  ;;  %v1103_v61 = vshrl.u32 %v1026_v50, 16  ;;  %v1106_v62 = vshll.u32 %v1026_v50, 16  ;;  %v2063_v4 = vor.u32 %v2169_v54, %v2062_v52  ;;  %v816_v44 = vld [vmem:[#allocation2 + $0x38] sm:$0xe]  ;;  %p2287_p5 = pnand %p2286_p3, %p2282_p0 }
  0x60   : > { %v480_v63 = vmax.f32 %v464_v57, 0.0  ;;  %v481_v1 = vmax.f32 %v465_v58, 0.0  ;;  %v855_v13 = vsel %vm2684_vm13, %v2076_v2, %v854_v49  ;;  %v1148_v53 = vunpack.c.l.b16 %v1073_v5  ;;  %v2066_v49 = vld [vmem:[#allocation2 + $0x30] sm:$0xf]  ;;  %v2170_v50 = vld [vmem:[#allocation2 + $0x34] sm:$0xf0] }
  0x61   : > { %2069 = vmatmul.msk.bf16.gmra.mxu1 %vm699_vm9, %v2059_v9  ;;  %v859_v9 = vsel %vm2684_vm13, %v2077_v55, %v858_v56  ;;  %v1149_v11 = vunpack.c.l.b16 %v1087_v59  ;;  %v1091_v12 = vrot.slane %v1089_v60, 4  ;;  %v1094_v16 = vrot.slane %v1092_v23, 5  ;;  %v2775_v23 = vld [vmem:[#allocation2 + $0x3c] sm:$0x1] }
  0x62   : > { %v496_v10 = vpack.c.bf16 %v480_v63, %v480_v63  ;;  %v497_v41 = vpack.c.bf16 %v481_v1, %v481_v1  ;;  %v1105_v17 = vrot.slane %v1103_v61, 4  ;;  %v1108_v18 = vrot.slane %v1106_v62, 5  ;;  %v1210_v61 = vld [vmem:[#allocation2 + $0x8] sm:$0xe]  ;;  %v1211_v62 = vld [vmem:[#allocation2 + $0x10] sm:$0xe] }
  0x63   : > { %v1155_v26 = vpack.c.b16 %v1149_v11, %v1148_v53  ;;  %v875_v28 = vunpack.c.l.b16 %v859_v9  ;;  %v1095_v29 = vor.u32 %v1094_v16, %v1091_v12  ;;  %v1098_v20 = vshll.u32 %v2758_v24, 16 }
  0x64   : > { %2107 = vmatmul.msk.bf16.vlgmr.msrb.gmra.mxu0 %vm699_vm9, %v1154_v27  ;;  %v548_v21 = vsel %vm2537_vm5, %v496_v10, %v547_v37  ;;  %v551_v22 = vsel %vm2546_vm6, %v497_v41, %v550_v8  ;;  %v874_v27 = vunpack.c.l.b16 %v855_v13  ;;  %v1109_v30 = vor.u32 %v1108_v18, %v1105_v17  ;;  %v1415_v8 = vld [vmem:[#allocation2 + $0x10] sm:$0xf]  ;;  %v1417_v13 = vld [vmem:[#allocation2 + $0x18] sm:$0xf] }
  0x65   : > { %549 = vst [vmem:[#allocation2 + $0x40] sm:$0xf] %v548_v21  ;;  %v1112_v39 = vshll.u32 %v2760_v25, 16  ;;  %v1096_v36 = vrot.slane %v1095_v29, 4  ;;  %v1100_v38 = vrot.slane %v1098_v20, 5  ;;  %v2078_v45 = vrot.slane %v815_v31, 9 }
  0x66   : > { %552 = vst [vmem:[#allocation2 + $0x44] sm:$0x1] %v551_v22  ;;  %v880_v32 = vpack.c.b16 %v875_v28, %v874_v27  ;;  %v1110_v40 = vrot.slane %v1109_v30, 4  ;;  %v862_v46 = vrot.slane %v2647_v51, 5  ;;  %v1117_v47 = vshrl.u32 %v1028_v43, 16 }
  0x67   : > { %v1114_v35 = vrot.slane %v1112_v39, 5  ;;  %v1101_v55 = vsel %vm2621_vm10, %v1096_v36, %v1100_v38  ;;  %v2079_v57 = vrot.slane %v816_v44, 9  ;;  %v866_v58 = vrot.slane %v2658_v3, 5  ;;  %v2791_v31 = vld [vmem:[#allocation2 + $0x14] sm:$0x1] }
  0x68   : > { %v863_v51 = vsel %vm2684_vm13, %v2078_v45, %v862_v46  ;;  %v1119_v5 = vrot.slane %v1117_v47, 4  ;;  %v2067_v60 = vor.u32 %v2170_v50, %v2066_v49  ;;  %v1150_v63 = vunpack.c.l.b16 %v1101_v55 }
  0x69   : > { %v1115_v56 = vsel %vm2621_vm10, %v1110_v40, %v1114_v35  ;;  %v1236_v3 = vrot.slane %v2690_v7, 5  ;;  %v1240_v9 = vrot.slane %v2696_v14, 5  ;;  %v867_v10 = vsel %vm2684_vm13, %v2079_v57, %v866_v58  ;;  %v2794_v35 = vld [vmem:[#allocation2 + $0x1c] sm:$0x1] }
  0x6a   : > { %2082 = vmatmul.msk.bf16.gmra.mxu2 %vm699_vm9, %v879_v33  ;;  %v2096_v33 = vld [vmem:[#allocation2 + $0x28] sm:$0xf]  ;;  %v1151_v1 = vunpack.c.l.b16 %v1115_v56  ;;  %v876_v41 = vunpack.c.l.b16 %v863_v51  ;;  %v1126_v12 = vshll.u32 %v2775_v23, 16  ;;  %v2111_v16 = vrot.slane %v1210_v61, 9  ;;  %v1213_v61 = vld [vmem:[#allocation2 + $0x20] sm:$0xe] }
  0x6b   : > { %v2097_v2 = vor.u32 %v2173_v34, %v2096_v33  ;;  %v2112_v17 = vrot.slane %v1211_v62, 9  ;;  %v1432_v18 = vshrl.u32 %v1415_v8, 16  ;;  %v1435_v21 = vshll.u32 %v1415_v8, 16  ;;  %v1419_v62 = vld [vmem:[#allocation2 + $0x20] sm:$0xf] }
  0x6c   : > { %v1030_v42 = vld [vmem:[#allocation2 + $0x40] sm:$0xf]  ;;  %v1446_v22 = vshrl.u32 %v1417_v13, 16  ;;  %v1156_v7 = vpack.c.b16 %v1151_v1, %v1150_v63  ;;  %v877_v27 = vunpack.c.l.b16 %v867_v10  ;;  %v1128_v20 = vrot.slane %v1126_v12, 5  ;;  %v1421_v63 = vld [vmem:[#allocation2 + $0x28] sm:$0xf] }
  0x6d   : > { %v1131_v52 = vshrl.u32 %v1030_v42, 16  ;;  %v1134_v54 = vshll.u32 %v1030_v42, 16  ;;  %v2782_v53 = vld [vmem:[#allocation2 + $0x44] sm:$0x1]  ;;  %v1237_v30 = vsel %vm2684_vm13, %v2111_v16, %v1236_v3  ;;  %v1241_v39 = vsel %vm2684_vm13, %v2112_v17, %v1240_v9  ;;  %v2100_v42 = vld [vmem:[#allocation2 + $0x38] sm:$0xf] }
  0x6e   : > { %2103 = vmatmul.msk.bf16.gmra.mxu3 %vm699_vm9, %v2093_v48  ;;  %v1120_v48 = vshll.u32 %v1028_v43, 16  ;;  %v1140_v28 = vshll.u32 %v2782_v53, 16  ;;  %v1434_v43 = vrot.slane %v1432_v18, 4  ;;  %v1448_v33 = vrot.slane %v1446_v22, 4  ;;  %v2174_v44 = vld [vmem:[#allocation2 + $0x3c] sm:$0xf0] }
  0x6f   : > { %v1136_v37 = vrot.slane %v1134_v54, 5  ;;  %v881_v36 = vpack.c.b16 %v877_v27, %v876_v41  ;;  %v1268_v45 = vunpack.c.l.b16 %v1237_v30  ;;  %v1269_v46 = vunpack.c.l.b16 %v1241_v39  ;;  %v1609_v3 = vld [vmem:[#allocation2 + $0x10] sm:$0xe]  ;;  %v1610_v9 = vld [vmem:[#allocation2 + $0x18] sm:$0xe] }
  0x70   : > { %v1122_v59 = vrot.slane %v1120_v48, 5  ;;  %v1142_v40 = vrot.slane %v1140_v28, 5  ;;  %v1441_v47 = vshll.u32 %v2791_v31, 16  ;;  %v1455_v50 = vshll.u32 %v2794_v35, 16 }
  0x71   : > { %2070 = vmatmul.msk.bf16.gmra.mxu1 %vm699_vm9, %v2063_v4  ;;  %v1133_v4 = vrot.slane %v1131_v52, 4  ;;  %v2101_v52 = vor.u32 %v2174_v44, %v2100_v42  ;;  %v1276_v56 = vpack.c.b16 %v1269_v46, %v1268_v45  ;;  %v1244_v41 = vrot.slane %v2728_v15, 5 }
  0x72   : > { %v1123_v11 = vor.u32 %v1122_v59, %v1119_v5  ;;  %v1443_v57 = vrot.slane %v1441_v47, 5  ;;  %v1457_v59 = vrot.slane %v1455_v50, 5  ;;  %v1248_v12 = vrot.slane %v2730_v19, 5  ;;  %v1214_v47 = vld [vmem:[#allocation2 + $0x28] sm:$0xe] }
  0x73   : > { %v1137_v14 = vor.u32 %v1136_v37, %v1133_v4  ;;  %v2127_v4 = vld [vmem:[#allocation2 + $0x10] sm:$0xf]  ;;  %v2175_v37 = vld [vmem:[#allocation2 + $0x14] sm:$0xf0]  ;;  %v1460_v16 = vshrl.u32 %v1419_v62, 16  ;;  %v1463_v17 = vshll.u32 %v1419_v62, 16 }
  0x74   : > { %2108 = vmatmul.msk.bf16.gmra.mxu0 %vm699_vm9, %v1155_v26  ;;  %v1449_v26 = vshll.u32 %v1417_v13, 16  ;;  %v1124_v29 = vrot.slane %v1123_v11, 4  ;;  %v2114_v11 = vrot.slane %v1213_v61, 9  ;;  %v1474_v18 = vshrl.u32 %v1421_v63, 16  ;;  %v1423_v50 = vld [vmem:[#allocation2 + $0x30] sm:$0xf] }
  0x75   : > { %v1138_v38 = vrot.slane %v1137_v14, 4  ;;  %v2128_v22 = vor.u32 %v2175_v37, %v2127_v4  ;;  %v2151_v27 = vrot.slane %v1610_v9, 9  ;;  %v1639_v14 = vrot.slane %v2794_v35, 5  ;;  %v1612_v61 = vld [vmem:[#allocation2 + $0x28] sm:$0xe] }
  0x76   : > { %v1451_v34 = vrot.slane %v1449_v26, 5  ;;  %v1129_v48 = vsel %vm2621_vm10, %v1124_v29, %v1128_v20  ;;  %v2150_v26 = vrot.slane %v1609_v3, 9  ;;  %v1249_v19 = vsel %vm2684_vm13, %v2114_v11, %v1248_v12 }
  0x77   : > { %v1143_v54 = vsel %vm2621_vm10, %v1138_v38, %v1142_v40  ;;  %v1152_v55 = vunpack.c.l.b16 %v1129_v48  ;;  %v1462_v20 = vrot.slane %v1460_v16, 4  ;;  %v1465_v30 = vrot.slane %v1463_v17, 5  ;;  %v1215_v48 = vld [vmem:[#allocation2 + $0x30] sm:$0xe] }
  0x78   : > { %v1452_v49 = vor.u32 %v1451_v34, %v1448_v33  ;;  %v1153_v58 = vunpack.c.l.b16 %v1143_v54  ;;  %v1476_v39 = vrot.slane %v1474_v18, 4  ;;  %v1422_v33 = vld [vmem:[#allocation2 + $0x2c] sm:$0x1]  ;;  %v1271_v34 = vunpack.c.l.b16 %v1249_v19 }
  0x79   : > { %v1640_v40 = vsel %vm2684_vm13, %v2151_v27, %v1639_v14  ;;  %v1466_v35 = vor.u32 %v1465_v30, %v1462_v20  ;;  %v1483_v45 = vshll.u32 %v1422_v33, 16  ;;  %v1488_v62 = vshrl.u32 %v1423_v50, 16  ;;  %v1424_v27 = vld [vmem:[#allocation2 + $0x34] sm:$0x1]  ;;  %v1426_v14 = vld [vmem:[#allocation2 + $0x3c] sm:$0x1] }
  0x7a   : > { %2083 = vmatmul.msk.bf16.gmra.mxu2 %vm699_vm9, %v880_v32  ;;  %v1437_v32 = vrot.slane %v1435_v21, 5  ;;  %v1453_v5 = vrot.slane %v1452_v49, 4  ;;  %v1157_v1 = vpack.c.b16 %v1153_v58, %v1152_v55  ;;  %v1477_v21 = vshll.u32 %v1421_v63, 16  ;;  %v1611_v58 = vld [vmem:[#allocation2 + $0x20] sm:$0xe] }
  0x7b   : > { %v1668_v49 = vunpack.c.l.b16 %v1640_v40  ;;  %v1467_v54 = vrot.slane %v1466_v35, 4  ;;  %v1491_v63 = vshll.u32 %v1423_v50, 16  ;;  %v1490_v16 = vrot.slane %v1488_v62, 4 }
  0x7c   : > { %v1458_v13 = vsel %vm2621_vm10, %v1453_v5, %v1457_v59  ;;  %v1252_v5 = vrot.slane %v2758_v24, 5  ;;  %v2116_v59 = vrot.slane %v1215_v48, 9  ;;  %v1497_v30 = vshll.u32 %v1424_v27, 16  ;;  %v2135_v48 = vld [vmem:[#allocation2 + $0x30] sm:$0xf] }
  0x7d   : > { %v1546_v29 = vunpack.c.l.b16 %v1458_v13  ;;  %v2176_v13 = vld [vmem:[#allocation2 + $0x24] sm:$0xf0]  ;;  %v1493_v17 = vrot.slane %v1491_v63, 5  ;;  %v1651_v63 = vrot.slane %v1424_v27, 5 }
  0x7e   : > { %2104 = vmatmul.msk.bf16.gmra.mxu3 %vm699_vm9, %v2097_v2  ;;  %v1438_v2 = vor.u32 %v1437_v32, %v1434_v43  ;;  %v1479_v43 = vrot.slane %v1477_v21, 5  ;;  %v1420_v32 = vld [vmem:[#allocation2 + $0x24] sm:$0x1] }
  0x7f   : > { %v1469_v42 = vshll.u32 %v1420_v32, 16  ;;  %v1643_v24 = vrot.slane %v1420_v32, 5  ;;  %v1494_v20 = vor.u32 %v1493_v17, %v1490_v16 }
  0x80   : > { %v1439_v51 = vrot.slane %v1438_v2, 4  ;;  %v1480_v44 = vor.u32 %v1479_v43, %v1476_v39  ;;  %v1511_v43 = vshll.u32 %v1426_v14, 16 }
  0x81   : > { %2071 = vmatmul.msk.bf16.gmra.mxu1 %vm699_vm9, %v2067_v60  ;;  %v1212_v60 = vld [vmem:[#allocation2 + $0x18] sm:$0xe]  ;;  %v1471_v55 = vrot.slane %v1469_v42, 5 }
  0x82   : > { %v1444_v8 = vsel %vm2621_vm10, %v1439_v51, %v1443_v57  ;;  %v2113_v10 = vrot.slane %v1212_v60, 9  ;;  %v1485_v57 = vrot.slane %v1483_v45, 5  ;;  %v2115_v51 = vrot.slane %v1214_v47, 9  ;;  %v1216_v42 = vld [vmem:[#allocation2 + $0x38] sm:$0xe] }
  0x83   : > { %v1545_v28 = vunpack.c.l.b16 %v1444_v8  ;;  %v1256_v60 = vrot.slane %v2760_v25, 5  ;;  %v2131_v8 = vld [vmem:[#allocation2 + $0x20] sm:$0xf]  ;;  %v1472_v3 = vsel %vm2621_vm10, %v1467_v54, %v1471_v55  ;;  %v2153_v25 = vrot.slane %v1612_v61, 9  ;;  %v1614_v54 = vld [vmem:[#allocation2 + $0x38] sm:$0xe] }
  0x84   : > { %2109 = vmatmul.msk.bf16.gmra.mxu0 %vm699_vm9, %v1156_v7  ;;  %v1635_v7 = vrot.slane %v2791_v31, 5  ;;  %v1245_v15 = vsel %vm2684_vm13, %v2113_v10, %v1244_v41  ;;  %v1647_v10 = vrot.slane %v1422_v33, 5  ;;  %v2152_v41 = vrot.slane %v1611_v58, 9  ;;  %v1427_v45 = vld [vmem:[#allocation2 + $0x40] sm:$0xf] }
  0x85   : > { %v1270_v31 = vunpack.c.l.b16 %v1245_v15  ;;  %v1253_v11 = vsel %vm2684_vm13, %v2115_v51, %v1252_v5  ;;  %v1257_v12 = vsel %vm2684_vm13, %v2116_v59, %v1256_v60  ;;  %v1513_v35 = vrot.slane %v1511_v43, 5  ;;  %v2178_v43 = vld [vmem:[#allocation2 + $0x44] sm:$0xf0] }
  0x86   : > { %v1636_v38 = vsel %vm2684_vm13, %v2150_v26, %v1635_v7  ;;  %v1547_v26 = vunpack.c.l.b16 %v1472_v3  ;;  %v1272_v15 = vunpack.c.l.b16 %v1253_v11  ;;  %v1273_v19 = vunpack.c.l.b16 %v1257_v12 }
  0x87   : > { %v1277_v46 = vpack.c.b16 %v1271_v34, %v1270_v31  ;;  %v1667_v2 = vunpack.c.l.b16 %v1636_v38  ;;  %v1499_v38 = vrot.slane %v1497_v30, 5  ;;  %v2117_v55 = vrot.slane %v1216_v42, 9 }
  0x88   : > { %v1278_v34 = vpack.c.b16 %v1273_v19, %v1272_v15  ;;  %v1264_v58 = vrot.slane %v2782_v53, 5  ;;  %v1516_v51 = vshrl.u32 %v1427_v45, 16  ;;  %v1519_v5 = vshll.u32 %v1427_v45, 16 }
  0x89   : > { %v1675_v37 = vpack.c.b16 %v1668_v49, %v1667_v2  ;;  %v2177_v2 = vld [vmem:[#allocation2 + $0x34] sm:$0xf0] }
  0x8a   : > { %2084 = vmatmul.msk.bf16.gmra.mxu2 %vm699_vm9, %v881_v36  ;;  %v1553_v36 = vpack.c.b16 %v1546_v29, %v1545_v28  ;;  %v1644_v28 = vsel %vm2684_vm13, %v2152_v41, %v1643_v24  ;;  %v1648_v29 = vsel %vm2684_vm13, %v2153_v25, %v1647_v10  ;;  %v2136_v61 = vor.u32 %v2177_v2, %v2135_v48  ;;  %v1428_v10 = vld [vmem:[#allocation2 + $0x44] sm:$0x1]  ;;  %v1430_v41 = vld [vmem:[#allocation2 + $0x4c] sm:$0x1] }
  0x8b   : > { %v1669_v33 = vunpack.c.l.b16 %v1644_v28  ;;  %v1670_v31 = vunpack.c.l.b16 %v1648_v29  ;;  %v1518_v53 = vrot.slane %v1516_v51, 4  ;;  %v1521_v3 = vrot.slane %v1519_v5, 5 }
  0x8d   : > { %v1676_v47 = vpack.c.b16 %v1670_v31, %v1669_v33  ;;  %v1615_v31 = vld [vmem:[#allocation2 + $0x40] sm:$0xe] }
  0x8e   : > { %2105 = vmatmul.msk.bf16.gmra.mxu3 %vm699_vm9, %v2101_v52  ;;  %v1425_v52 = vld [vmem:[#allocation2 + $0x38] sm:$0xf]  ;;  %v2156_v42 = vrot.slane %v1615_v31, 9 }
  0x8f   : > { %v1505_v4 = vshll.u32 %v1425_v52, 16 }
  0x91   : > { %2120 = vmatmul.msk.bf16.vlgmr.msra.gmra.mxu1 %vm699_vm9, %v1276_v56  ;;  %v1481_v56 = vrot.slane %v1480_v44, 4  ;;  %v1507_v21 = vrot.slane %v1505_v4, 5  ;;  %v1217_v44 = vld [vmem:[#allocation2 + $0x40] sm:$0xe]  ;;  %v1655_v4 = vrot.slane %v1426_v14, 5 }
  0x93   : > { %v1486_v9 = vsel %vm2621_vm10, %v1481_v56, %v1485_v57  ;;  %v1260_v56 = vrot.slane %v2775_v23, 5  ;;  %v2118_v57 = vrot.slane %v1217_v44, 9  ;;  %v1659_v44 = vrot.slane %v1428_v10, 5 }
  0x94   : > { %2110 = vmatmul.msk.bf16.gmra.mxu0 %vm699_vm9, %v1157_v1  ;;  %v1502_v1 = vshrl.u32 %v1425_v52, 16  ;;  %v1548_v7 = vunpack.c.l.b16 %v1486_v9  ;;  %v1613_v52 = vld [vmem:[#allocation2 + $0x30] sm:$0xe] }
  0x95   : > { %v2154_v62 = vrot.slane %v1613_v52, 9  ;;  %v1265_v23 = vsel %vm2684_vm13, %v2118_v57, %v1264_v58  ;;  %v1660_v6 = vsel %vm2684_vm13, %v2156_v42, %v1659_v44 }
  0x96   : > { %v1504_v18 = vrot.slane %v1502_v1, 4  ;;  %v1554_v32 = vpack.c.b16 %v1548_v7, %v1547_v26  ;;  %v2155_v1 = vrot.slane %v1614_v54, 9  ;;  %v1275_v11 = vunpack.c.l.b16 %v1265_v23 }
  0x97   : > { %v1652_v16 = vsel %vm2684_vm13, %v2154_v62, %v1651_v63  ;;  %v1539_v26 = vshll.u32 %v1430_v41, 16 }
  0x98   : > { %v1508_v39 = vor.u32 %v1507_v21, %v1504_v18  ;;  %v1656_v17 = vsel %vm2684_vm13, %v2155_v1, %v1655_v4  ;;  %v1522_v18 = vor.u32 %v1521_v3, %v1518_v53  ;;  %v1525_v21 = vshll.u32 %v1428_v10, 16 }
  0x99   : > { %v1671_v27 = vunpack.c.l.b16 %v1652_v16  ;;  %v1672_v14 = vunpack.c.l.b16 %v1656_v17 }
  0x9a   : > { %2141 = vmatmul.msk.bf16.vlgmr.msra.gmra.mxu2 %vm699_vm9, %v2128_v22  ;;  %v2132_v22 = vor.u32 %v2176_v13, %v2131_v8  ;;  %v1509_v40 = vrot.slane %v1508_v39, 4  ;;  %v1261_v13 = vsel %vm2684_vm13, %v2117_v55, %v1260_v56  ;;  %v1523_v29 = vrot.slane %v1522_v18, 4  ;;  %v2139_v39 = vld [vmem:[#allocation2 + $0x40] sm:$0xf] }
  0x9b   : > { %v1274_v25 = vunpack.c.l.b16 %v1261_v13  ;;  %v1527_v15 = vrot.slane %v1525_v21, 5  ;;  %v1677_v30 = vpack.c.b16 %v1672_v14, %v1671_v27 }
  0x9c   : > { %v1514_v50 = vsel %vm2621_vm10, %v1509_v40, %v1513_v35 }
  0x9d   : > { %v1550_v8 = vunpack.c.l.b16 %v1514_v50  ;;  %v1279_v7 = vpack.c.b16 %v1275_v11, %v1274_v25 }
  0x9e   : > { %2146 = vmatmul.msk.bf16.vlgmr.msra.gmra.mxu3 %vm699_vm9, %v1553_v36  ;;  %v1495_v36 = vrot.slane %v1494_v20, 4  ;;  %v1541_v20 = vrot.slane %v1539_v26, 5 }
  0xa0   : > { %v1500_v49 = vsel %vm2621_vm10, %v1495_v36, %v1499_v38  ;;  %v2140_v36 = vor.u32 %v2178_v43, %v2139_v39 }
  0xa1   : > { %2121 = vmatmul.msk.bf16.gmra.mxu1 %vm699_vm9, %v1277_v46  ;;  %v1429_v46 = vld [vmem:[#allocation2 + $0x48] sm:$0xf] }
  0xa2   : > { %v1530_v59 = vshrl.u32 %v1429_v46, 16  ;;  %v1533_v60 = vshll.u32 %v1429_v46, 16  ;;  %v1663_v46 = vrot.slane %v1430_v41, 5 }
  0xa4   : > { %2159 = vmatmul.msk.bf16.vlgmr.msra.gmra.mxu0 %vm699_vm9, %v1675_v37  ;;  %v1549_v37 = vunpack.c.l.b16 %v1500_v49  ;;  %v1532_v9 = vrot.slane %v1530_v59, 4  ;;  %v1535_v24 = vrot.slane %v1533_v60, 5  ;;  %v1673_v49 = vunpack.c.l.b16 %v1660_v6 }
  0xa6   : > { %v1555_v12 = vpack.c.b16 %v1550_v8, %v1549_v37 }
  0xaa   : > { %2142 = vmatmul.msk.bf16.gmra.mxu2 %vm699_vm9, %v2132_v22  ;;  %v1536_v22 = vor.u32 %v1535_v24, %v1532_v9 }
  0xac   : > { %v1537_v19 = vrot.slane %v1536_v22, 4 }
  0xae   : > { %2147 = vmatmul.msk.bf16.gmra.mxu3 %vm699_vm9, %v1554_v32  ;;  %v1528_v32 = vsel %vm2621_vm10, %v1523_v29, %v1527_v15  ;;  %v1542_v33 = vsel %vm2621_vm10, %v1537_v19, %v1541_v20 }
  0xaf   : > { %v1551_v38 = vunpack.c.l.b16 %v1528_v32  ;;  %v1552_v40 = vunpack.c.l.b16 %v1542_v33 }
  0xb1   : > { %2122 = vmatmul.msk.bf16.gmra.mxu1 %vm699_vm9, %v1278_v34  ;;  %v1616_v34 = vld [vmem:[#allocation2 + $0x48] sm:$0xe] }
  0xb2   : > { %v2157_v45 = vrot.slane %v1616_v34, 9 }
  0xb4   : > { %2160 = vmatmul.msk.bf16.gmra.mxu0 %vm699_vm9, %v1676_v47  ;;  %v1556_v47 = vpack.c.b16 %v1552_v40, %v1551_v38  ;;  %v1664_v48 = vsel %vm2684_vm13, %v2157_v45, %v1663_v46  ;;  %v2180_v38 = vld [vmem:[%s2923_s21] sm:$0xff]  }
  0xb5   : > { %v1674_v50 = vunpack.c.l.b16 %v1664_v48 }
  0xb7   : > { %v1678_v55 = vpack.c.b16 %v1674_v50, %v1673_v49 }
  0xba   : > { %2143 = vmatmul.msk.bf16.gmra.mxu2 %vm699_vm9, %v2136_v61 }
  0xbe   : > { %2148 = vmatmul.msk.bf16.gmra.mxu3 %vm699_vm9, %v1555_v12  ;;  %v2860_v28 = vpop.f32.mrf.mxu1 }
  0xc1   : > { %2123 = vmatmul.msk.bf16.gmra.mxu1 %vm699_vm9, %v1279_v7 }
  0xc4   : > { %2161 = vmatmul.msk.bf16.gmra.mxu0 %vm699_vm9, %v1677_v30 }
  0xc6   : > { %v2868_v35 = vpop.f32.mrf.mxu1 }
  0xca   : > { %2144 = vmatmul.msk.bf16.gmra.mxu2 %vm699_vm9, %v2140_v36 }
  0xcd   : > { %v2875_v2 = vpop.f32.mrf.mxu2 }
  0xce   : > { %2149 = vmatmul.msk.bf16.gmra.mxu3 %vm699_vm9, %v1556_v47  ;;  %v789_v52 = vpop.f32.mrf.mxu1  ;;  %v2181_v47 = vunpack.c.l.bf16 %v2180_v38 }
  0xd1   : > { %v2878_v54 = vpop.f32.mrf.mxu3  ;;  %v725_v56 = vpop.f32.mrf.mxu0 }
  0xd2   : > { %v790_v26 = vadd.f32 %v789_v52, %v725_v56 }
  0xd4   : > { %2162 = vmatmul.msk.bf16.gmra.mxu0 %vm699_vm9, %v1678_v55 }
  0xd5   : > { %v2880_v57 = vpop.f32.mrf.mxu2 }
  0xd6   : > { %v791_v58 = vpop.f32.mrf.mxu1 }
  0xd9   : > { %v2883_v51 = vpop.f32.mrf.mxu3  ;;  %v727_v0 = vpop.f32.mrf.mxu0 }
  0xda   : > { %v792_v20 = vadd.f32 %v791_v58, %v727_v0 }
  0xdd   : > { %v906_v5 = vpop.f32.mrf.mxu2 }
  0xde   : > { %v794_v59 = vpop.f32.mrf.mxu1  ;;  %v926_v27 = vadd.f32 %v906_v5, %v790_v26 }
  0xdf   : > { %v795_v42 = vadd.f32 %v794_v59, %v2860_v28 }
  0xe1   : > { %v988_v60 = vpop.f32.mrf.mxu3  ;;  %v1182_v61 = vpop.f32.mrf.mxu0 }
  0xe2   : > { %v1008_v15 = vadd.f32 %v988_v60, %v926_v27 }
  0xe4   : > { %v1202_v43 = vadd.f32 %v1182_v61, %v1008_v15  ;;  %v2182_v61 = vunpack.c.h.bf16 %v2180_v38 }
  0xe5   : > { %v908_v62 = vpop.f32.mrf.mxu2 }
  0xe6   : > { %v796_v63 = vpop.f32.mrf.mxu1  ;;  %v927_v39 = vadd.f32 %v908_v62, %v792_v20 }
  0xe7   : > { %v797_v28 = vadd.f32 %v796_v63, %v2868_v35 }
  0xe9   : > { %v990_v1 = vpop.f32.mrf.mxu3  ;;  %v1184_v4 = vpop.f32.mrf.mxu0 }
  0xea   : > { %v1009_v34 = vadd.f32 %v990_v1, %v927_v39  ;;  %v2195_v39 = vld [vmem:[%s2923_s21 + $0x8] sm:$0xff]  }
  0xec   : > { %v1203_v6 = vadd.f32 %v1184_v4, %v1009_v34 }
  0xed   : > { %v911_v37 = vpop.f32.mrf.mxu2 }
  0xee   : > { %v2885_v8 = vpop.f32.mrf.mxu1  ;;  %v928_v45 = vadd.f32 %v911_v37, %v795_v42 }
  0xf1   : > { %v993_v13 = vpop.f32.mrf.mxu3  ;;  %v1187_v23 = vpop.f32.mrf.mxu0 }
  0xf2   : > { %v1010_v55 = vadd.f32 %v993_v13, %v928_v45 }
  0xf4   : > { %v1204_v62 = vadd.f32 %v1187_v23, %v1010_v55 }
  0xf5   : > { %v913_v53 = vpop.f32.mrf.mxu2 }
  0xf6   : > { %v2887_v3 = vpop.f32.mrf.mxu1  ;;  %v929_v0 = vadd.f32 %v913_v53, %v797_v28 }
  0xf9   : > { %v995_v9 = vpop.f32.mrf.mxu3  ;;  %v2889_v24 = vpop.f32.mrf.mxu0 }
  0xfa   : > { %v1011_v26 = vadd.f32 %v995_v9, %v929_v0 }
  0xfc   : > { %v1205_v38 = vadd.f32 %v2889_v24, %v1011_v26 }
  0xfd   : > { %v2891_v10 = vpop.f32.mrf.mxu2 }
  0xfe   : > { %v2893_v41 = vpop.f32.mrf.mxu1 }
 0x101   : > { %v2895_v25 = vpop.f32.mrf.mxu3  ;;  %v2897_v11 = vpop.f32.mrf.mxu0 }
 0x105   : > { %v2899_v12 = vpop.f32.mrf.mxu2 }
 0x106   : > { %v2901_v16 = vpop.f32.mrf.mxu1 }
 0x109   : > { %v2903_v17 = vpop.f32.mrf.mxu3  ;;  %v2905_v18 = vpop.f32.mrf.mxu0 }
 0x10d   : > { %v2907_v21 = vpop.f32.mrf.mxu2 }
 0x10e   : > { %v1304_v22 = vpop.f32.mrf.mxu1 }
 0x10f   : > { %v1324_v33 = vadd.f32 %v1304_v22, %v1202_v43 }
 0x111   : > { %v2909_v7 = vpop.f32.mrf.mxu3  ;;  %v2911_v14 = vpop.f32.mrf.mxu0 }
 0x115   : > { %v2913_v29 = vpop.f32.mrf.mxu2 }
 0x116   : > { %v1306_v19 = vpop.f32.mrf.mxu1 }
 0x117   : > { %v1325_v50 = vadd.f32 %v1306_v19, %v1203_v6  ;;  %v800_v19 = vadd.f32 %v2885_v8, %v2875_v2 }
 0x119   : > { %v2915_v30 = vpop.f32.mrf.mxu3  ;;  %v2918_v32 = vpop.f32.mrf.mxu0  ;;  %v930_v9 = vadd.f32 %v2891_v10, %v800_v19  ;;  %v802_v10 = vadd.f32 %v2887_v3, %v2880_v57 }
 0x11b   : > { %v931_v24 = vadd.f32 %v2899_v12, %v802_v10 }
 0x11d   : > { %v1387_v31 = vpop.f32.mrf.mxu2  ;;  %v1013_v57 = vadd.f32 %v2903_v17, %v931_v24 }
 0x11e   : > { %v1407_v36 = vadd.f32 %v1387_v31, %v1324_v33  ;;  %v1309_v40 = vpop.f32.mrf.mxu1 }
 0x11f   : > { %v1326_v22 = vadd.f32 %v1309_v40, %v1204_v62 }
 0x121   : > { %v1581_v44 = vpop.f32.mrf.mxu3  ;;  %v1703_v48 = vpop.f32.mrf.mxu0 }
 0x122   : > { %v1601_v46 = vadd.f32 %v1581_v44, %v1407_v36  ;;  %v2185_v36 = vunpack.c.l.bf16 %v2195_v39  ;;  %v1012_v44 = vadd.f32 %v2895_v25, %v930_v9 }
 0x124   : > { %v1723_v49 = vadd.f32 %v1703_v48, %v1601_v46 }
 0x125   : > { %v1389_v52 = vpop.f32.mrf.mxu2 }
 0x126   : > { %v1799_v56 = vadd.f32 %v2181_v47, %v1723_v49  ;;  %v1408_v58 = vadd.f32 %v1389_v52, %v1325_v50  ;;  %v1311_v59 = vpop.f32.mrf.mxu1  ;;  %v1753_v4 = vmul.f32 %v1723_v49, %v1723_v49  ;;  %v1731_v13 = vsel %vm699_vm9, %v1723_v49, 0.0 }
 0x127   : > { %v1327_v8 = vadd.f32 %v1311_v59, %v1205_v38 }
 0x128   : > { %1807 = vst.msk [vmem:[%s2931_s10] sm:$0xff] %vm699_vm9, %v1799_v56  ;;  %v1761_v23 = vsel %vm699_vm9, %v1753_v4, 0.0  ;;  %v2186_v56 = vunpack.c.h.bf16 %v2195_v39 }
 0x129   : > { %v1583_v5 = vpop.f32.mrf.mxu3  ;;  %v1705_v1 = vpop.f32.mrf.mxu0 }
 0x12a   : > { %v1602_v60 = vadd.f32 %v1583_v5, %v1408_v58  ;;  %v1206_v58 = vadd.f32 %v2897_v11, %v1012_v44 }
 0x12c   : > { %v1724_v37 = vadd.f32 %v1705_v1, %v1602_v60  ;;  %v805_v1 = vadd.f32 %v2893_v41, %v2878_v54 }
 0x12d   : > { %v1392_v27 = vpop.f32.mrf.mxu2 }
 0x12e   : > { %v1732_v35 = vsel %vm699_vm9, %v1724_v37, 0.0  ;;  %v1754_v63 = vmul.f32 %v1724_v37, %v1724_v37  ;;  %v1800_v15 = vadd.f32 %v2182_v61, %v1724_v37  ;;  %v1409_v53 = vadd.f32 %v1392_v27, %v1326_v22  ;;  %v1314_v42 = vpop.f32.mrf.mxu1  ;;  %v2196_v37 = vld [vmem:[%s2923_s21 + $0x10] sm:$0xff]  }
 0x12f   : > { %v1733_v20 = vadd.f32 %v1732_v35, %v1731_v13  ;;  %v1328_v5 = vadd.f32 %v1314_v42, %v1206_v58  ;;  %v932_v11 = vadd.f32 %v2907_v21, %v805_v1  ;;  %v2189_v27 = vunpack.c.l.bf16 %v2196_v37 }
 0x130   : > { %v1762_v43 = vsel %vm699_vm9, %v1754_v63, 0.0  ;;  %1808 = vst.msk [vmem:[%s2931_s10 + $0x8] sm:$0xff] %vm699_vm9, %v1800_v15  ;;  %v1207_v35 = vadd.f32 %v2905_v18, %v1013_v57  ;;  %v807_v21 = vadd.f32 %v2901_v16, %v2883_v51 }
 0x131   : > { %v1763_v33 = vadd.f32 %v1762_v43, %v1761_v23  ;;  %v1586_v31 = vpop.f32.mrf.mxu3  ;;  %v1708_v40 = vpop.f32.mrf.mxu0  ;;  %v1014_v54 = vadd.f32 %v2909_v7, %v932_v11 }
 0x132   : > { %v1603_v34 = vadd.f32 %v1586_v31, %v1409_v53  ;;  %v933_v18 = vadd.f32 %v2913_v29, %v807_v21 }
 0x133   : > { %v1208_v38 = vadd.f32 %v2911_v14, %v1014_v54 }
 0x134   : > { %v1725_v2 = vadd.f32 %v1708_v40, %v1603_v34  ;;  %v1015_v51 = vadd.f32 %v2915_v30, %v933_v18 }
 0x135   : > { %v1394_v45 = vpop.f32.mrf.mxu2 }
 0x136   : > { %v1734_v46 = vsel %vm699_vm9, %v1725_v2, 0.0  ;;  %v1755_v47 = vmul.f32 %v1725_v2, %v1725_v2  ;;  %v1801_v6 = vadd.f32 %v2185_v36, %v1725_v2  ;;  %v1410_v48 = vadd.f32 %v1394_v45, %v1327_v8  ;;  %v1316_v59 = vpop.f32.mrf.mxu1 }
 0x137   : > { %v1735_v49 = vadd.f32 %v1734_v46, %v1733_v20  ;;  %v1329_v53 = vadd.f32 %v1316_v59, %v1207_v35  ;;  %v2190_v36 = vunpack.c.h.bf16 %v2196_v37  ;;  %v1209_v30 = vadd.f32 %v2918_v32, %v1015_v51 }
 0x138   : > { %v1764_v50 = vsel %vm699_vm9, %v1755_v47, 0.0  ;;  %1809 = vst.msk [vmem:[%s2931_s10 + $0x10] sm:$0xff] %vm699_vm9, %v1801_v6  ;;  %v2197_v47 = vld [vmem:[%s2923_s21 + $0x18] sm:$0xff]   ;;  %s3002_s21 = sshll.u32 %s338_s20, 4  ;;  %s1843_s21 = int_to_ptr.vmem [resolvable:$true] %s3002_s21 }
 0x139   : > { %v1765_v52 = vadd.f32 %v1764_v50, %v1763_v33  ;;  %v1588_v55 = vpop.f32.mrf.mxu3  ;;  %v1710_v28 = vpop.f32.mrf.mxu0  ;;  %v2193_v50 = vunpack.c.l.bf16 %v2197_v47  ;;  %v2194_v32 = vunpack.c.h.bf16 %v2197_v47 }
 0x13a   : > { %v1604_v25 = vadd.f32 %v1588_v55, %v1410_v48 }
 0x13c   : > { %v1726_v0 = vadd.f32 %v1710_v28, %v1604_v25 }
 0x13d   : > { %v1397_v3 = vpop.f32.mrf.mxu2 }
 0x13e   : > { %v1736_v60 = vsel %vm699_vm9, %v1726_v0, 0.0  ;;  %v1756_v61 = vmul.f32 %v1726_v0, %v1726_v0  ;;  %v1802_v62 = vadd.f32 %v2186_v56, %v1726_v0  ;;  %v1411_v12 = vadd.f32 %v1397_v3, %v1328_v5  ;;  %v1319_v9 = vpop.f32.mrf.mxu1 }
 0x13f   : > { %v1737_v4 = vadd.f32 %v1736_v60, %v1735_v49  ;;  %v1330_v2 = vadd.f32 %v1319_v9, %v1208_v38 }
 0x140   : > { %v1766_v22 = vsel %vm699_vm9, %v1756_v61, 0.0  ;;  %1810 = vst.msk [vmem:[%s2931_s10 + $0x18] sm:$0xff] %vm699_vm9, %v1802_v62 }
 0x141   : > { %v1767_v26 = vadd.f32 %v1766_v22, %v1765_v52  ;;  %v1591_v17 = vpop.f32.mrf.mxu3  ;;  %v1713_v63 = vpop.f32.mrf.mxu0 }
 0x142   : > { %v1605_v13 = vadd.f32 %v1591_v17, %v1411_v12 }
 0x144   : > { %v1727_v15 = vadd.f32 %v1713_v63, %v1605_v13 }
 0x145   : > { %v1399_v41 = vpop.f32.mrf.mxu2 }
 0x146   : > { %v1738_v19 = vsel %vm699_vm9, %v1727_v15, 0.0  ;;  %v1757_v20 = vmul.f32 %v1727_v15, %v1727_v15  ;;  %v1803_v39 = vadd.f32 %v2189_v27, %v1727_v15  ;;  %v1412_v23 = vadd.f32 %v1399_v41, %v1329_v53  ;;  %v1321_v10 = vpop.f32.mrf.mxu1 }
 0x147   : > { %v1739_v43 = vadd.f32 %v1738_v19, %v1737_v4  ;;  %v1331_v55 = vadd.f32 %v1321_v10, %v1209_v30 }
 0x148   : > { %v1768_v33 = vsel %vm699_vm9, %v1757_v20, 0.0  ;;  %1811 = vst.msk [vmem:[%s2931_s10 + $0x20] sm:$0xff] %vm699_vm9, %v1803_v39 }
 0x149   : > { %v1769_v31 = vadd.f32 %v1768_v33, %v1767_v26  ;;  %v1593_v7 = vpop.f32.mrf.mxu3  ;;  %v1715_v40 = vpop.f32.mrf.mxu0 }
 0x14a   : > { %v1606_v34 = vadd.f32 %v1593_v7, %v1412_v23 }
 0x14c   : > { %v1728_v42 = vadd.f32 %v1715_v40, %v1606_v34 }
 0x14d   : > { %v1402_v16 = vpop.f32.mrf.mxu2 }
 0x14e   : > { %v1740_v8 = vsel %vm699_vm9, %v1728_v42, 0.0  ;;  %v1758_v44 = vmul.f32 %v1728_v42, %v1728_v42  ;;  %v1804_v45 = vadd.f32 %v2190_v36, %v1728_v42  ;;  %v1413_v46 = vadd.f32 %v1402_v16, %v1330_v2 }
 0x14f   : > { %v1741_v29 = vadd.f32 %v1740_v8, %v1739_v43 }
 0x150   : > { %v1770_v6 = vsel %vm699_vm9, %v1758_v44, 0.0  ;;  %1812 = vst.msk [vmem:[%s2931_s10 + $0x28] sm:$0xff] %vm699_vm9, %v1804_v45 }
 0x151   : > { %v1771_v48 = vadd.f32 %v1770_v6, %v1769_v31  ;;  %v1596_v14 = vpop.f32.mrf.mxu3  ;;  %v1718_v24 = vpop.f32.mrf.mxu0 }
 0x152   : > { %v1607_v49 = vadd.f32 %v1596_v14, %v1413_v46 }
 0x154   : > { %v1729_v52 = vadd.f32 %v1718_v24, %v1607_v49 }
 0x155   : > { %v1404_v25 = vpop.f32.mrf.mxu2 }
 0x156   : > { %v1742_v56 = vsel %vm699_vm9, %v1729_v52, 0.0  ;;  %v1759_v58 = vmul.f32 %v1729_v52, %v1729_v52  ;;  %v1805_v28 = vadd.f32 %v2193_v50, %v1729_v52  ;;  %v1414_v0 = vadd.f32 %v1404_v25, %v1331_v55 }
 0x157   : > { %v1743_v5 = vadd.f32 %v1742_v56, %v1741_v29 }
 0x158   : > { %v1772_v57 = vsel %vm699_vm9, %v1759_v58, 0.0  ;;  %1813 = vst.msk [vmem:[%s2931_s10 + $0x30] sm:$0xff] %vm699_vm9, %v1805_v28 }
 0x159   : > { %v1773_v3 = vadd.f32 %v1772_v57, %v1771_v48  ;;  %v1598_v59 = vpop.f32.mrf.mxu3  ;;  %v1720_v61 = vpop.f32.mrf.mxu0 }
 0x15a   : > { %v1608_v60 = vadd.f32 %v1598_v59, %v1414_v0 }
 0x15c   : > { %v1730_v62 = vadd.f32 %v1720_v61, %v1608_v60 }
 0x15e   : > { %v1744_v12 = vsel %vm699_vm9, %v1730_v62, 0.0  ;;  %v1760_v1 = vmul.f32 %v1730_v62, %v1730_v62  ;;  %v1806_v4 = vadd.f32 %v2194_v32, %v1730_v62 }
 0x15f   : > { %v1745_v37 = vadd.f32 %v1744_v12, %v1743_v5 }
 0x160   : > { %v1774_v22 = vsel %vm699_vm9, %v1760_v1, 0.0  ;;  %1814 = vst.msk [vmem:[%s2931_s10 + $0x38] sm:$0xff] %vm699_vm9, %v1806_v4  ;;  %s3009_s10 = sshll.u32 %s1854_s19, 4  ;;  %s1859_s10 = int_to_ptr.hbm [resolvable:$true] %s3009_s10 }
 0x161   : > { %v1746_v11 = vrot.slane %v1745_v37, 4  ;;  %v1775_v26 = vadd.f32 %v1774_v22, %v1773_v3 }
 0x163   : > { %v1747_v17 = vadd.f32 %v1746_v11, %v1745_v37  ;;  %v1776_v13 = vrot.slane %v1775_v26, 4 }
 0x165   : > { %v1748_v27 = vrot.slane %v1747_v17, 2  ;;  %v1777_v35 = vadd.f32 %v1776_v13, %v1775_v26 }
 0x167   : > { %v1749_v63 = vadd.f32 %v1748_v27, %v1747_v17  ;;  %v1778_v15 = vrot.slane %v1777_v35, 2 }
 0x169   : > { %v1750_v53 = vrot.slane %v1749_v63, 1  ;;  %v1779_v54 = vadd.f32 %v1778_v15, %v1777_v35 }
 0x16b   : > { %v1751_v41 = vadd.f32 %v1750_v53, %v1749_v63  ;;  %v1780_v19 = vrot.slane %v1779_v54, 1 }
 0x16d   : > { %1752 = vst.msk [vmem:[%s338_s20] sm:$0x1] %vm375_vm2, %v1751_v41  ;;  %v1781_v20 = vadd.f32 %v1780_v19, %v1779_v54 }
 0x16e   : > { %2290 = shalt.err (!%p2287_p5)
}
 0x16f   : > { %2202 = dma.vmem_to_hbm [thread:$0]  (%p2456_p4), %s1843_s21, 16, %s1845_s22, %s1824_s27   ;;  %1782 = vst.msk [vmem:[%s344_s23] sm:$0x1] %vm375_vm2, %v1781_v20 }
 0x170   : > { %s1828_s20 = scalar_lea.sflag [#allocation6], %s2991_s17  ;;  %s2305_s16 = sshra.s32 %s1859_s10, 4  ;;  %s2306_s16 = int_to_ptr.hbm [resolvable:$true] %s2305_s16 }
 0x171   : > { %s2307_s18 = scalar_lea.hbm %s2306_s16, 1  ;;  %s2311_s15 = scalar_lea.hbm %s3074_s7, 2 }
 0x172   : > { %p2308_p6 = scmp.ne.s32.totalorder %s2306_s16, %s2307_s18  ;;  %p2312_p10 = scmp.lt.s32.totalorder %s2306_s16, %s3074_s7 }
 0x173   : > { %p2313_p11 = scmp.lt.s32.totalorder %s2311_s15, %s2307_s18 }
 0x174   : > { %p2309_p7 = pnand %p2308_p6, %p2456_p4 }
 0x175   : > { %p2314_p12 = por %p2313_p11, %p2312_p10 }
 0x176   : > { %p2310_p9 = pneg %p2309_p7 }
 0x178   : > { %p2315_p13 = pnand %p2314_p12, %p2310_p9 }
 0x17a   : > { %2318 = shalt.err (!%p2315_p13)
}
 0x17b   : > { %2203 = dma.vmem_to_hbm [thread:$0]  (%p2456_p4), %s1857_s30, 16, %s1859_s10, %s1828_s20  }
 0x17c PF: > { %p2213_p0 = scmp.ge.s32.totalorder %s2373_s29, 2  ;;  %s1881_s17 = sand.u32 1, %s2353_s24  }
 0x17d   : > { %s1882_s21 = scalar_lea.sflag [#allocation4], %s1881_s17 }
 0x17e   : > { %p2207_p1 = pnand %p2213_p0, %p2463_p8 }
 0x180   : > { %p2208_p2 = pneg %p2207_p1 }
 0x182   : > { %2344 = dma.done.wait (%p2208_p2), %s1882_s21, 16  }
 0x183   : > { %2346 = vsyncadd (%p2208_p2), %s1882_s21, 4294967280  ;;  %s1891_s22 = scalar_lea.sflag [#allocation6], %s1881_s17 }
 0x184   : > { %2348 = dma.done.wait (%p2208_p2), %s1891_s22, 16  }
 0x185   : > { %2350 = vsyncadd (%p2208_p2), %s1891_s22, 4294967280  ;;  %s24_s29 = sadd.s32 1, %s2373_s29   ;;  %s3087_s24 = smov %s2357_s25 }
 0x186   : > { %p21_p3 = scmp.ge.s32.totalorder %s24_s29, 4   ;;  %s3088_s25 = smov %s2361_s26 }
 0x187   : > { %s3089_s26 = smov %s2469_s14  ;;  %s3090_s27 = smov %s2369_s28 }
 0x188   : > { %s3091_s28 = smov %s3093_s9  ;;  %23 = sbr.rel (!%p21_p3) target bundleno = 8 (0x8), region = 121 }
 0x18d   :  { %1896 = vsyncpa [#allocation4], 1 }
 0x18e   :  { %1898 = vsyncpa [#allocation4 + $0x1], 1 }
 0x18f   :  { %1899 = vsyncpa [#allocation6], 1 }
 0x190   :  { %1901 = vsyncpa [#allocation6 + $0x1], 1 }

// kernel: _lambda_.8
= control target key start
LH: loop header
LB: loop body
LE: loop exit
PB: predicated region body
PF: predicated region fallthrough
CT: control target
= control target key end

     0   :  { %s2975_s27 = smov 0   ;;  %s2977_s28 = smov 0   ;;  %s4132_s0 = inlined_call_operand.vmem [shape: f32[2,2,2,9,9,4], index: 0, kind: input, shape index: {}]   ;;  %s4133_s1 = inlined_call_operand.vmem [shape: f32[1,4], index: 1, kind: input, shape index: {}]   ;;  %s4134_s2 = inlined_call_operand.vmem [shape: f32[1,4], index: 2, kind: input, shape index: {}]   ;;  %s4135_s3 = inlined_call_operand.vmem [shape: bf16[3,3,4,8], index: 3, kind: input, shape index: {}]   ;;  %s4136_s4 = inlined_call_operand.vmem [shape: bf16[4,8], index: 4, kind: input, shape index: {}]   ;;  %s4137_s5 = inlined_call_operand.vmem [shape: bf16[2,1,1,10,10,8], index: 5, kind: output, shape index: {0}]   ;;  %s4138_s6 = inlined_call_operand.vmem [shape: f32[2,1,8], index: 6, kind: output, shape index: {1}]   ;;  %s4139_s7 = inlined_call_operand.vmem [shape: f32[2,1,8], index: 7, kind: output, shape index: {2}]   ;;  %s4140_s8 = inlined_call_operand.vmem [shape: bf16[2,8,8,8], index: 8, kind: output, shape index: {3}]  }
   0x1   :  { %s2979_s29 = smov 0  }
   0x2 LB: > { %s31_s30 = sadd.s32 1, %s2923_s28  ;;  %p2612_p0 = scmp.ge.s32.totalorder %s2927_s29, 1  ;;  %s2927_s29 = sphi %s2979_s29, %s19_s29   ;;  %s2923_s28 = sphi %s2977_s28, %s4160_s28   ;;  %s2919_s27 = sphi %s2975_s27, %s4159_s27  }
   0x3   : > { %p33_p1 = scmp.ge.s32.totalorder %s31_s30, 2  ;;  %p307_p2 = scmp.lt.s32.totalorder %s2927_s29, 3 }
   0x5   : > { %s4162_s30 = smov (%p33_p1, %s31_s30), 0  ;;  %p308_p3 = pnand %p2612_p0, %p307_p2 }
   0x6   : > { %p372_p4 = scmp.lt.s32.totalorder (!%p308_p3), %s2919_s27, 1 }
   0x7   : > { %311 = sbr.rel (%p308_p3) target bundleno = 382 (0x17e), region = 40 }
   0xc   : > { %v2649_v0 = vld [vmem:[%s4135_s3 + $0x2] sm:$0x3]  ;;  %vm1066_vm0 = vcmask 1041408   ;;  %vm416_vm1 = vcmask 27648   ;;  %s4164_s27 = smov (!%p372_p4, %s2919_s27), 1  ;;  %v4141_v2 = vmov 0  }
   0xd   : > { %v1068_v1 = vsel %vm1066_vm0, %v2649_v0, 0  ;;  %652 = vst.msk [vmem:[#allocation2 + $0x68] sm:$0xf] %vm416_vm1, %v4141_v2  ;;  %v1022_v3 = vld [vmem:[%s4135_s3] sm:$0x3]  ;;  %s2874_s13 = smul.u32 576, %s4164_s27  ;;  %s398_s15 = scalar_lea.vmem %s4138_s6, %s4164_s27 }
   0xe   : > { %2872 = vmatpush.bf16.msra.mxu2 %v1068_v1  ;;  %1077 = vmatpush.bf16.msra.mxu0 %v1068_v1  ;;  %v3008_v4 = vld [vmem:[%s4133_s1] ss:$0 sm:$0xff]  ;;  %656 = vst.msk [vmem:[#allocation2 + $0x70] sm:$0xf] %vm416_vm1, %v4141_v2  ;;  %v1132_v5 = vsel %vm1066_vm0, %v1022_v3, 0  ;;  %vm1053_vm2 = vcmask 31744   ;;  %s404_s19 = scalar_lea.vmem %s4139_s7, %s4164_s27 }
   0xf   : > { %417 = vst.msk [vmem:[#allocation2] sm:$0xf] %vm416_vm1, %v4141_v2  ;;  %1141 = vmatpush.bf16.msra.mxu1 %v1132_v5  ;;  %2873 = vmatpush.bf16.msra.mxu3 %v1132_v5  ;;  %s3018_s18 = scalar_lea.vmem %s4132_s0, %s2874_s13  ;;  %v3023_v6 = vld [vmem:[%s4134_s2] ss:$0 sm:$0xff]  ;;  %v2690_v18 = vld [vmem:[%s4135_s3 + $0x4] sm:$0x3] }
  0x10   : > { %424 = vst.msk [vmem:[#allocation2 + $0x8] sm:$0xf] %vm416_vm1, %v4141_v2  ;;  %v2628_v7 = vld [vmem:[%s3018_s18 + $0xd0] sm:$0xff]  ;;  %v2629_v8 = vld [vmem:[%s3018_s18 + $0xe0] sm:$0xff]  ;;  %v1321_v20 = vsel %vm1066_vm0, %v2690_v18, 0  ;;  %vm418_vm5 = vcmask 24576  }
  0x11   : > { %428 = vst.msk [vmem:[#allocation2 + $0x10] sm:$0xf] %vm416_vm1, %v4141_v2  ;;  %v684_v9 = vmul.f32 %v3008_v4, %v2628_v7  ;;  %v685_v10 = vmul.f32 %v3008_v4, %v2629_v8  ;;  %v2625_v17 = vld [vmem:[%s3018_s18 + $0xa0] sm:$0xff]  ;;  %v2617_v19 = vld [vmem:[%s3018_s18 + $0x11] sm:$0xff]  ;;  %v2716_v44 = vld [vmem:[%s4135_s3 + $0x8] sm:$0x3] }
  0x12   : > { %432 = vst.msk [vmem:[#allocation2 + $0x18] sm:$0xf] %vm416_vm1, %v4141_v2  ;;  %v681_v21 = vmul.f32 %v3008_v4, %v2625_v17  ;;  %v468_v22 = vmul.f32 %v3008_v4, %v2617_v19  ;;  %v2620_v23 = vld [vmem:[%s3018_s18 + $0x41] sm:$0xff]  ;;  %1330 = vmatpush.bf16.msrb.mxu2 %v1321_v20  ;;  %v2621_v24 = vld [vmem:[%s3018_s18 + $0x51] sm:$0xff]  ;;  %vm585_vm3 = vsmask.f32 7938 }
  0x13   : > { %436 = vst.msk [vmem:[#allocation2 + $0x20] sm:$0xf] %vm416_vm1, %v4141_v2  ;;  %v692_v11 = vadd.f32 %v3023_v6, %v684_v9  ;;  %v693_v12 = vadd.f32 %v3023_v6, %v685_v10  ;;  %v471_v25 = vmul.f32 %v3008_v4, %v2620_v23  ;;  %v2630_v26 = vld [vmem:[%s3018_s18 + $0xf0] sm:$0xff]  ;;  %v472_v28 = vmul.f32 %v3008_v4, %v2621_v24  ;;  %v2695_v31 = vld [vmem:[%s4135_s3 + $0x6] sm:$0x3]  ;;  %vm3136_vm4 = vmand %vm416_vm1, %vm585_vm3  ;;  %s2843_s9 = sshll.u32 %s4164_s27, 5 }
  0x14   : > { %440 = vst.msk [vmem:[#allocation2 + $0x28] sm:$0xf] %vm416_vm1, %v4141_v2  ;;  %v479_v27 = vadd.f32 %v3023_v6, %v468_v22  ;;  %v686_v29 = vmul.f32 %v3008_v4, %v2630_v26  ;;  %v689_v33 = vadd.f32 %v3023_v6, %v681_v21  ;;  %v1403_v36 = vsel %vm1066_vm0, %v2695_v31, 0  ;;  %v2631_v39 = vld [vmem:[%s3018_s18 + $0x100] sm:$0xff]  ;;  %v2626_v46 = vld [vmem:[%s3018_s18 + $0xb0] sm:$0xff]  ;;  %s4001_s12 = scalar_lea.vmem %s4140_s8, %s2843_s9 }
  0x15   : > { %444 = vst.msk [vmem:[#allocation2 + $0x30] sm:$0xf] %vm416_vm1, %v4141_v2  ;;  %v700_v13 = vmax.f32 %v692_v11, 0.0  ;;  %v701_v14 = vmax.f32 %v693_v12, 0.0  ;;  %v482_v30 = vadd.f32 %v3023_v6, %v471_v25  ;;  %v483_v35 = vadd.f32 %v3023_v6, %v472_v28  ;;  %1412 = vmatpush.bf16.msrb.mxu3 %v1403_v36  ;;  %v2627_v49 = vld [vmem:[%s3018_s18 + $0xc0] sm:$0xff]  ;;  %v2619_v3 = vld [vmem:[%s3018_s18 + $0x31] sm:$0xff] }
  0x16   : > { %448 = vst.msk [vmem:[#allocation2 + $0x38] sm:$0xf] %vm416_vm1, %v4141_v2  ;;  %v487_v34 = vmax.f32 %v479_v27, 0.0  ;;  %v694_v40 = vadd.f32 %v3023_v6, %v686_v29  ;;  %v687_v45 = vmul.f32 %v3008_v4, %v2631_v39  ;;  %v1485_v48 = vsel %vm1066_vm0, %v2716_v44, 0  ;;  %v2618_v54 = vld [vmem:[%s3018_s18 + $0x21] sm:$0xff]  ;;  %v2623_v12 = vld [vmem:[%s3018_s18 + $0x71] sm:$0xff] }
  0x17   : > { %452 = vst.msk [vmem:[#allocation2 + $0x40] sm:$0xf] %vm416_vm1, %v4141_v2  ;;  %v708_v15 = vpack.c.bf16 %v700_v13, %v700_v13  ;;  %v709_v16 = vpack.c.bf16 %v701_v14, %v701_v14  ;;  %v490_v38 = vmax.f32 %v482_v30, 0.0  ;;  %v491_v43 = vmax.f32 %v483_v35, 0.0  ;;  %1494 = vmatpush.bf16.msrb.mxu0 %v1485_v48  ;;  %v2622_v11 = vld [vmem:[%s3018_s18 + $0x61] sm:$0xff] }
  0x18   : > { %636 = vst.msk [vmem:[#allocation2 + $0x48] sm:$0xf] %vm416_vm1, %v4141_v2  ;;  %v495_v42 = vpack.c.bf16 %v487_v34, %v487_v34  ;;  %v697_v50 = vmax.f32 %v689_v33, 0.0  ;;  %v695_v53 = vadd.f32 %v3023_v6, %v687_v45  ;;  %v682_v57 = vmul.f32 %v3008_v4, %v2626_v46  ;;  %v1163_v29 = vld [vmem:[#allocation2] sm:$0xf] }
  0x19   : > { %640 = vst.msk [vmem:[#allocation2 + $0x50] sm:$0xf] %vm416_vm1, %v4141_v2  ;;  %v498_v47 = vpack.c.bf16 %v490_v38, %v490_v38  ;;  %v499_v52 = vpack.c.bf16 %v491_v43, %v491_v43  ;;  %v683_v58 = vmul.f32 %v3008_v4, %v2627_v49  ;;  %v702_v62 = vmax.f32 %v694_v40, 0.0  ;;  %v2633_v38 = vld [vmem:[%s3018_s18 + $0x121] sm:$0xff] }
  0x1a   : > { %717 = vst.msk [vmem:[#allocation2 + $0x68] sm:$0xf] %vm416_vm1, %v708_v15  ;;  %v504_v51 = vshrl.u32 %v495_v42, 16  ;;  %v507_v55 = vshll.u32 %v495_v42, 16  ;;  %v703_v1 = vmax.f32 %v695_v53, 0.0  ;;  %v469_v5 = vmul.f32 %v3008_v4, %v2618_v54 }
  0x1b   : > { %718 = vst.msk [vmem:[#allocation2 + $0x70] sm:$0xf] %vm416_vm1, %v709_v16  ;;  %v528_v56 = vshrl.u32 %v498_v47, 16  ;;  %v531_v60 = vshll.u32 %v498_v47, 16  ;;  %v536_v61 = vshrl.u32 %v499_v52, 16  ;;  %v539_v0 = vshll.u32 %v499_v52, 16 }
  0x1c   : > { %644 = vst.msk [vmem:[#allocation2 + $0x58] sm:$0xf] %vm416_vm1, %v4141_v2  ;;  %v3113_v59 = vrot.slane %v504_v51, 7  ;;  %v690_v9 = vadd.f32 %v3023_v6, %v682_v57  ;;  %v3128_v10 = vadd.f32 %v3023_v6, %v683_v58  ;;  %v705_v13 = vpack.c.bf16 %v697_v50, %v697_v50  ;;  %v587_v15 = vld [vmem:[#allocation2 + $0x8] sm:$0xf] }
  0x1d   : > { %648 = vst.msk [vmem:[#allocation2 + $0x60] sm:$0xf] %vm416_vm1, %v4141_v2  ;;  %v3117_v63 = vrot.slane %v528_v56, 7  ;;  %v3121_v7 = vrot.slane %v536_v61, 7  ;;  %v605_v17 = vld [vmem:[#allocation2 + $0x20] sm:$0xf]  ;;  %v3141_v18 = vpack.c.bf16 %v702_v62, %v702_v62  ;;  %v470_v19 = vmul.f32 %v3008_v4, %v2619_v3 }
  0x1e   : > { %660 = vst.msk [vmem:[#allocation2 + $0x78] sm:$0xf] %vm416_vm1, %v4141_v2  ;;  %v509_v8 = vor.u32 %v507_v55, %v3113_v59  ;;  %v510_v20 = vrot.slane %v3113_v59, 4  ;;  %v611_v22 = vld [vmem:[#allocation2 + $0x28] sm:$0xf]  ;;  %v3148_v23 = vpack.c.bf16 %v703_v1, %v703_v1  ;;  %v480_v24 = vadd.f32 %v3023_v6, %v469_v5 }
  0x1f   : > { %664 = vst.msk [vmem:[#allocation2 + $0x80] sm:$0xf] %vm416_vm1, %v4141_v2  ;;  %v533_v16 = vor.u32 %v531_v60, %v3117_v63  ;;  %v541_v21 = vor.u32 %v539_v0, %v3121_v7  ;;  %v481_v26 = vadd.f32 %v3023_v6, %v470_v19  ;;  %v473_v27 = vmul.f32 %v3008_v4, %v2622_v11  ;;  %v593_v51 = vld [vmem:[#allocation2 + $0x10] sm:$0xf]  ;;  %v3177_v54 = vld [vmem:[#allocation2 + $0x4] sm:$0x1] }
  0x20   : > { %668 = vst.msk [vmem:[#allocation2 + $0x88] sm:$0xf] %vm416_vm1, %v4141_v2  ;;  %v474_v28 = vmul.f32 %v3008_v4, %v2623_v12  ;;  %v588_v30 = vsel %vm3136_vm4, %v509_v8, %v587_v15  ;;  %v698_v31 = vmax.f32 %v690_v9, 0.0  ;;  %v488_v33 = vmax.f32 %v480_v24, 0.0  ;;  %v3179_v55 = vld [vmem:[#allocation2 + $0xc] sm:$0x1] }
  0x21   : > { %v2660_v32 = vld [vmem:[#allocation2 + $0x68] sm:$0xf]  ;;  %723 = vst.msk [vmem:[#allocation2 + $0x90] sm:$0xf] %vm416_vm1, %v4141_v2  ;;  %v606_v34 = vsel %vm3136_vm4, %v533_v16, %v605_v17  ;;  %v489_v35 = vmax.f32 %v481_v26, 0.0  ;;  %v484_v36 = vadd.f32 %v3023_v6, %v473_v27  ;;  %v612_v39 = vsel %vm3136_vm4, %v541_v21, %v611_v22  ;;  %v2634_v21 = vld [vmem:[%s3018_s18 + $0x131] sm:$0xff] }
  0x22   : > { %v2850_v37 = vld [vmem:[#allocation2 + $0x6c] sm:$0xf0]  ;;  %727 = vst.msk [vmem:[#allocation2 + $0x98] sm:$0xf] %vm416_vm1, %v4141_v2  ;;  %v496_v40 = vpack.c.bf16 %v488_v33, %v488_v33  ;;  %vm419_vm6 = vsmask.f32 256  ;;  %v768_v48 = vmul.f32 %v3008_v4, %v2633_v38  ;;  %v706_v56 = vpack.c.bf16 %v698_v31, %v698_v31 }
  0x23   : > { %v2661_v41 = vor.u32 %v2850_v37, %v2660_v32  ;;  %731 = vst.msk [vmem:[#allocation2 + $0xa0] sm:$0xf] %vm416_vm1, %v4141_v2  ;;  %v699_v32 = vmax.f32 %v3128_v10, 0.0  ;;  %v485_v37 = vadd.f32 %v3023_v6, %v474_v28  ;;  %v497_v42 = vpack.c.bf16 %v489_v35, %v489_v35  ;;  %v599_v58 = vld [vmem:[#allocation2 + $0x18] sm:$0xf]  ;;  %vm3191_vm7 = vmand %vm418_vm5, %vm419_vm6  ;;  %v2641_v31 = vld [vmem:[%s3018_s18 + $0x1b0] sm:$0xff] }
  0x24   : > { %735 = vst.msk [vmem:[#allocation2 + $0xa8] sm:$0xf] %vm416_vm1, %v4141_v2  ;;  %v492_v43 = vmax.f32 %v484_v36, 0.0  ;;  %v512_v45 = vshrl.u32 %v496_v40, 16  ;;  %v515_v46 = vshll.u32 %v496_v40, 16  ;;  %v1186_v47 = vshll.u32 %v1163_v29, 16 }
  0x25   : > { %2668 = vmatmul.msk.bf16.vlgmr.msra.gmra.mxu2 %vm1053_vm2, %v2661_v41  ;;  %739 = vst.msk [vmem:[#allocation2 + $0xb0] sm:$0xf] %vm416_vm1, %v4141_v2  ;;  %v1183_v41 = vshrl.u32 %v1163_v29, 16  ;;  %v493_v44 = vmax.f32 %v485_v37, 0.0  ;;  %v520_v49 = vshrl.u32 %v497_v42, 16  ;;  %v523_v50 = vshll.u32 %v497_v42, 16 }
  0x26   : > { %743 = vst.msk [vmem:[#allocation2 + $0xb8] sm:$0xf] %vm416_vm1, %v4141_v2  ;;  %v500_v52 = vpack.c.bf16 %v492_v43, %v492_v43  ;;  %v3181_v57 = vrot.slane %v512_v45, 7  ;;  %v3185_v61 = vrot.slane %v1186_v47, 5  ;;  %v2652_v8 = vld [vmem:[#allocation2 + $0x48] sm:$0xf]  ;;  %v707_v9 = vpack.c.bf16 %v699_v32, %v699_v32 }
  0x27   : > { %747 = vst.msk [vmem:[#allocation2 + $0xc0] sm:$0xf] %vm416_vm1, %v4141_v2  ;;  %v501_v53 = vpack.c.bf16 %v493_v44, %v493_v44  ;;  %v3183_v60 = vrot.slane %v1183_v41, 4  ;;  %v3187_v62 = vrot.slane %v520_v49, 7  ;;  %v617_v12 = vld [vmem:[#allocation2 + $0x30] sm:$0xf] }
  0x28   : > { %751 = vst.msk [vmem:[#allocation2 + $0xc8] sm:$0xf] %vm416_vm1, %v4141_v2  ;;  %v544_v0 = vshrl.u32 %v500_v52, 16  ;;  %v547_v1 = vshll.u32 %v500_v52, 16  ;;  %v517_v10 = vor.u32 %v515_v46, %v3181_v57  ;;  %v623_v24 = vld [vmem:[#allocation2 + $0x38] sm:$0xf] }
  0x29   : > { %929 = vst.msk [vmem:[#allocation2 + $0xd8] sm:$0xf] %vm416_vm1, %v4141_v2  ;;  %v552_v3 = vshrl.u32 %v501_v53, 16  ;;  %v555_v11 = vshll.u32 %v501_v53, 16  ;;  %v525_v16 = vor.u32 %v523_v50, %v3187_v62  ;;  %v426_v26 = vsel %vm3191_vm7, 0, %v3179_v55  ;;  %v2642_v36 = vld [vmem:[%s3018_s18 + $0x1c0] sm:$0xff] }
  0x2a   : > { %933 = vst.msk [vmem:[#allocation2 + $0xe0] sm:$0xf] %vm416_vm1, %v4141_v2  ;;  %v3203_v17 = vrot.slane %v544_v0, 7  ;;  %v594_v22 = vsel %vm3136_vm4, %v517_v10, %v593_v51  ;;  %v2672_v27 = vld [vmem:[#allocation2] sm:$0xf]  ;;  %v518_v33 = vrot.slane %v3181_v57, 4  ;;  %v974_v51 = vmul.f32 %v3008_v4, %v2641_v31 }
  0x2b   : > { %937 = vst.msk [vmem:[#allocation2 + $0xe8] sm:$0xf] %vm416_vm1, %v4141_v2  ;;  %v3205_v19 = vrot.slane %v552_v3, 7  ;;  %v600_v28 = vsel %vm3136_vm4, %v525_v16, %v599_v58  ;;  %v3231_v37 = vld [vmem:[#allocation2 + $0x4c] sm:$0x1]  ;;  %vm2098_vm11 = vcmask 57344  }
  0x2c   : > { %941 = vst.msk [vmem:[#allocation2 + $0xf0] sm:$0xf] %vm416_vm1, %v4141_v2  ;;  %v3237_v43 = vld [vmem:[#allocation2 + $0x54] sm:$0x1]  ;;  %v3239_v44 = vld [vmem:[#allocation2 + $0x5c] sm:$0x1]  ;;  %vm3984_vm15 = vmand %vm2098_vm11, %vm419_vm6 }
  0x2d   : > { %945 = vst.msk [vmem:[#allocation2 + $0xf8] sm:$0xf] %vm416_vm1, %v4141_v2  ;;  %v557_v29 = vor.u32 %v555_v11, %v3205_v19  ;;  %v3241_v45 = vld [vmem:[#allocation2 + $0x64] sm:$0x1]  ;;  %v3243_v46 = vld [vmem:[#allocation2 + $0x6c] sm:$0x1] }
  0x2e   : > { %949 = vst.msk [vmem:[#allocation2 + $0x100] sm:$0xf] %vm416_vm1, %v4141_v2  ;;  %v3246_v52 = vld [vmem:[#allocation2 + $0x74] sm:$0x1]  ;;  %v3248_v53 = vld [vmem:[#allocation2 + $0x7c] sm:$0x1] }
  0x2f   : > { %953 = vst.msk [vmem:[#allocation2 + $0x108] sm:$0xf] %vm416_vm1, %v4141_v2  ;;  %v624_v41 = vsel %vm3136_vm4, %v557_v29, %v623_v24  ;;  %v3258_v0 = vld [vmem:[#allocation2 + $0xd4] sm:$0x1]  ;;  %v3262_v3 = vld [vmem:[#allocation2 + $0xe4] sm:$0x1]  ;;  %v975_v29 = vmul.f32 %v3008_v4, %v2642_v36 }
  0x30   : > { %957 = vst.msk [vmem:[#allocation2 + $0x110] sm:$0xf] %vm416_vm1, %v4141_v2  ;;  %v3268_v16 = vld [vmem:[#allocation2 + $0xf4] sm:$0x1]  ;;  %vm1179_vm8 = vsmask.f32 3328 }
  0x31   : > { %714 = vst.msk [vmem:[#allocation2 + $0x50] sm:$0xf] %vm416_vm1, %v705_v13  ;;  %v3197_v13 = vadd.f32 %v3023_v6, %v768_v48  ;;  %vm1180_vm9 = vsmask.f32 7440  ;;  %v642_v36 = vsel %vm3191_vm7, 0, %v3237_v43  ;;  %v646_v55 = vsel %vm3191_vm7, 0, %v3239_v44 }
  0x32   : > { %589 = vst [vmem:[#allocation2 + $0x8] sm:$0xf] %v588_v30  ;;  %v1189_v30 = vor.u32 %v3185_v61, %v3183_v60  ;;  %v3321_v43 = vld [vmem:[#allocation2 + $0x11c] sm:$0x1]  ;;  %v3360_v2 = vadd.f32 %v3023_v6, %v975_v29  ;;  %vm3392_vm10 = vmor %vm1179_vm8, %vm1180_vm9  ;;  %vm2130_vm12 = vcmask 60416   ;;  %vm2076_vm13 = vcmask 64512  }
  0x33   : > { %607 = vst [vmem:[#allocation2 + $0x20] sm:$0xf] %v606_v34  ;;  %v769_v34 = vmul.f32 %v3008_v4, %v2634_v21  ;;  %v784_v35 = vmax.f32 %v3197_v13, 0.0  ;;  %v3266_v13 = vld [vmem:[#allocation2 + $0xec] sm:$0x1]  ;;  %v963_v29 = vsel %vm3191_vm7, 0, %v3321_v43  ;;  %vm3975_vm14 = vmand %vm2130_vm12, %vm585_vm3 }
  0x34   : > { %613 = vst [vmem:[#allocation2 + $0x28] sm:$0xf] %v612_v39  ;;  %v3256_v61 = vrot.slane %v1189_v30, 4  ;;  %v3270_v21 = vld [vmem:[#allocation2 + $0xfc] sm:$0x1] }
  0x35   : > { %719 = vst.msk [vmem:[#allocation2 + $0x78] sm:$0xf] %vm416_vm1, %v3141_v18  ;;  %v422_v18 = vsel %vm3191_vm7, 0, %v3177_v54  ;;  %v3250_v54 = vld [vmem:[#allocation2 + $0x84] sm:$0x1] }
  0x36   : > { %720 = vst.msk [vmem:[#allocation2 + $0x80] sm:$0xf] %vm416_vm1, %v3148_v23  ;;  %v549_v23 = vor.u32 %v547_v1, %v3203_v17  ;;  %v3260_v1 = vld [vmem:[#allocation2 + $0xdc] sm:$0x1]  ;;  %v3279_v30 = vld [vmem:[#allocation2 + $0x10c] sm:$0x1] }
  0x37   : > { %715 = vst.msk [vmem:[#allocation2 + $0x58] sm:$0xf] %vm416_vm1, %v706_v56  ;;  %v3252_v56 = vld [vmem:[#allocation2 + $0x8c] sm:$0x1] }
  0x38   : > { %v2848_v32 = vld [vmem:[#allocation2 + $0x4c] sm:$0xf0]  ;;  %716 = vst.msk [vmem:[#allocation2 + $0x60] sm:$0xf] %vm416_vm1, %v707_v9  ;;  %v618_v40 = vsel %vm3136_vm4, %v549_v23, %v617_v12  ;;  %v777_v12 = vadd.f32 %v3023_v6, %v769_v34  ;;  %v3276_v23 = vpack.c.bf16 %v784_v35, %v784_v35  ;;  %v638_v34 = vsel %vm3191_vm7, 0, %v3231_v37 }
  0x39   : > { %v2653_v38 = vor.u32 %v2848_v32, %v2652_v8  ;;  %v2844_v39 = vld [vmem:[#allocation2 + $0x4] sm:$0xf0]  ;;  %595 = vst [vmem:[#allocation2 + $0x10] sm:$0xf] %v594_v22  ;;  %v3272_v22 = vld [vmem:[#allocation2 + $0x104] sm:$0x1] }
  0x3a   : > { %v1165_v42 = vld [vmem:[#allocation2 + $0x8] sm:$0xf]  ;;  %v2673_v47 = vor.u32 %v2844_v39, %v2672_v27  ;;  %v2680_v48 = vld [vmem:[#allocation2 + $0x20] sm:$0xf]  ;;  %601 = vst [vmem:[#allocation2 + $0x18] sm:$0xf] %v600_v28 }
  0x3b   : > { %v1197_v49 = vshrl.u32 %v1165_v42, 16  ;;  %v1200_v50 = vshll.u32 %v1165_v42, 16  ;;  %2666 = vmatmul.msk.bf16.vlgmr.msra.gmra.mxu0 %vm1053_vm2, %v2653_v38  ;;  %v2846_v58 = vld [vmem:[#allocation2 + $0x24] sm:$0xf0]  ;;  %619 = vst [vmem:[#allocation2 + $0x30] sm:$0xf] %v618_v40 }
  0x3c   : > { %2686 = vmatmul.msk.bf16.vlgmr.msra.gmra.mxu1 %vm1053_vm2, %v2673_v47  ;;  %v2681_v8 = vor.u32 %v2846_v58, %v2680_v48  ;;  %v2664_v9 = vld [vmem:[#allocation2 + $0x78] sm:$0xf]  ;;  %625 = vst [vmem:[#allocation2 + $0x38] sm:$0xf] %v624_v41  ;;  %v3292_v35 = vld [vmem:[#allocation2 + $0x114] sm:$0x1] }
  0x3d   : > { %v1199_v10 = vrot.slane %v1197_v49, 4  ;;  %v1202_v11 = vrot.slane %v1200_v50, 5  ;;  %v2851_v24 = vld [vmem:[#allocation2 + $0x7c] sm:$0xf0]  ;;  %423 = vst [vmem:[#allocation2 + $0x4] sm:$0x1] %v422_v18  ;;  %v3290_v18 = vadd.f32 %v3023_v6, %v974_v51 }
  0x3e   : > { %2688 = vmatmul.msk.bf16.vlgmr.msra.gmra.mxu3 %vm1053_vm2, %v2681_v8  ;;  %v2665_v31 = vor.u32 %v2851_v24, %v2664_v9  ;;  %427 = vst [vmem:[#allocation2 + $0xc] sm:$0x1] %v426_v26  ;;  %v650_v26 = vsel %vm3191_vm7, 0, %v3241_v45  ;;  %v654_v37 = vsel %vm3191_vm7, 0, %v3243_v46  ;;  %v3307_v38 = vld [vmem:[#allocation2 + $0x58] sm:$0xf] }
  0x3f   : > { %v1203_v32 = vor.u32 %v1202_v11, %v1199_v10  ;;  %v658_v39 = vsel %vm3191_vm7, 0, %v3246_v52  ;;  %v662_v40 = vsel %vm3191_vm7, 0, %v3248_v53  ;;  %v666_v41 = vsel %vm3191_vm7, 0, %v3250_v54  ;;  %v2849_v44 = vld [vmem:[#allocation2 + $0x5c] sm:$0xf0] }
  0x40   : > { %2669 = vmatmul.msk.bf16.gmra.mxu2 %vm1053_vm2, %v2665_v31  ;;  %v670_v42 = vsel %vm3191_vm7, 0, %v3252_v56  ;;  %v757_v46 = vsel %vm3191_vm7, 0, %v3258_v0  ;;  %v931_v47 = vsel %vm3191_vm7, 0, %v3260_v1  ;;  %v935_v48 = vsel %vm3191_vm7, 0, %v3262_v3  ;;  %v2737_v53 = vld [vmem:[%s4135_s3 + $0xa] sm:$0x3] }
  0x41   : > { %v3323_v45 = vrot.slane %v1203_v32, 4  ;;  %v939_v49 = vsel %vm3191_vm7, 0, %v3266_v13  ;;  %v943_v50 = vsel %vm3191_vm7, 0, %v3268_v16  ;;  %v947_v51 = vsel %vm3191_vm7, 0, %v3270_v21  ;;  %v2676_v58 = vld [vmem:[#allocation2 + $0x10] sm:$0xf] }
  0x42   : > { %v951_v52 = vsel %vm3191_vm7, 0, %v3272_v22  ;;  %v2845_v8 = vld [vmem:[#allocation2 + $0x14] sm:$0xf0]  ;;  %v955_v9 = vsel %vm3191_vm7, 0, %v3279_v30  ;;  %v959_v10 = vsel %vm3191_vm7, 0, %v3292_v35  ;;  %v1679_v11 = vsel %vm1066_vm0, %v2737_v53, 0 }
  0x43   : > { %639 = vst [vmem:[#allocation2 + $0x4c] sm:$0x1] %v638_v34  ;;  %v785_v24 = vmax.f32 %v777_v12, 0.0  ;;  %1688 = vmatpush.bf16.msrb.mxu1 %v1679_v11  ;;  %v2742_v32 = vld [vmem:[%s4135_s3 + $0xc] sm:$0x3]  ;;  %v2657_v28 = vor.u32 %v2849_v44, %v3307_v38  ;;  %v801_v38 = vshrl.u32 %v3276_v23, 16 }
  0x44   : > { %v1164_v31 = vld [vmem:[#allocation2 + $0x4] sm:$0x1]  ;;  %643 = vst [vmem:[#allocation2 + $0x54] sm:$0x1] %v642_v36  ;;  %v2684_v27 = vld [vmem:[#allocation2 + $0x30] sm:$0xf] }
  0x45   : > { %v2847_v15 = vld [vmem:[#allocation2 + $0x34] sm:$0xf0]  ;;  %v590_v25 = vld [vmem:[#allocation2 + $0xc] sm:$0x1]  ;;  %v1192_v60 = vshll.u32 %v1164_v31, 16  ;;  %v1761_v12 = vsel %vm1066_vm0, %v2742_v32, 0  ;;  %v793_v34 = vpack.c.bf16 %v785_v24, %v785_v24  ;;  %v2677_v32 = vor.u32 %v2845_v8, %v2676_v58 }
  0x46   : > { %647 = vst [vmem:[#allocation2 + $0x5c] sm:$0x1] %v646_v55  ;;  %v3364_v53 = vld [vmem:[#allocation2 + $0x14] sm:$0x1]  ;;  %v591_v36 = vsel %vm3191_vm7, %v510_v20, %v590_v25  ;;  %1770 = vmatpush.bf16.msra.mxu2 %v1761_v12  ;;  %v804_v55 = vshll.u32 %v3276_v23, 16  ;;  %v2635_v44 = vld [vmem:[%s3018_s18 + $0x141] sm:$0xff] }
  0x47   : > { %651 = vst [vmem:[#allocation2 + $0x64] sm:$0x1] %v650_v26  ;;  %v1194_v11 = vrot.slane %v1192_v60, 5  ;;  %v809_v24 = vshrl.u32 %v793_v34, 16  ;;  %v812_v31 = vshll.u32 %v793_v34, 16  ;;  %v990_v59 = vmax.f32 %v3290_v18, 0.0 }
  0x48   : > { %592 = vst [vmem:[#allocation2 + $0xc] sm:$0x1] %v591_v36  ;;  %v3377_v20 = vrot.slane %v801_v38, 7  ;;  %v991_v25 = vmax.f32 %v3360_v2, 0.0  ;;  %v2763_v26 = vld [vmem:[%s4135_s3 + $0xe] sm:$0x3]  ;;  %v770_v12 = vmul.f32 %v3008_v4, %v2635_v44 }
  0x49   : > { %655 = vst [vmem:[#allocation2 + $0x6c] sm:$0x1] %v654_v37  ;;  %v3384_v23 = vrot.slane %v809_v24, 7  ;;  %v1843_v60 = vsel %vm1066_vm0, %v2763_v26, 0  ;;  %v2784_v18 = vld [vmem:[%s4135_s3 + $0x10] sm:$0x3]  ;;  %v2685_v37 = vor.u32 %v2847_v15, %v2684_v27  ;;  %v3435_v0 = vpack.c.bf16 %v990_v59, %v990_v59 }
  0x4a   : > { %659 = vst [vmem:[#allocation2 + $0x74] sm:$0x1] %v658_v39  ;;  %1852 = vmatpush.bf16.msra.mxu3 %v1843_v60  ;;  %v2037_v58 = vsel %vm1066_vm0, %v2784_v18, 0  ;;  %v430_v39 = vsel %vm3191_vm7, 0, %v3364_v53  ;;  %v3400_v8 = vld [vmem:[#allocation2 + $0x1c] sm:$0x1]  ;;  %v778_v54 = vadd.f32 %v3023_v6, %v770_v12  ;;  %v806_v56 = vor.u32 %v804_v55, %v3377_v20 }
  0x4b   : > { %663 = vst [vmem:[#allocation2 + $0x7c] sm:$0x1] %v662_v40  ;;  %2667 = vmatmul.msk.bf16.gmra.mxu0 %vm1053_vm2, %v2657_v28  ;;  %v807_v15 = vrot.slane %v3377_v20, 4  ;;  %v815_v27 = vrot.slane %v3384_v23, 4  ;;  %v1167_v40 = vld [vmem:[#allocation2 + $0x10] sm:$0xf] }
  0x4c   : > { %667 = vst [vmem:[#allocation2 + $0x84] sm:$0x1] %v666_v41  ;;  %2687 = vmatmul.msk.bf16.gmra.mxu1 %vm1053_vm2, %v2677_v32  ;;  %v3414_v34 = vld [vmem:[#allocation2 + $0x90] sm:$0xf]  ;;  %2046 = vmatpush.bf16.msra.mxu0 %v2037_v58  ;;  %v1169_v28 = vld [vmem:[#allocation2 + $0x18] sm:$0xf]  ;;  %v1195_v41 = vsel %vm3392_vm10, %v3256_v61, %v1194_v11  ;;  %v814_v61 = vor.u32 %v812_v31, %v3384_v23 }
  0x4d   : > { %671 = vst [vmem:[#allocation2 + $0x8c] sm:$0x1] %v670_v42  ;;  %v1211_v36 = vshrl.u32 %v1167_v40, 16  ;;  %v1214_v38 = vshll.u32 %v1167_v40, 16  ;;  %v3425_v42 = vld [vmem:[#allocation2 + $0x98] sm:$0xf]  ;;  %v1296_v18 = vunpack.c.l.b16 %v1195_v41  ;;  %v881_v58 = vsel %vm3136_vm4, %v806_v56, %v3414_v34 }
  0x4e   : > { %758 = vst [vmem:[#allocation2 + $0xd4] sm:$0x1] %v757_v46  ;;  %v1225_v44 = vshrl.u32 %v1169_v28, 16  ;;  %v1228_v24 = vshll.u32 %v1169_v28, 16  ;;  %v3427_v32 = vld [vmem:[#allocation2 + $0x94] sm:$0x1]  ;;  %2689 = vmatmul.msk.bf16.gmra.mxu3 %vm1053_vm2, %v2685_v37 }
  0x4f   : > { %v1166_v26 = vld [vmem:[#allocation2 + $0xc] sm:$0x1]  ;;  %932 = vst [vmem:[#allocation2 + $0xdc] sm:$0x1] %v931_v47  ;;  %v1213_v46 = vrot.slane %v1211_v36, 4  ;;  %v1216_v55 = vrot.slane %v1214_v38, 5  ;;  %v999_v47 = vpack.c.bf16 %v991_v25, %v991_v25  ;;  %v887_v25 = vsel %vm3136_vm4, %v814_v61, %v3425_v42 }
  0x50   : > { %v1206_v11 = vshll.u32 %v1166_v26, 16  ;;  %936 = vst [vmem:[#allocation2 + $0xe4] sm:$0x1] %v935_v48  ;;  %v434_v12 = vsel %vm3191_vm7, 0, %v3400_v8  ;;  %v1227_v60 = vrot.slane %v1225_v44, 4  ;;  %v1230_v1 = vrot.slane %v1228_v24, 5 }
  0x51   : > { %940 = vst [vmem:[#allocation2 + $0xec] sm:$0x1] %v939_v49  ;;  %v1217_v31 = vor.u32 %v1216_v55, %v1213_v46  ;;  %v3448_v59 = vld [vmem:[#allocation2 + $0x9c] sm:$0x1]  ;;  %v2636_v37 = vld [vmem:[%s3018_s18 + $0x151] sm:$0xff]  ;;  %v786_v3 = vmax.f32 %v778_v54, 0.0 }
  0x52   : > { %v1208_v48 = vrot.slane %v1206_v11, 5  ;;  %944 = vst [vmem:[#allocation2 + $0xf4] sm:$0x1] %v943_v50  ;;  %v1231_v13 = vor.u32 %v1230_v1, %v1227_v60  ;;  %v771_v49 = vmul.f32 %v3008_v4, %v2636_v37  ;;  %v725_v16 = vsel %vm3191_vm7, 0, %v3427_v32  ;;  %v2643_v34 = vld [vmem:[%s3018_s18 + $0x1d0] sm:$0xff]  ;;  %v2644_v36 = vld [vmem:[%s3018_s18 + $0x1e0] sm:$0xff] }
  0x53   : > { %948 = vst [vmem:[#allocation2 + $0xfc] sm:$0x1] %v947_v51  ;;  %v729_v50 = vsel %vm3191_vm7, 0, %v3448_v59  ;;  %v794_v40 = vpack.c.bf16 %v786_v3, %v786_v3  ;;  %v3480_v21 = vrot.slane %v1217_v31, 4  ;;  %v976_v38 = vmul.f32 %v3008_v4, %v2643_v34  ;;  %v3485_v54 = vld [vmem:[#allocation2 + $0x24] sm:$0x1] }
  0x54   : > { %v1209_v28 = vsel %vm3392_vm10, %v3323_v45, %v1208_v48  ;;  %952 = vst [vmem:[#allocation2 + $0x104] sm:$0x1] %v951_v52  ;;  %v779_v51 = vadd.f32 %v3023_v6, %v771_v49  ;;  %v977_v52 = vmul.f32 %v3008_v4, %v2644_v36  ;;  %v3492_v56 = vld [vmem:[#allocation2 + $0x2c] sm:$0x1]  ;;  %v3498_v42 = vrot.slane %v1231_v13, 4  ;;  %v2637_v26 = vld [vmem:[%s3018_s18 + $0x161] sm:$0xff] }
  0x55   : > { %v1297_v41 = vunpack.c.l.b16 %v1209_v28  ;;  %956 = vst [vmem:[#allocation2 + $0x10c] sm:$0x1] %v955_v9  ;;  %v817_v45 = vshrl.u32 %v794_v40, 16  ;;  %v820_v22 = vshll.u32 %v794_v40, 16  ;;  %v3500_v24 = vld [vmem:[#allocation2 + $0xa0] sm:$0xf]  ;;  %v984_v30 = vadd.f32 %v3023_v6, %v976_v38 }
  0x56   : > { %960 = vst [vmem:[#allocation2 + $0x114] sm:$0x1] %v959_v10  ;;  %v787_v44 = vmax.f32 %v779_v51, 0.0  ;;  %v438_v9 = vsel %vm3191_vm7, 0, %v3485_v54  ;;  %v985_v10 = vadd.f32 %v3023_v6, %v977_v52  ;;  %v3514_v46 = vld [vmem:[#allocation2 + $0xa4] sm:$0x1]  ;;  %v772_v11 = vmul.f32 %v3008_v4, %v2637_v26 }
  0x57   : > { %v1304_v61 = vpack.c.b16 %v1297_v41, %v1296_v18  ;;  %964 = vst [vmem:[#allocation2 + $0x11c] sm:$0x1] %v963_v29  ;;  %v3511_v35 = vrot.slane %v817_v45, 7  ;;  %v2638_v55 = vld [vmem:[%s3018_s18 + $0x171] sm:$0xff]  ;;  %v992_v1 = vmax.f32 %v984_v30, 0.0  ;;  %v442_v18 = vsel %vm3191_vm7, 0, %v3492_v56 }
  0x58   : > { %882 = vst [vmem:[#allocation2 + $0x90] sm:$0xf] %v881_v58  ;;  %v795_v60 = vpack.c.bf16 %v787_v44, %v787_v44  ;;  %v3521_v31 = vld [vmem:[#allocation2 + $0xac] sm:$0x1]  ;;  %v773_v43 = vmul.f32 %v3008_v4, %v2638_v55  ;;  %v1171_v3 = vld [vmem:[#allocation2 + $0x20] sm:$0xf]  ;;  %v780_v58 = vadd.f32 %v3023_v6, %v772_v11 }
  0x59   : > { %2691 = vmatmul.msk.bf16.vlgmr.msrb.gmra.mxu2 %vm1053_vm2, %v1304_v61  ;;  %888 = vst [vmem:[#allocation2 + $0x98] sm:$0xf] %v887_v25  ;;  %v822_v29 = vor.u32 %v820_v22, %v3511_v35  ;;  %v823_v37 = vrot.slane %v3511_v35, 4  ;;  %v733_v48 = vsel %vm3191_vm7, 0, %v3514_v46  ;;  %v1173_v40 = vld [vmem:[#allocation2 + $0x28] sm:$0xf] }
  0x5a   : > { %1006 = vst.msk [vmem:[#allocation2 + $0xd8] sm:$0xf] %vm416_vm1, %v3435_v0  ;;  %v825_v13 = vshrl.u32 %v795_v60, 16  ;;  %v828_v49 = vshll.u32 %v795_v60, 16  ;;  %v781_v34 = vadd.f32 %v3023_v6, %v773_v43  ;;  %v898_v28 = vld [vmem:[#allocation2 + $0xa8] sm:$0xf] }
  0x5b   : > { %1007 = vst.msk [vmem:[#allocation2 + $0xe0] sm:$0xf] %vm416_vm1, %v999_v47  ;;  %v893_v25 = vsel %vm3136_vm4, %v822_v29, %v3500_v24  ;;  %v993_v51 = vmax.f32 %v985_v10, 0.0  ;;  %v1239_v36 = vshrl.u32 %v1171_v3, 16  ;;  %v1242_v38 = vshll.u32 %v1171_v3, 16 }
  0x5c   : > { %431 = vst [vmem:[#allocation2 + $0x14] sm:$0x1] %v430_v39  ;;  %v3542_v0 = vrot.slane %v825_v13, 7  ;;  %v1253_v41 = vshrl.u32 %v1173_v40, 16  ;;  %v1256_v45 = vshll.u32 %v1173_v40, 16  ;;  %v737_v47 = vsel %vm3191_vm7, 0, %v3521_v31 }
  0x5d   : > { %435 = vst [vmem:[#allocation2 + $0x1c] sm:$0x1] %v434_v12  ;;  %v1241_v22 = vrot.slane %v1239_v36, 4  ;;  %v1244_v52 = vrot.slane %v1242_v38, 5  ;;  %v788_v44 = vmax.f32 %v780_v58, 0.0  ;;  %v789_v24 = vmax.f32 %v781_v34, 0.0 }
  0x5e   : > { %726 = vst [vmem:[#allocation2 + $0x94] sm:$0x1] %v725_v16  ;;  %v830_v53 = vor.u32 %v828_v49, %v3542_v0  ;;  %v831_v39 = vrot.slane %v3542_v0, 4  ;;  %v1255_v30 = vrot.slane %v1253_v41, 4  ;;  %v1258_v26 = vrot.slane %v1256_v45, 5 }
  0x5f   : > { %v2698_v61 = vld [vmem:[#allocation2 + $0x90] sm:$0xf]  ;;  %730 = vst [vmem:[#allocation2 + $0x9c] sm:$0x1] %v729_v50  ;;  %v1000_v12 = vpack.c.bf16 %v992_v1, %v992_v1  ;;  %v1001_v10 = vpack.c.bf16 %v993_v51, %v993_v51  ;;  %v1245_v55 = vor.u32 %v1244_v52, %v1241_v22  ;;  %v796_v59 = vpack.c.bf16 %v788_v44, %v788_v44  ;;  %v2300_v20 = vld [vmem:[%s4136_s4] sm:$0x3] }
  0x60   : > { %v1524_v8 = vld [vmem:[#allocation2 + $0x90] sm:$0xf]  ;;  %v2852_v11 = vld [vmem:[#allocation2 + $0x94] sm:$0xf0]  ;;  %v899_v43 = vsel %vm3136_vm4, %v830_v53, %v898_v28  ;;  %v1259_v29 = vor.u32 %v1258_v26, %v1255_v30  ;;  %894 = vst [vmem:[#allocation2 + $0xa0] sm:$0xf] %v893_v25  ;;  %v3563_v34 = vpack.c.bf16 %v789_v24, %v789_v24 }
  0x61   : > { %v1526_v60 = vld [vmem:[#allocation2 + $0x98] sm:$0xf]  ;;  %v1541_v32 = vshrl.u32 %v1524_v8, 16  ;;  %v1544_v16 = vshll.u32 %v1524_v8, 16  ;;  %v2699_v3 = vor.u32 %v2852_v11, %v2698_v61  ;;  %900 = vst [vmem:[#allocation2 + $0xa8] sm:$0xf] %v899_v43 }
  0x62   : > { %v2719_v58 = vld [vmem:[#allocation2 + $0xd8] sm:$0xf]  ;;  %v1555_v13 = vshrl.u32 %v1526_v60, 16  ;;  %v1558_v49 = vshll.u32 %v1526_v60, 16  ;;  %v2856_v50 = vld [vmem:[#allocation2 + $0xdc] sm:$0xf0] }
  0x63   : > { %v1543_v40 = vrot.slane %v1541_v32, 4  ;;  %v1546_v1 = vrot.slane %v1544_v16, 5  ;;  %v2645_v51 = vld [vmem:[%s3018_s18 + $0x1f0] sm:$0xff]  ;;  %2712 = vmatmul.msk.bf16.vlgmr.msrb.gmra.mxu3 %vm1053_vm2, %v2699_v3  ;;  %v2720_v36 = vor.u32 %v2856_v50, %v2719_v58  ;;  %1008 = vst.msk [vmem:[#allocation2 + $0xe8] sm:$0xf] %vm416_vm1, %v1000_v12  ;;  %v3573_v52 = vrot.slane %v1245_v55, 4 }
  0x64   : > { %v596_v38 = vld [vmem:[#allocation2 + $0x14] sm:$0x1]  ;;  %v1557_v41 = vrot.slane %v1555_v13, 4  ;;  %v1560_v28 = vrot.slane %v1558_v49, 5  ;;  %v602_v45 = vld [vmem:[#allocation2 + $0x1c] sm:$0x1] }
  0x65   : > { %v597_v25 = vsel %vm3191_vm7, %v518_v33, %v596_v38  ;;  %v1547_v22 = vor.u32 %v1546_v1, %v1543_v40  ;;  %1009 = vst.msk [vmem:[#allocation2 + $0xf0] sm:$0xf] %vm416_vm1, %v1001_v10  ;;  %v3575_v44 = vrot.slane %v1259_v29, 4  ;;  %2733 = vmatmul.msk.bf16.vlgmr.msrb.gmra.mxu0 %vm1053_vm2, %v2720_v36  ;;  %v4149_v24 = vrot.slane %v3187_v62, 4  ;;  %v883_v57 = vld [vmem:[#allocation2 + $0x94] sm:$0x1] }
  0x66   : > { %598 = vst [vmem:[#allocation2 + $0x14] sm:$0x1] %v597_v25  ;;  %v1561_v30 = vor.u32 %v1560_v28, %v1557_v41  ;;  %v833_v26 = vshrl.u32 %v796_v59, 16  ;;  %v836_v33 = vshll.u32 %v796_v59, 16  ;;  %v884_v61 = vsel %vm3191_vm7, %v807_v15, %v883_v57  ;;  %v889_v8 = vld [vmem:[#allocation2 + $0x9c] sm:$0x1] }
  0x67   : > { %v603_v53 = vsel %vm3191_vm7, %v4149_v24, %v602_v45  ;;  %v3586_v12 = vrot.slane %v1547_v22, 4  ;;  %v841_v10 = vshrl.u32 %v3563_v34, 16  ;;  %885 = vst [vmem:[#allocation2 + $0x94] sm:$0x1] %v884_v61  ;;  %v890_v62 = vsel %vm3191_vm7, %v815_v27, %v889_v8  ;;  %v2702_v60 = vld [vmem:[#allocation2 + $0xa0] sm:$0xf] }
  0x68   : > { %604 = vst [vmem:[#allocation2 + $0x1c] sm:$0x1] %v603_v53  ;;  %v3593_v55 = vrot.slane %v1561_v30, 4  ;;  %v3598_v11 = vrot.slane %v833_v26, 7  ;;  %v978_v15 = vmul.f32 %v3008_v4, %v2645_v51  ;;  %v2334_v32 = vsel %vm1066_vm0, %v2300_v20, 0 }
  0x69   : > { %891 = vst [vmem:[#allocation2 + $0x9c] sm:$0x1] %v890_v62  ;;  %v3602_v16 = vrot.slane %v841_v10, 7  ;;  %v2853_v23 = vld [vmem:[#allocation2 + $0xa4] sm:$0xf0]  ;;  %2343 = vmatpush.bf16.msra.mxu1 %v2334_v32  ;;  %v844_v41 = vshll.u32 %v3563_v34, 16 }
  0x6a   : > { %439 = vst [vmem:[#allocation2 + $0x24] sm:$0x1] %v438_v9  ;;  %v1528_v27 = vld [vmem:[#allocation2 + $0xa0] sm:$0xf]  ;;  %v3608_v43 = vld [vmem:[#allocation2 + $0xe8] sm:$0xf]  ;;  %v3621_v9 = vor.u32 %v836_v33, %v3598_v11  ;;  %v3624_v58 = vadd.f32 %v3023_v6, %v978_v15  ;;  %v2703_v49 = vor.u32 %v2853_v23, %v2702_v60 }
  0x6b   : > { %443 = vst [vmem:[#allocation2 + $0x2c] sm:$0x1] %v442_v18  ;;  %v1530_v4 = vld [vmem:[#allocation2 + $0xa8] sm:$0xf]  ;;  %v1569_v3 = vshrl.u32 %v1528_v27, 16  ;;  %v1572_v54 = vshll.u32 %v1528_v27, 16  ;;  %v846_v30 = vor.u32 %v844_v41, %v3602_v16 }
  0x6c   : > { %v3614_v29 = vld [vmem:[#allocation2 + $0xec] sm:$0xf0]  ;;  %734 = vst [vmem:[#allocation2 + $0xa4] sm:$0x1] %v733_v48  ;;  %v1583_v46 = vshrl.u32 %v1530_v4, 16  ;;  %v1586_v18 = vshll.u32 %v1530_v4, 16 }
  0x6d   : > { %v1168_v13 = vld [vmem:[#allocation2 + $0x14] sm:$0x1]  ;;  %v2724_v56 = vor.u32 %v3614_v29, %v3608_v43  ;;  %738 = vst [vmem:[#allocation2 + $0xac] sm:$0x1] %v737_v47  ;;  %v1571_v50 = vrot.slane %v1569_v3, 4  ;;  %v1574_v40 = vrot.slane %v1572_v54, 5 }
  0x6e   : > { %v1220_v59 = vshll.u32 %v1168_v13, 16  ;;  %v839_v1 = vrot.slane %v3598_v11, 4  ;;  %v1525_v51 = vld [vmem:[#allocation2 + $0x94] sm:$0x1]  ;;  %v1585_v36 = vrot.slane %v1583_v46, 4  ;;  %v1588_v38 = vrot.slane %v1586_v18, 5 }
  0x6f   : > { %v1170_v48 = vld [vmem:[#allocation2 + $0x1c] sm:$0x1]  ;;  %v1550_v45 = vshll.u32 %v1525_v51, 16  ;;  %v1575_v22 = vor.u32 %v1574_v40, %v1571_v50  ;;  %v847_v31 = vrot.slane %v3602_v16, 4  ;;  %v904_v26 = vld [vmem:[#allocation2 + $0xb0] sm:$0xf] }
  0x70   : > { %v1234_v6 = vshll.u32 %v1170_v48, 16  ;;  %v1222_v28 = vrot.slane %v1220_v59, 5  ;;  %v1527_v25 = vld [vmem:[#allocation2 + $0x9c] sm:$0x1]  ;;  %v1589_v57 = vor.u32 %v1588_v38, %v1585_v36  ;;  %v4150_v34 = vrot.slane %v3117_v63, 4  ;;  %v2646_v27 = vld [vmem:[%s3018_s18 + $0x200] sm:$0xff] }
  0x71   : > { %v1564_v24 = vshll.u32 %v1527_v25, 16  ;;  %v608_v53 = vld [vmem:[#allocation2 + $0x24] sm:$0x1]  ;;  %v1552_v61 = vrot.slane %v1550_v45, 5  ;;  %v3643_v62 = vrot.slane %v1575_v22, 4  ;;  %v4151_v23 = vrot.slane %v3121_v7, 4 }
  0x72   : > { %v1236_v47 = vrot.slane %v1234_v6, 5  ;;  %v1223_v33 = vsel %vm3392_vm10, %v3480_v21, %v1222_v28  ;;  %v609_v8 = vsel %vm3191_vm7, %v4150_v34, %v608_v53  ;;  %v614_v10 = vld [vmem:[#allocation2 + $0x2c] sm:$0x1]  ;;  %v910_v20 = vld [vmem:[#allocation2 + $0xb8] sm:$0xf]  ;;  %v3661_v29 = vrot.slane %v1589_v57, 4 }
  0x73   : > { %v1298_v60 = vunpack.c.l.b16 %v1223_v33  ;;  %v1566_v32 = vrot.slane %v1564_v24, 5  ;;  %610 = vst [vmem:[#allocation2 + $0x24] sm:$0x1] %v609_v8  ;;  %v615_v21 = vsel %vm3191_vm7, %v4151_v23, %v614_v10  ;;  %v895_v63 = vld [vmem:[#allocation2 + $0xa4] sm:$0x1]  ;;  %v1553_v4 = vsel %vm3392_vm10, %v3586_v12, %v1552_v61  ;;  %2713 = vmatmul.msk.bf16.gmra.mxu3 %vm1053_vm2, %v2703_v49  ;;  %v2640_v59 = vld [vmem:[%s3018_s18 + $0x191] sm:$0xff] }
  0x74   : > { %v1237_v15 = vsel %vm3392_vm10, %v3498_v42, %v1236_v47  ;;  %616 = vst [vmem:[#allocation2 + $0x2c] sm:$0x1] %v615_v21  ;;  %v896_v42 = vsel %vm3191_vm7, %v823_v37, %v895_v63  ;;  %v901_v7 = vld [vmem:[#allocation2 + $0xac] sm:$0x1]  ;;  %v1654_v54 = vunpack.c.l.b16 %v1553_v4  ;;  %v905_v35 = vsel %vm3136_vm4, %v3621_v9, %v904_v26  ;;  %v445_v37 = vld [vmem:[#allocation2 + $0x34] sm:$0x1] }
  0x75   : > { %v1299_v43 = vunpack.c.l.b16 %v1237_v15  ;;  %v1567_v3 = vsel %vm3392_vm10, %v3593_v55, %v1566_v32  ;;  %897 = vst [vmem:[#allocation2 + $0xa4] sm:$0x1] %v896_v42  ;;  %v902_v12 = vsel %vm3191_vm7, %v831_v39, %v901_v7  ;;  %v449_v13 = vld [vmem:[#allocation2 + $0x3c] sm:$0x1]  ;;  %v2639_v49 = vld [vmem:[%s3018_s18 + $0x181] sm:$0xff]  ;;  %2734 = vmatmul.msk.bf16.gmra.mxu0 %vm1053_vm2, %v2724_v56  ;;  %v911_v55 = vsel %vm3136_vm4, %v846_v30, %v910_v20  ;;  %v2647_v24 = vld [vmem:[%s3018_s18 + $0x210] sm:$0xff] }
  0x76   : > { %v1655_v18 = vunpack.c.l.b16 %v1567_v3  ;;  %903 = vst [vmem:[#allocation2 + $0xac] sm:$0x1] %v902_v12  ;;  %v3680_v0 = vld [vmem:[%s4133_s1] ss:$0 sm:$0xff]  ;;  %v1175_v48 = vld [vmem:[#allocation2 + $0x30] sm:$0xf] }
  0x77   : > { %v1305_v46 = vpack.c.b16 %v1299_v43, %v1298_v60  ;;  %v979_v39 = vmul.f32 %v3680_v0, %v2646_v27  ;;  %v1177_v9 = vld [vmem:[#allocation2 + $0x38] sm:$0xf]  ;;  %906 = vst [vmem:[#allocation2 + $0xb0] sm:$0xf] %v905_v35  ;;  %v994_v50 = vmax.f32 %v3624_v58, 0.0  ;;  %v446_v56 = vsel %vm3191_vm7, 0, %v445_v37 }
  0x78   : > { %v450_v40 = vsel %vm3191_vm7, 0, %v449_v13  ;;  %v1267_v6 = vshrl.u32 %v1175_v48, 16  ;;  %v1662_v51 = vpack.c.b16 %v1655_v18, %v1654_v54  ;;  %912 = vst [vmem:[#allocation2 + $0xb8] sm:$0xf] %v911_v55  ;;  %v3693_v36 = vld [vmem:[%s4134_s2] ss:$0 sm:$0xff]  ;;  %v774_v26 = vmul.f32 %v3680_v0, %v2639_v49 }
  0x79   : > { %2692 = vmatmul.msk.bf16.gmra.mxu2 %vm1053_vm2, %v1305_v46  ;;  %v987_v38 = vadd.f32 %v3693_v36, %v979_v39  ;;  %v1270_v58 = vshll.u32 %v1175_v48, 16  ;;  %v1281_v41 = vshrl.u32 %v1177_v9, 16  ;;  %v740_v28 = vld [vmem:[#allocation2 + $0xb4] sm:$0x1]  ;;  %v1002_v25 = vpack.c.bf16 %v994_v50, %v994_v50  ;;  %447 = vst [vmem:[#allocation2 + $0x34] sm:$0x1] %v446_v56 }
  0x7a   : > { %v3696_v45 = vrot.slane %v1267_v6, 4  ;;  %v1284_v22 = vshll.u32 %v1177_v9, 16  ;;  %v741_v47 = vsel %vm3191_vm7, 0, %v740_v28  ;;  %2738 = vmatmul.msk.bf16.vlgmr.msrb.gmra.mxu1 %vm1053_vm2, %v1662_v51  ;;  %v1172_v53 = vld [vmem:[#allocation2 + $0x24] sm:$0x1]  ;;  %v775_v8 = vmul.f32 %v3680_v0, %v2640_v59 }
  0x7b   : > { %v995_v57 = vmax.f32 %v987_v38, 0.0  ;;  %451 = vst [vmem:[#allocation2 + $0x3c] sm:$0x1] %v450_v40  ;;  %v3702_v30 = vrot.slane %v1270_v58, 5  ;;  %v1174_v33 = vld [vmem:[#allocation2 + $0x2c] sm:$0x1]  ;;  %v980_v27 = vmul.f32 %v3680_v0, %v2647_v24  ;;  %v782_v3 = vadd.f32 %v3693_v36, %v774_v26 }
  0x7c   : > { %v1248_v61 = vshll.u32 %v1172_v53, 16  ;;  %1010 = vst.msk [vmem:[#allocation2 + $0xf8] sm:$0xf] %vm416_vm1, %v1002_v25  ;;  %v3706_v34 = vrot.slane %v1281_v41, 4  ;;  %v1262_v10 = vshll.u32 %v1174_v33, 16  ;;  %v3709_v60 = vrot.slane %v1284_v22, 5 }
  0x7d   : > { %v1529_v20 = vld [vmem:[#allocation2 + $0xa4] sm:$0x1]  ;;  %v1003_v15 = vpack.c.bf16 %v995_v57, %v995_v57  ;;  %742 = vst [vmem:[#allocation2 + $0xb4] sm:$0x1] %v741_v47  ;;  %v1531_v23 = vld [vmem:[#allocation2 + $0xac] sm:$0x1]  ;;  %v1273_v7 = vor.u32 %v3702_v30, %v3696_v45  ;;  %v783_v13 = vadd.f32 %v3693_v36, %v775_v8  ;;  %v988_v6 = vadd.f32 %v3693_v36, %v980_v27 }
  0x7e   : > { %v1250_v32 = vrot.slane %v1248_v61, 5  ;;  %v1578_v21 = vshll.u32 %v1529_v20, 16  ;;  %v744_v63 = vld [vmem:[#allocation2 + $0xbc] sm:$0x1]  ;;  %v1264_v43 = vrot.slane %v1262_v10, 5  ;;  %v1592_v4 = vshll.u32 %v1531_v23, 16 }
  0x7f   : > { %v2706_v42 = vld [vmem:[#allocation2 + $0xb0] sm:$0xf]  ;;  %1011 = vst.msk [vmem:[#allocation2 + $0x100] sm:$0xf] %vm416_vm1, %v1003_v15  ;;  %v2854_v35 = vld [vmem:[#allocation2 + $0xb4] sm:$0xf0]  ;;  %v1287_v11 = vor.u32 %v3709_v60, %v3706_v34 }
  0x80   : > { %v1251_v54 = vsel %vm3392_vm10, %v3573_v52, %v1250_v32  ;;  %v1580_v12 = vrot.slane %v1578_v21, 5  ;;  %v745_v37 = vsel %vm3191_vm7, 0, %v744_v63  ;;  %v2648_v49 = vld [vmem:[%s3018_s18 + $0x220] sm:$0xff]  ;;  %v1265_v46 = vsel %vm3392_vm10, %v3575_v44, %v1264_v43  ;;  %v620_v48 = vld [vmem:[#allocation2 + $0x34] sm:$0x1] }
  0x81   : > { %v1300_v18 = vunpack.c.l.b16 %v1251_v54  ;;  %v1594_v55 = vrot.slane %v1592_v4, 5  ;;  %v2707_v39 = vor.u32 %v2854_v35, %v2706_v42  ;;  %746 = vst [vmem:[#allocation2 + $0xbc] sm:$0x1] %v745_v37  ;;  %v1301_v9 = vunpack.c.l.b16 %v1265_v46  ;;  %v1532_v40 = vld [vmem:[#allocation2 + $0xb0] sm:$0xf] }
  0x82   : > { %v1581_v52 = vsel %vm3392_vm10, %v3643_v62, %v1580_v12  ;;  %v4152_v59 = vrot.slane %v3203_v17, 4  ;;  %v626_v56 = vld [vmem:[#allocation2 + $0x3c] sm:$0x1]  ;;  %v4153_v58 = vrot.slane %v3205_v19, 4  ;;  %v1534_v17 = vld [vmem:[#allocation2 + $0xb8] sm:$0xf]  ;;  %v981_v41 = vmul.f32 %v3680_v0, %v2648_v49 }
  0x83   : > { %v1595_v44 = vsel %vm3392_vm10, %v3661_v29, %v1594_v55  ;;  %v1656_v51 = vunpack.c.l.b16 %v1581_v52  ;;  %v2727_v38 = vld [vmem:[#allocation2 + $0xf8] sm:$0xf]  ;;  %v1306_v28 = vpack.c.b16 %v1301_v9, %v1300_v18  ;;  %v1597_v22 = vshrl.u32 %v1532_v40, 16  ;;  %2714 = vmatmul.msk.bf16.gmra.mxu3 %vm1053_vm2, %v2707_v39  ;;  %v748_v54 = vld [vmem:[#allocation2 + $0xc4] sm:$0x1] }
  0x84   : > { %v621_v50 = vsel %vm3191_vm7, %v4152_v59, %v620_v48  ;;  %v627_v62 = vsel %vm3191_vm7, %v4153_v58, %v626_v56  ;;  %v1657_v25 = vunpack.c.l.b16 %v1595_v44  ;;  %v907_v45 = vld [vmem:[#allocation2 + $0xb4] sm:$0x1]  ;;  %v1600_v47 = vshll.u32 %v1532_v40, 16  ;;  %v916_v49 = vld [vmem:[#allocation2 + $0xc0] sm:$0xf] }
  0x85   : > { %622 = vst [vmem:[#allocation2 + $0x34] sm:$0x1] %v621_v50  ;;  %v908_v29 = vsel %vm3191_vm7, %v839_v1, %v907_v45  ;;  %v1611_v19 = vshrl.u32 %v1534_v17, 16  ;;  %v1614_v24 = vshll.u32 %v1534_v17, 16  ;;  %v790_v53 = vmax.f32 %v782_v3, 0.0 }
  0x86   : > { %628 = vst [vmem:[#allocation2 + $0x3c] sm:$0x1] %v627_v62  ;;  %v1663_v57 = vpack.c.b16 %v1657_v25, %v1656_v51  ;;  %v2858_v30 = vld [vmem:[#allocation2 + $0xfc] sm:$0xf0]  ;;  %v1599_v26 = vrot.slane %v1597_v22, 4  ;;  %v1602_v33 = vrot.slane %v1600_v47, 5  ;;  %v989_v61 = vadd.f32 %v3693_v36, %v981_v41 }
  0x87   : > { %909 = vst [vmem:[#allocation2 + $0xb4] sm:$0x1] %v908_v29  ;;  %v2728_v8 = vor.u32 %v2858_v30, %v2727_v38  ;;  %v1613_v10 = vrot.slane %v1611_v19, 4  ;;  %v1616_v20 = vrot.slane %v1614_v24, 5  ;;  %v791_v15 = vmax.f32 %v783_v13, 0.0 }
  0x88   : > { %v913_v32 = vld [vmem:[#allocation2 + $0xbc] sm:$0x1]  ;;  %v798_v23 = vpack.c.bf16 %v790_v53, %v790_v53  ;;  %v996_v1 = vmax.f32 %v988_v6, 0.0  ;;  %v997_v21 = vmax.f32 %v989_v61, 0.0  ;;  %v1274_v63 = vrot.slane %v1273_v7, 4 }
  0x89   : > { %2693 = vmatmul.msk.bf16.gmra.mxu2 %vm1053_vm2, %v1306_v28  ;;  %2735 = vmatmul.msk.bf16.gmra.mxu0 %vm1053_vm2, %v2728_v8  ;;  %v914_v27 = vsel %vm3191_vm7, %v847_v31, %v913_v32  ;;  %v799_v43 = vpack.c.bf16 %v791_v15, %v791_v15  ;;  %v1603_v42 = vor.u32 %v1602_v33, %v1599_v26  ;;  %v1288_v16 = vrot.slane %v1287_v11, 4  ;;  %v922_v55 = vld [vmem:[#allocation2 + $0xc8] sm:$0xf]  ;;  %v752_v40 = vld [vmem:[#allocation2 + $0xcc] sm:$0x1] }
  0x8a   : > { %915 = vst [vmem:[#allocation2 + $0xbc] sm:$0x1] %v914_v27  ;;  %v849_v3 = vshrl.u32 %v798_v23, 16  ;;  %v1004_v34 = vpack.c.bf16 %v996_v1, %v996_v1  ;;  %v1005_v60 = vpack.c.bf16 %v997_v21, %v997_v21  ;;  %2739 = vmatmul.msk.bf16.gmra.mxu1 %vm1053_vm2, %v1663_v57  ;;  %v1617_v37 = vor.u32 %v1616_v20, %v1613_v10  ;;  %v1882_v58 = vld [vmem:[#allocation2 + $0x8] sm:$0xf] }
  0x8b   : > { %v852_v13 = vshll.u32 %v798_v23, 16  ;;  %v857_v7 = vshrl.u32 %v799_v43, 16  ;;  %v860_v31 = vshll.u32 %v799_v43, 16  ;;  %v1604_v59 = vrot.slane %v1603_v42, 4  ;;  %v1883_v25 = vld [vmem:[#allocation2 + $0xc] sm:$0x1] }
  0x8c   : > { %v1176_v4 = vld [vmem:[#allocation2 + $0x34] sm:$0x1]  ;;  %v851_v18 = vrot.slane %v849_v3, 7  ;;  %1012 = vst.msk [vmem:[#allocation2 + $0x108] sm:$0xf] %vm416_vm1, %v1004_v34  ;;  %v1618_v44 = vrot.slane %v1617_v37, 4 }
  0x8d   : > { %v1178_v12 = vld [vmem:[#allocation2 + $0x3c] sm:$0x1]  ;;  %v1276_v35 = vshll.u32 %v1176_v4, 16  ;;  %v3758_v9 = vrot.slane %v857_v7, 7  ;;  %1013 = vst.msk [vmem:[#allocation2 + $0x110] sm:$0xf] %vm416_vm1, %v1005_v60 }
  0x8e   : > { %v1290_v46 = vshll.u32 %v1178_v12, 16  ;;  %v1533_v48 = vld [vmem:[#allocation2 + $0xb4] sm:$0x1]  ;;  %v854_v56 = vor.u32 %v852_v13, %v851_v18  ;;  %v749_v38 = vsel %vm3191_vm7, 0, %v748_v54  ;;  %v855_v47 = vrot.slane %v851_v18, 4 }
  0x8f   : > { %v1278_v39 = vrot.slane %v1276_v35, 5  ;;  %v1606_v50 = vshll.u32 %v1533_v48, 16  ;;  %v862_v51 = vor.u32 %v860_v31, %v3758_v9  ;;  %750 = vst [vmem:[#allocation2 + $0xc4] sm:$0x1] %v749_v38  ;;  %v753_v19 = vsel %vm3191_vm7, 0, %v752_v40 }
  0x90   : > { %v1292_v52 = vrot.slane %v1290_v46, 5  ;;  %v917_v28 = vsel %vm3136_vm4, %v854_v56, %v916_v49  ;;  %v1884_v57 = vld [vmem:[#allocation2 + $0x10] sm:$0xf]  ;;  %v1899_v30 = vshrl.u32 %v1882_v58, 16  ;;  %754 = vst [vmem:[#allocation2 + $0xcc] sm:$0x1] %v753_v19 }
  0x91   : > { %v1279_v6 = vsel %vm3392_vm10, %v1274_v63, %v1278_v39  ;;  %v1608_v41 = vrot.slane %v1606_v50, 5  ;;  %v1535_v22 = vld [vmem:[#allocation2 + $0xbc] sm:$0x1]  ;;  %918 = vst [vmem:[#allocation2 + $0xc0] sm:$0xf] %v917_v28  ;;  %v923_v29 = vsel %vm3136_vm4, %v862_v51, %v922_v55  ;;  %v1902_v11 = vshll.u32 %v1882_v58, 16 }
  0x92   : > { %v1293_v62 = vsel %vm3392_vm10, %v1288_v16, %v1292_v52  ;;  %v1302_v17 = vunpack.c.l.b16 %v1279_v6  ;;  %v1620_v53 = vshll.u32 %v1535_v22, 16  ;;  %924 = vst [vmem:[#allocation2 + $0xc8] sm:$0xf] %v923_v29  ;;  %v1885_v8 = vld [vmem:[#allocation2 + $0x14] sm:$0x1]  ;;  %v1901_v15 = vrot.slane %v1899_v30, 4 }
  0x93   : > { %v1303_v45 = vunpack.c.l.b16 %v1293_v62  ;;  %v1609_v24 = vsel %vm3392_vm10, %v1604_v59, %v1608_v41  ;;  %v2731_v61 = vld [vmem:[#allocation2 + $0x108] sm:$0xf]  ;;  %v1908_v32 = vshll.u32 %v1883_v25, 16  ;;  %v1913_v1 = vshrl.u32 %v1884_v57, 16  ;;  %v1886_v54 = vld [vmem:[#allocation2 + $0x18] sm:$0xf] }
  0x94   : > { %v1658_v33 = vunpack.c.l.b16 %v1609_v24  ;;  %v1622_v10 = vrot.slane %v1620_v53, 5  ;;  %v2859_v20 = vld [vmem:[#allocation2 + $0x10c] sm:$0xf0]  ;;  %v1916_v21 = vshll.u32 %v1884_v57, 16  ;;  %v1922_v63 = vshll.u32 %v1885_v8, 16 }
  0x95   : > { %v1307_v26 = vpack.c.b16 %v1303_v45, %v1302_v17  ;;  %v2732_v23 = vor.u32 %v2859_v20, %v2731_v61  ;;  %v863_v43 = vrot.slane %v3758_v9, 4  ;;  %v1904_v4 = vrot.slane %v1902_v11, 5  ;;  %v1888_v41 = vld [vmem:[#allocation2 + $0x20] sm:$0xf]  ;;  %v2745_v25 = vld [vmem:[#allocation2 + $0x8] sm:$0xf] }
  0x96   : > { %v1623_v27 = vsel %vm3392_vm10, %v1618_v44, %v1622_v10  ;;  %v919_v3 = vld [vmem:[#allocation2 + $0xc4] sm:$0x1]  ;;  %v1915_v34 = vrot.slane %v1913_v1, 4  ;;  %v1918_v60 = vrot.slane %v1916_v21, 5  ;;  %v1910_v7 = vrot.slane %v1908_v32, 5 }
  0x97   : > { %v1659_v42 = vunpack.c.l.b16 %v1623_v27  ;;  %v920_v35 = vsel %vm3191_vm7, %v855_v47, %v919_v3  ;;  %v1905_v13 = vor.u32 %v1904_v4, %v1901_v15  ;;  %v1924_v49 = vrot.slane %v1922_v63, 5  ;;  %v925_v39 = vld [vmem:[#allocation2 + $0xcc] sm:$0x1]  ;;  %v2860_v22 = vld [vmem:[#allocation2 + $0xc] sm:$0xf0]  ;;  %v2624_v61 = vld [vmem:[%s3018_s18 + $0x81] sm:$0xff] }
  0x98   : > { %v2710_v12 = vld [vmem:[#allocation2 + $0xc0] sm:$0xf]  ;;  %921 = vst [vmem:[#allocation2 + $0xc4] sm:$0x1] %v920_v35  ;;  %v1919_v31 = vor.u32 %v1918_v60, %v1915_v34  ;;  %v926_v59 = vsel %vm3191_vm7, %v863_v43, %v925_v39  ;;  %v1927_v38 = vshrl.u32 %v1886_v54, 16  ;;  %v1930_v28 = vshll.u32 %v1886_v54, 16 }
  0x99   : > { %v1536_v37 = vld [vmem:[#allocation2 + $0xc0] sm:$0xf]  ;;  %2694 = vmatmul.msk.bf16.gmra.mxu2 %vm1053_vm2, %v1307_v26  ;;  %v1664_v16 = vpack.c.b16 %v1659_v42, %v1658_v33  ;;  %v2855_v46 = vld [vmem:[#allocation2 + $0xc4] sm:$0xf0]  ;;  %2736 = vmatmul.msk.bf16.gmra.mxu0 %vm1053_vm2, %v2732_v23  ;;  %v1906_v56 = vrot.slane %v1905_v13, 4  ;;  %v1941_v26 = vshrl.u32 %v1888_v41, 16  ;;  %v2746_v32 = vor.u32 %v2860_v22, %v2745_v25 }
  0x9a   : > { %v1538_v18 = vld [vmem:[#allocation2 + $0xc8] sm:$0xf]  ;;  %v2711_v55 = vor.u32 %v2855_v46, %v2710_v12  ;;  %v1625_v48 = vshrl.u32 %v1536_v37, 16  ;;  %v1628_v9 = vshll.u32 %v1536_v37, 16  ;;  %v1920_v40 = vrot.slane %v1919_v31, 4 }
  0x9b   : > { %v1639_v52 = vshrl.u32 %v1538_v18, 16  ;;  %2740 = vmatmul.msk.bf16.gmra.mxu1 %vm1053_vm2, %v1664_v16  ;;  %v1642_v50 = vshll.u32 %v1538_v18, 16  ;;  %927 = vst [vmem:[#allocation2 + $0xcc] sm:$0x1] %v926_v59  ;;  %v1911_v62 = vsel %vm3392_vm10, %v1906_v56, %v1910_v7  ;;  %v1887_v19 = vld [vmem:[#allocation2 + $0x1c] sm:$0x1]  ;;  %v475_v63 = vmul.f32 %v3680_v0, %v2624_v61 }
  0x9c   : > { %2715 = vmatmul.msk.bf16.gmra.mxu3 %vm1053_vm2, %v2711_v55  ;;  %v1627_v6 = vrot.slane %v1625_v48, 4  ;;  %v1630_v44 = vrot.slane %v1628_v9, 5  ;;  %v1925_v17 = vsel %vm3392_vm10, %v1920_v40, %v1924_v49  ;;  %v2012_v47 = vunpack.c.l.b16 %v1911_v62  ;;  %v1889_v20 = vld [vmem:[#allocation2 + $0x24] sm:$0x1]  ;;  %v2766_v4 = vld [vmem:[#allocation2 + $0x50] sm:$0xf] }
  0x9d   : > { %v1641_v51 = vrot.slane %v1639_v52, 4  ;;  %v1644_v58 = vrot.slane %v1642_v50, 5  ;;  %v2013_v29 = vunpack.c.l.b16 %v1925_v17  ;;  %v1929_v24 = vrot.slane %v1927_v38, 4  ;;  %v2864_v42 = vld [vmem:[#allocation2 + $0x54] sm:$0xf0] }
  0x9e   : > { %v1631_v45 = vor.u32 %v1630_v44, %v1627_v6  ;;  %v1932_v30 = vrot.slane %v1930_v28, 5  ;;  %v1944_v33 = vshll.u32 %v1888_v41, 16  ;;  %v1943_v15 = vrot.slane %v1941_v26, 4  ;;  %v453_v16 = vld [vmem:[#allocation2 + $0x44] sm:$0x1] }
  0x9f   : > { %v1537_v53 = vld [vmem:[#allocation2 + $0xc4] sm:$0x1]  ;;  %v1645_v57 = vor.u32 %v1644_v58, %v1641_v51  ;;  %v1936_v21 = vshll.u32 %v1887_v19, 16  ;;  %v2020_v3 = vpack.c.b16 %v2013_v29, %v2012_v47  ;;  %v1950_v12 = vshll.u32 %v1889_v20, 16  ;;  %v1890_v52 = vld [vmem:[#allocation2 + $0x28] sm:$0xf] }
  0xa0   : > { %v1632_v8 = vrot.slane %v1631_v45, 4  ;;  %v1634_v10 = vshll.u32 %v1537_v53, 16  ;;  %v1946_v11 = vrot.slane %v1944_v33, 5  ;;  %v1933_v34 = vor.u32 %v1932_v30, %v1929_v24  ;;  %v1892_v59 = vld [vmem:[#allocation2 + $0x30] sm:$0xf] }
  0xa1   : > { %v1646_v27 = vrot.slane %v1645_v57, 4  ;;  %v486_v35 = vadd.f32 %v3693_v36, %v475_v63  ;;  %v2767_v7 = vor.u32 %v2864_v42, %v2766_v4  ;;  %v1938_v49 = vrot.slane %v1936_v21, 5  ;;  %v2749_v41 = vld [vmem:[#allocation2 + $0x18] sm:$0xf]  ;;  %v2861_v28 = vld [vmem:[#allocation2 + $0x1c] sm:$0xf0] }
  0xa2   : > { %v1539_v23 = vld [vmem:[#allocation2 + $0xcc] sm:$0x1]  ;;  %v1636_v1 = vrot.slane %v1634_v10, 5  ;;  %v1947_v54 = vor.u32 %v1946_v11, %v1943_v15  ;;  %v1934_v18 = vrot.slane %v1933_v34, 4  ;;  %v454_v55 = vsel %vm3191_vm7, 0, %v453_v16  ;;  %v2632_v19 = vld [vmem:[%s3018_s18 + $0x110] sm:$0xff] }
  0xa3   : > { %v1648_v43 = vshll.u32 %v1539_v23, 16  ;;  %v494_v31 = vmax.f32 %v486_v35, 0.0  ;;  %v1952_v9 = vrot.slane %v1950_v12, 5  ;;  %455 = vst [vmem:[#allocation2 + $0x44] sm:$0x1] %v454_v55  ;;  %v1955_v40 = vshrl.u32 %v1890_v52, 16 }
  0xa4   : > { %v1637_v60 = vsel %vm3392_vm10, %v1632_v8, %v1636_v1  ;;  %v1948_v48 = vrot.slane %v1947_v54, 4  ;;  %v1939_v56 = vsel %vm3392_vm10, %v1934_v18, %v1938_v49  ;;  %v1958_v51 = vshll.u32 %v1890_v52, 16  ;;  %v1891_v22 = vld [vmem:[#allocation2 + $0x2c] sm:$0x1]  ;;  %v629_v30 = vld [vmem:[#allocation2 + $0x40] sm:$0xf] }
  0xa5   : > { %v1650_v37 = vrot.slane %v1648_v43, 5  ;;  %v1660_v13 = vunpack.c.l.b16 %v1637_v60  ;;  %v502_v6 = vpack.c.bf16 %v494_v31, %v494_v31  ;;  %v1969_v38 = vshrl.u32 %v1892_v59, 16  ;;  %v1893_v33 = vld [vmem:[#allocation2 + $0x34] sm:$0x1]  ;;  %v2770_v15 = vld [vmem:[#allocation2 + $0x60] sm:$0xf] }
  0xa6   : > { %v1953_v44 = vsel %vm3392_vm10, %v1948_v48, %v1952_v9  ;;  %v1972_v58 = vshll.u32 %v1892_v59, 16  ;;  %v2014_v25 = vunpack.c.l.b16 %v1939_v56  ;;  %v1957_v47 = vrot.slane %v1955_v40, 4  ;;  %v2823_v1 = vld [vmem:[#allocation2 + $0xd8] sm:$0xf]  ;;  %v2868_v43 = vld [vmem:[#allocation2 + $0xdc] sm:$0xf0] }
  0xa7   : > { %v1651_v46 = vsel %vm3392_vm10, %v1646_v27, %v1650_v37  ;;  %v560_v62 = vshrl.u32 %v502_v6, 16  ;;  %v563_v17 = vshll.u32 %v502_v6, 16  ;;  %v2015_v45 = vunpack.c.l.b16 %v1953_v44  ;;  %v1894_v37 = vld [vmem:[#allocation2 + $0x38] sm:$0xf]  ;;  %v2753_v9 = vld [vmem:[#allocation2 + $0x28] sm:$0xf] }
  0xa8   : > { %v1661_v39 = vunpack.c.l.b16 %v1651_v46  ;;  %v1960_v24 = vrot.slane %v1958_v51, 5  ;;  %v1971_v53 = vrot.slane %v1969_v38, 4  ;;  %v1974_v57 = vrot.slane %v1972_v58, 5  ;;  %v1089_v18 = vpop.f32.mrf.mxu2  ;;  %v1895_v38 = vld [vmem:[#allocation2 + $0x3c] sm:$0x1]  ;;  %s2875_s18 = smul.u32 80, %s4164_s27 }
  0xa9   : > { %2759 = vmatmul.msk.bf16.vlgmr.msra.gmra.mxu2 %vm1053_vm2, %v2746_v32  ;;  %2785 = vmatmul.msk.bf16.vlgmr.msra.gmra.mxu0 %vm1053_vm2, %v2020_v3  ;;  %v562_v29 = vrot.slane %v560_v62, 7  ;;  %v688_v26 = vmul.f32 %v3680_v0, %v2632_v19  ;;  %v2750_v20 = vor.u32 %v2861_v28, %v2749_v41  ;;  %v2865_v32 = vld [vmem:[#allocation2 + $0x64] sm:$0xf0]  ;;  %v2021_v23 = vpack.c.b16 %v2015_v45, %v2014_v25  ;;  %v2774_v28 = vld [vmem:[#allocation2 + $0x70] sm:$0xf] }
  0xaa   : > { %v1665_v50 = vpack.c.b16 %v1661_v39, %v1660_v13  ;;  %v632_v10 = vld [vmem:[#allocation2 + $0x44] sm:$0x1]  ;;  %v1964_v21 = vshll.u32 %v1891_v22, 16  ;;  %v1961_v0 = vor.u32 %v1960_v24, %v1957_v47  ;;  %v1975_v4 = vor.u32 %v1974_v57, %v1971_v53  ;;  %v2866_v25 = vld [vmem:[#allocation2 + $0x74] sm:$0xf0]  ;;  %s3881_s26 = scalar_lea.vmem %s4137_s5, %s2875_s18 }
  0xab   : > { %v565_v61 = vor.u32 %v563_v17, %v562_v29  ;;  %v566_v8 = vrot.slane %v562_v29, 4  ;;  %v696_v11 = vadd.f32 %v3693_v36, %v688_v26  ;;  %v1978_v42 = vshll.u32 %v1893_v33, 16  ;;  %v2827_v29 = vld [vmem:[#allocation2 + $0xe8] sm:$0xf]  ;;  %v2869_v19 = vld [vmem:[#allocation2 + $0xec] sm:$0xf0] }
  0xac   : > { %2780 = vmatmul.msk.bf16.vlgmr.msra.gmra.mxu3 %vm1053_vm2, %v2767_v7  ;;  %2741 = vmatmul.msk.bf16.gmra.mxu1 %vm1053_vm2, %v1665_v50  ;;  %v2771_v60 = vor.u32 %v2865_v32, %v2770_v15  ;;  %v2824_v36 = vor.u32 %v2868_v43, %v2823_v1  ;;  %v1962_v54 = vrot.slane %v1961_v0, 4  ;;  %v1966_v14 = vrot.slane %v1964_v21, 5  ;;  %v2862_v50 = vld [vmem:[#allocation2 + $0x2c] sm:$0xf0] }
  0xad   : > { %v630_v63 = vsel %vm3136_vm4, %v565_v61, %v629_v30  ;;  %v633_v27 = vsel %vm3191_vm7, %v566_v8, %v632_v10  ;;  %v704_v3 = vmax.f32 %v696_v11, 0.0  ;;  %v1976_v12 = vrot.slane %v1975_v4, 4  ;;  %v2757_v4 = vld [vmem:[#allocation2 + $0x38] sm:$0xf] }
  0xae   : > { %631 = vst [vmem:[#allocation2 + $0x40] sm:$0xf] %v630_v63  ;;  %v1980_v35 = vrot.slane %v1978_v42, 5  ;;  %v1967_v16 = vsel %vm3392_vm10, %v1962_v54, %v1966_v14  ;;  %v1983_v31 = vshrl.u32 %v1894_v37, 16  ;;  %v1986_v55 = vshll.u32 %v1894_v37, 16 }
  0xaf   : > { %634 = vst [vmem:[#allocation2 + $0x44] sm:$0x1] %v633_v27  ;;  %v712_v34 = vpack.c.bf16 %v704_v3, %v704_v3  ;;  %v2016_v52 = vunpack.c.l.b16 %v1967_v16  ;;  %v2754_v41 = vor.u32 %v2862_v50, %v2753_v9  ;;  %v1992_v53 = vshll.u32 %v1895_v38, 16  ;;  %v2778_v14 = vld [vmem:[#allocation2 + $0x80] sm:$0xf] }
  0xb0   : > { %v1981_v46 = vsel %vm3392_vm10, %v1976_v12, %v1980_v35  ;;  %v1985_v56 = vrot.slane %v1983_v31, 4  ;;  %v1988_v40 = vrot.slane %v1986_v55, 5  ;;  %v2775_v26 = vor.u32 %v2866_v25, %v2774_v28  ;;  %v1091_v33 = vpop.f32.mrf.mxu2 }
  0xb1   : > { %721 = vst.msk [vmem:[#allocation2 + $0x88] sm:$0xf] %vm416_vm1, %v712_v34  ;;  %v2017_v59 = vunpack.c.l.b16 %v1981_v46  ;;  %v2828_v61 = vor.u32 %v2869_v19, %v2827_v29  ;;  %v1994_v10 = vrot.slane %v1992_v53, 5 }
  0xb2   : > { %v1989_v24 = vor.u32 %v1988_v40, %v1985_v56 }
  0xb3   : > { %v2022_v45 = vpack.c.b16 %v2017_v59, %v2016_v52 }
  0xb4   : > { %v1990_v8 = vrot.slane %v1989_v24, 4 }
  0xb5   : > { %v1896_v7 = vld [vmem:[#allocation2 + $0x40] sm:$0xf] }
  0xb6   : > { %v1997_v39 = vshrl.u32 %v1896_v7, 16  ;;  %v2000_v48 = vshll.u32 %v1896_v7, 16  ;;  %v1897_v58 = vld [vmem:[#allocation2 + $0x44] sm:$0x1]  ;;  %v1995_v63 = vsel %vm3392_vm10, %v1990_v8, %v1994_v10  ;;  %v2863_v42 = vld [vmem:[#allocation2 + $0x3c] sm:$0xf0] }
  0xb7   : > { %v2006_v30 = vshll.u32 %v1897_v58, 16  ;;  %v2018_v43 = vunpack.c.l.b16 %v1995_v63  ;;  %v2758_v54 = vor.u32 %v2863_v42, %v2757_v4  ;;  %v2870_v7 = vld [vmem:[#allocation2 + $0xfc] sm:$0xf0] }
  0xb8   : > { %v1079_v5 = vpop.f32.mrf.mxu0  ;;  %v1999_v6 = vrot.slane %v1997_v39, 4  ;;  %v2002_v44 = vrot.slane %v2000_v48, 5  ;;  %v2867_v12 = vld [vmem:[#allocation2 + $0x84] sm:$0xf0]  ;;  %v2871_v48 = vld [vmem:[#allocation2 + $0x10c] sm:$0xf0] }
  0xb9   : > { %2760 = vmatmul.msk.bf16.gmra.mxu2 %vm1053_vm2, %v2750_v20  ;;  %2786 = vmatmul.msk.bf16.gmra.mxu0 %vm1053_vm2, %v2021_v23  ;;  %v1143_v13 = vpop.f32.mrf.mxu1  ;;  %v2008_v15 = vrot.slane %v2006_v30, 5  ;;  %v2779_v2 = vor.u32 %v2867_v12, %v2778_v14  ;;  %v2835_v39 = vld [vmem:[#allocation2 + $0x108] sm:$0xf]  ;;  %v4154_v30 = vmov 0  }
  0xba   : > { %v3820_v49 = vadd.f32 %v1143_v13, %v1079_v5  ;;  %v2003_v57 = vor.u32 %v2002_v44, %v1999_v6  ;;  %v2831_v13 = vld [vmem:[#allocation2 + $0xf8] sm:$0xf]  ;;  %v2836_v59 = vor.u32 %v2871_v48, %v2835_v39  ;;  %2132 = vst.msk [vmem:[%s3881_s26 + $0x4] sm:$0x1] %vm2098_vm11, %v4154_v30 }
  0xbb   : > { %v2832_v16 = vor.u32 %v2870_v7, %v2831_v13  ;;  %2134 = vst.msk [vmem:[%s3881_s26 + $0xc] sm:$0x1] %vm2098_vm11, %v4154_v30 }
  0xbc   : > { %2781 = vmatmul.msk.bf16.gmra.mxu3 %vm1053_vm2, %v2771_v60  ;;  %2837 = vmatmul.msk.bf16.vlgmr.msra.gmra.mxu1 %vm1053_vm2, %v2824_v36  ;;  %v2004_v20 = vrot.slane %v2003_v57, 4  ;;  %2133 = vst.msk [vmem:[%s3881_s26 + $0x8] sm:$0xf] %vm2130_vm12, %v4154_v30 }
  0xbd   : > { %2150 = vst.msk [vmem:[%s3881_s26 + $0x4c] sm:$0x1] %vm2098_vm11, %v4154_v30 }
  0xbe   : > { %v2009_v27 = vsel %vm3392_vm10, %v2004_v20, %v2008_v15  ;;  %2131 = vst.msk [vmem:[%s3881_s26] sm:$0xf] %vm2130_vm12, %v4154_v30 }
  0xbf   : > { %v2019_v0 = vunpack.c.l.b16 %v2009_v27  ;;  %2135 = vst.msk [vmem:[%s3881_s26 + $0x10] sm:$0xf] %vm2130_vm12, %v4154_v30 }
  0xc0   : > { %v1081_v51 = vpop.f32.mrf.mxu0  ;;  %2136 = vst.msk [vmem:[%s3881_s26 + $0x14] sm:$0x1] %vm2098_vm11, %v4154_v30 }
  0xc1   : > { %v1153_v62 = vpop.f32.mrf.mxu3  ;;  %v1145_v17 = vpop.f32.mrf.mxu1  ;;  %v2023_v35 = vpack.c.b16 %v2019_v0, %v2018_v43  ;;  %2137 = vst.msk [vmem:[%s3881_s26 + $0x18] sm:$0xf] %vm2130_vm12, %v4154_v30 }
  0xc2   : > { %v3826_v22 = vadd.f32 %v1153_v62, %v1089_v18  ;;  %v3828_v47 = vadd.f32 %v1145_v17, %v1081_v51  ;;  %2138 = vst.msk [vmem:[%s3881_s26 + $0x1c] sm:$0x1] %vm2098_vm11, %v4154_v30 }
  0xc3   : > { %v1094_v3 = vpop.f32.mrf.mxu2  ;;  %2139 = vst.msk [vmem:[%s3881_s26 + $0x20] sm:$0xf] %vm2130_vm12, %v4154_v30 }
  0xc4   : > { %2140 = vst.msk [vmem:[%s3881_s26 + $0x24] sm:$0x1] %vm2098_vm11, %v4154_v30 }
  0xc5   : > { %2141 = vst.msk [vmem:[%s3881_s26 + $0x28] sm:$0xf] %vm2130_vm12, %v4154_v30 }
  0xc6   : > { %2142 = vst.msk [vmem:[%s3881_s26 + $0x2c] sm:$0x1] %vm2098_vm11, %v4154_v30 }
  0xc7   : > { %2143 = vst.msk [vmem:[%s3881_s26 + $0x30] sm:$0xf] %vm2130_vm12, %v4154_v30 }
  0xc8   : > { %v1084_v11 = vpop.f32.mrf.mxu0  ;;  %2144 = vst.msk [vmem:[%s3881_s26 + $0x34] sm:$0x1] %vm2098_vm11, %v4154_v30 }
  0xc9   : > { %2761 = vmatmul.msk.bf16.gmra.mxu2 %vm1053_vm2, %v2754_v41  ;;  %2787 = vmatmul.msk.bf16.gmra.mxu0 %vm1053_vm2, %v2022_v45  ;;  %v1155_v32 = vpop.f32.mrf.mxu3  ;;  %v1148_v23 = vpop.f32.mrf.mxu1  ;;  %2145 = vst.msk [vmem:[%s3881_s26 + $0x38] sm:$0xf] %vm2130_vm12, %v4154_v30 }
  0xca   : > { %v3834_v1 = vadd.f32 %v1155_v32, %v1091_v33  ;;  %v3836_v21 = vadd.f32 %v1148_v23, %v1084_v11  ;;  %2146 = vst.msk [vmem:[%s3881_s26 + $0x3c] sm:$0x1] %vm2098_vm11, %v4154_v30 }
  0xcb   : > { %v1096_v46 = vpop.f32.mrf.mxu2  ;;  %2147 = vst.msk [vmem:[%s3881_s26 + $0x40] sm:$0xf] %vm2130_vm12, %v4154_v30 }
  0xcc   : > { %2782 = vmatmul.msk.bf16.gmra.mxu3 %vm1053_vm2, %v2775_v26  ;;  %2838 = vmatmul.msk.bf16.gmra.mxu1 %vm1053_vm2, %v2828_v61  ;;  %2148 = vst.msk [vmem:[%s3881_s26 + $0x44] sm:$0x1] %vm2098_vm11, %v4154_v30 }
  0xcd   : > { %2149 = vst.msk [vmem:[%s3881_s26 + $0x48] sm:$0xf] %vm2130_vm12, %v4154_v30 }
  0xd0   : > { %v1086_v34 = vpop.f32.mrf.mxu0 }
  0xd1   : > { %v1158_v60 = vpop.f32.mrf.mxu3  ;;  %v1150_v36 = vpop.f32.mrf.mxu1 }
  0xd2   : > { %v3842_v5 = vadd.f32 %v1158_v60, %v1094_v3  ;;  %v3844_v37 = vadd.f32 %v1150_v36, %v1086_v34 }
  0xd9   : > { %2762 = vmatmul.msk.bf16.gmra.mxu2 %vm1053_vm2, %v2758_v54  ;;  %2788 = vmatmul.msk.bf16.gmra.mxu0 %vm1053_vm2, %v2023_v35  ;;  %v1160_v18 = vpop.f32.mrf.mxu3 }
  0xda   : > { %v3850_v31 = vadd.f32 %v1160_v18, %v1096_v46 }
  0xdc   : > { %2783 = vmatmul.msk.bf16.gmra.mxu3 %vm1053_vm2, %v2779_v2  ;;  %2839 = vmatmul.msk.bf16.gmra.mxu1 %vm1053_vm2, %v2832_v16  ;;  %v1332_v9 = vpop.f32.mrf.mxu2 }
  0xdd   : > { %v1352_v15 = vadd.f32 %v1332_v9, %v3820_v49 }
  0xe2   : > { %v1496_v55 = vpop.f32.mrf.mxu0 }
  0xe4   : > { %v1334_v40 = vpop.f32.mrf.mxu2 }
  0xe5   : > { %v1353_v27 = vadd.f32 %v1334_v40, %v3828_v47  ;;  %v2791_v40 = vld [vmem:[%s3881_s26 + $0xc] sm:$0x1] }
  0xe6   : > { %v1414_v52 = vpop.f32.mrf.mxu3 }
  0xe7   : > { %v1434_v11 = vadd.f32 %v1414_v52, %v1352_v15 }
  0xe9   : > { %v1516_v63 = vadd.f32 %v1496_v55, %v1434_v11 }
  0xea   : > { %v3852_v50 = vpop.f32.mrf.mxu0 }
  0xec   : > { %2840 = vmatmul.msk.bf16.gmra.mxu1 %vm1053_vm2, %v2836_v59 }
  0xee   : > { %v1416_v56 = vpop.f32.mrf.mxu3 }
  0xef   : > { %v1435_v4 = vadd.f32 %v1416_v56, %v1353_v27 }
  0xf1   : > { %v1517_v36 = vadd.f32 %v3852_v50, %v1435_v4  ;;  %v2789_v50 = vld [vmem:[%s3881_s26 + $0x8] sm:$0xf] }
  0xf2   : > { %v3855_v6 = vpop.f32.mrf.mxu0 }
  0xf6   : > { %v3857_v51 = vpop.f32.mrf.mxu3 }
  0xf7   : > { %v1690_v44 = vpop.f32.mrf.mxu1 }
  0xf8   : > { %v1710_v0 = vadd.f32 %v1690_v44, %v1516_v63 }
  0xfa   : > { %v3859_v58 = vpop.f32.mrf.mxu0 }
  0xfc   : > { %v1337_v38 = vpop.f32.mrf.mxu2 }
  0xfd   : > { %v1354_v14 = vadd.f32 %v1337_v38, %v3836_v21 }
  0xfe   : > { %v3861_v17 = vpop.f32.mrf.mxu3 }
  0xff   : > { %v1692_v62 = vpop.f32.mrf.mxu1  ;;  %v1436_v13 = vadd.f32 %v3857_v51, %v1354_v14 }
 0x100   : > { %v1711_v47 = vadd.f32 %v1692_v62, %v1517_v36 }
 0x101   : > { %v1518_v18 = vadd.f32 %v3855_v6, %v1436_v13 }
 0x104   : > { %v3863_v41 = vpop.f32.mrf.mxu2 }
 0x105   : > { %v1355_v59 = vadd.f32 %v3863_v41, %v3844_v37 }
 0x106   : > { %v3865_v28 = vpop.f32.mrf.mxu0  ;;  %v3869_v45 = vpop.f32.mrf.mxu3 }
 0x107   : > { %v3867_v25 = vpop.f32.mrf.mxu1  ;;  %v1437_v37 = vadd.f32 %v3861_v17, %v1355_v59 }
 0x108   : > { %v1712_v30 = vadd.f32 %v3867_v25, %v1518_v18 }
 0x10c   : > { %v3871_v29 = vpop.f32.mrf.mxu2 }
 0x10e   : > { %v3873_v19 = vpop.f32.mrf.mxu0  ;;  %v3885_v57 = vpop.f32.mrf.mxu3 }
 0x10f   : > { %v3876_v24 = vpop.f32.mrf.mxu1 }
 0x114   : > { %v3883_v53 = vpop.f32.mrf.mxu2 }
 0x116   : > { %v3890_v26 = vpop.f32.mrf.mxu0 }
 0x118   : > { %v3898_v33 = vpop.f32.mrf.mxu1 }
 0x11c   : > { %v3912_v61 = vpop.f32.mrf.mxu2 }
 0x11e   : > { %v3920_v8 = vpop.f32.mrf.mxu0 }
 0x11f   : > { %v3925_v10 = vpop.f32.mrf.mxu3 }
 0x120   : > { %v3930_v20 = vpop.f32.mrf.mxu1 }
 0x124   : > { %v3945_v32 = vpop.f32.mrf.mxu2 }
 0x126   : > { %v2048_v23 = vpop.f32.mrf.mxu0 }
 0x127   : > { %v3956_v49 = vpop.f32.mrf.mxu3 }
 0x129   : > { %v3965_v43 = vpop.f32.mrf.mxu1 }
 0x12c   : > { %v1772_v42 = vpop.f32.mrf.mxu2 }
 0x12d   : > { %v1792_v3 = vadd.f32 %v1772_v42, %v1710_v0 }
 0x12e   : > { %v2050_v34 = vpop.f32.mrf.mxu0 }
 0x12f   : > { %v1854_v60 = vpop.f32.mrf.mxu3 }
 0x130   : > { %v1874_v54 = vadd.f32 %v1854_v60, %v1792_v3 }
 0x131   : > { %v3969_v12 = vpop.f32.mrf.mxu1 }
 0x132   : > { %v2068_v35 = vadd.f32 %v2048_v23, %v1874_v54  ;;  %v1519_v54 = vadd.f32 %v3859_v58, %v1437_v37 }
 0x134   : > { %v2151_v7 = vpack.c.bf16 %v2068_v35, %v2068_v35  ;;  %v1774_v2 = vpop.f32.mrf.mxu2  ;;  %v2100_v6 = vmul.f32 %v2068_v35, %v2068_v35  ;;  %v2077_v41 = vsel %vm2076_vm13, %v2068_v35, 0.0  ;;  %v1356_v35 = vadd.f32 %v3871_v29, %v3826_v22 }
 0x135   : > { %v1793_v46 = vadd.f32 %v1774_v2, %v1711_v47  ;;  %v2793_v2 = vld [vmem:[%s3881_s26 + $0x10] sm:$0xf]  ;;  %v1713_v58 = vadd.f32 %v3876_v24, %v1519_v54 }
 0x136   : > { %v2160_v16 = vshrl.u32 %v2151_v7, 16  ;;  %v2053_v39 = vpop.f32.mrf.mxu0  ;;  %v2163_v21 = vshll.u32 %v2151_v7, 16  ;;  %v2108_v4 = vsel %vm2076_vm13, %v2100_v6, 0.0 }
 0x137   : > { %v1856_v55 = vpop.f32.mrf.mxu3 }
 0x138   : > { %v2162_v48 = vrot.slane %v2160_v16, 7  ;;  %v1875_v52 = vadd.f32 %v1856_v55, %v1793_v46  ;;  %v2795_v16 = vld [vmem:[%s3881_s26 + $0x14] sm:$0x1]  ;;  %v1438_v55 = vadd.f32 %v3869_v45, %v1356_v35 }
 0x139   : > { %v2345_v62 = vpop.f32.mrf.mxu1 }
 0x13a   : > { %v2165_v44 = vor.u32 %v2163_v21, %v2162_v48  ;;  %v2166_v51 = vrot.slane %v2162_v48, 4  ;;  %v2069_v38 = vadd.f32 %v2050_v34, %v1875_v52  ;;  %v2365_v15 = vpack.c.bf16 %v2345_v62, %v2345_v62 }
 0x13c   : > { %v2243_v11 = vsel %vm3975_vm14, %v2165_v44, %v2789_v50  ;;  %v2248_v23 = vsel %vm3984_vm15, %v2166_v51, %v2791_v40  ;;  %v2078_v63 = vsel %vm2076_vm13, %v2069_v38, 0.0  ;;  %v2101_v27 = vmul.f32 %v2069_v38, %v2069_v38  ;;  %v1777_v0 = vpop.f32.mrf.mxu2  ;;  %2373 = vst.msk [vmem:[%s4001_s12] sm:$0xf] %vm2130_vm12, %v2365_v15 }
 0x13d   : > { %2790 = vst [vmem:[%s3881_s26 + $0x8] sm:$0xf] %v2243_v11  ;;  %v2079_v17 = vadd.f32 %v2078_v63, %v2077_v41  ;;  %v2152_v25 = vpack.c.bf16 %v2069_v38, %v2069_v38  ;;  %v1794_v3 = vadd.f32 %v1777_v0, %v1712_v30  ;;  %v1520_v51 = vadd.f32 %v3865_v28, %v1438_v55  ;;  %v2797_v11 = vld [vmem:[%s3881_s26 + $0x18] sm:$0xf]  ;;  %v2803_v55 = vld [vmem:[%s3881_s26 + $0x24] sm:$0x1] }
 0x13e   : > { %2792 = vst [vmem:[%s3881_s26 + $0xc] sm:$0x1] %v2248_v23  ;;  %v2109_v42 = vsel %vm2076_vm13, %v2101_v27, 0.0  ;;  %v2055_v7 = vpop.f32.mrf.mxu0  ;;  %v1357_v15 = vadd.f32 %v3883_v53, %v3834_v1  ;;  %v2799_v23 = vld [vmem:[%s3881_s26 + $0x1c] sm:$0x1] }
 0x13f   : > { %v2110_v34 = vadd.f32 %v2109_v42, %v2108_v4  ;;  %v2168_v60 = vshrl.u32 %v2152_v25, 16  ;;  %v1859_v36 = vpop.f32.mrf.mxu3  ;;  %v2171_v47 = vshll.u32 %v2152_v25, 16  ;;  %v1714_v25 = vadd.f32 %v3898_v33, %v1520_v51 }
 0x140   : > { %v1876_v14 = vadd.f32 %v1859_v36, %v1794_v3  ;;  %v1439_v28 = vadd.f32 %v3885_v57, %v1357_v15  ;;  %v2805_v15 = vld [vmem:[%s3881_s26 + $0x28] sm:$0xf] }
 0x141   : > { %v2170_v13 = vrot.slane %v2168_v60, 7  ;;  %v2347_v18 = vpop.f32.mrf.mxu1 }
 0x142   : > { %v2070_v46 = vadd.f32 %v2053_v39, %v1876_v14  ;;  %v2366_v52 = vpack.c.bf16 %v2347_v18, %v2347_v18  ;;  %v2801_v18 = vld [vmem:[%s3881_s26 + $0x20] sm:$0xf] }
 0x143   : > { %v2173_v48 = vor.u32 %v2171_v47, %v2170_v13  ;;  %v2174_v21 = vrot.slane %v2170_v13, 4  ;;  %v1521_v47 = vadd.f32 %v3873_v19, %v1439_v28 }
 0x144   : > { %v2080_v59 = vsel %vm2076_vm13, %v2070_v46, 0.0  ;;  %v2102_v22 = vmul.f32 %v2070_v46, %v2070_v46  ;;  %v2153_v29 = vpack.c.bf16 %v2070_v46, %v2070_v46  ;;  %v1779_v50 = vpop.f32.mrf.mxu2  ;;  %2374 = vst.msk [vmem:[%s4001_s12 + $0x4] sm:$0xf] %vm2130_vm12, %v2366_v52 }
 0x145   : > { %v2251_v40 = vsel %vm3975_vm14, %v2173_v48, %v2793_v2  ;;  %v2254_v39 = vsel %vm3984_vm15, %v2174_v21, %v2795_v16  ;;  %v2081_v45 = vadd.f32 %v2080_v59, %v2079_v17  ;;  %v1795_v44 = vadd.f32 %v1779_v50, %v1713_v58 }
 0x146   : > { %2794 = vst [vmem:[%s3881_s26 + $0x10] sm:$0xf] %v2251_v40  ;;  %v2111_v6 = vsel %vm2076_vm13, %v2102_v22, 0.0  ;;  %v2176_v24 = vshrl.u32 %v2153_v29, 16  ;;  %v2179_v37 = vshll.u32 %v2153_v29, 16  ;;  %v2058_v4 = vpop.f32.mrf.mxu0  ;;  %v1358_v2 = vadd.f32 %v3912_v61, %v3842_v5 }
 0x147   : > { %2796 = vst [vmem:[%s3881_s26 + $0x14] sm:$0x1] %v2254_v39  ;;  %v2112_v38 = vadd.f32 %v2111_v6, %v2110_v34  ;;  %v1861_v62 = vpop.f32.mrf.mxu3  ;;  %v1715_v19 = vadd.f32 %v3930_v20, %v1521_v47 }
 0x148   : > { %v2178_v30 = vrot.slane %v2176_v24, 7  ;;  %v1877_v41 = vadd.f32 %v1861_v62, %v1795_v44  ;;  %v1440_v52 = vadd.f32 %v3925_v10, %v1358_v2 }
 0x149   : > { %v2350_v17 = vpop.f32.mrf.mxu1 }
 0x14a   : > { %v2181_v63 = vor.u32 %v2179_v37, %v2178_v30  ;;  %v2182_v27 = vrot.slane %v2178_v30, 4  ;;  %v2071_v0 = vadd.f32 %v2055_v7, %v1877_v41  ;;  %v2367_v42 = vpack.c.bf16 %v2350_v17, %v2350_v17 }
 0x14b   : > { %v1522_v44 = vadd.f32 %v3890_v26, %v1440_v52  ;;  %v1359_v41 = vadd.f32 %v3945_v32, %v3850_v31 }
 0x14c   : > { %v2257_v3 = vsel %vm3975_vm14, %v2181_v63, %v2797_v11  ;;  %v2260_v1 = vsel %vm3984_vm15, %v2182_v27, %v2799_v23  ;;  %v2082_v53 = vsel %vm2076_vm13, %v2071_v0, 0.0  ;;  %v2103_v34 = vmul.f32 %v2071_v0, %v2071_v0  ;;  %v1782_v60 = vpop.f32.mrf.mxu2  ;;  %2375 = vst.msk [vmem:[%s4001_s12 + $0x8] sm:$0xf] %vm2130_vm12, %v2367_v42  ;;  %v2807_v11 = vld [vmem:[%s3881_s26 + $0x2c] sm:$0x1] }
 0x14d   : > { %2798 = vst [vmem:[%s3881_s26 + $0x18] sm:$0xf] %v2257_v3  ;;  %v2083_v36 = vadd.f32 %v2082_v53, %v2081_v45  ;;  %v2154_v33 = vpack.c.bf16 %v2071_v0, %v2071_v0  ;;  %v1796_v54 = vadd.f32 %v1782_v60, %v1714_v25  ;;  %v1716_v17 = vadd.f32 %v3965_v43, %v1522_v44 }
 0x14e   : > { %2800 = vst [vmem:[%s3881_s26 + $0x1c] sm:$0x1] %v2260_v1  ;;  %v2113_v57 = vsel %vm2076_vm13, %v2103_v34, 0.0  ;;  %v2060_v10 = vpop.f32.mrf.mxu0  ;;  %v1441_v26 = vadd.f32 %v3956_v49, %v1359_v41 }
 0x14f   : > { %v2114_v14 = vadd.f32 %v2113_v57, %v2112_v38  ;;  %v2184_v35 = vshrl.u32 %v2154_v33, 16  ;;  %v1864_v13 = vpop.f32.mrf.mxu3  ;;  %v2187_v46 = vshll.u32 %v2154_v33, 16 }
 0x150   : > { %v1878_v7 = vadd.f32 %v1864_v13, %v1796_v54  ;;  %v1523_v33 = vadd.f32 %v3920_v8, %v1441_v26  ;;  %v2811_v13 = vld [vmem:[%s3881_s26 + $0x34] sm:$0x1] }
 0x151   : > { %v2186_v16 = vrot.slane %v2184_v35, 7  ;;  %v2352_v21 = vpop.f32.mrf.mxu1  ;;  %v2809_v35 = vld [vmem:[%s3881_s26 + $0x30] sm:$0xf] }
 0x152   : > { %v2072_v48 = vadd.f32 %v2058_v4, %v1878_v7  ;;  %v2368_v22 = vpack.c.bf16 %v2352_v21, %v2352_v21 }
 0x153   : > { %v2189_v58 = vor.u32 %v2187_v46, %v2186_v16  ;;  %v2190_v59 = vrot.slane %v2186_v16, 4 }
 0x154   : > { %v2084_v29 = vsel %vm2076_vm13, %v2072_v48, 0.0  ;;  %v2104_v50 = vmul.f32 %v2072_v48, %v2072_v48  ;;  %v2155_v5 = vpack.c.bf16 %v2072_v48, %v2072_v48  ;;  %v1784_v61 = vpop.f32.mrf.mxu2  ;;  %2376 = vst.msk [vmem:[%s4001_s12 + $0xc] sm:$0xf] %vm2130_vm12, %v2368_v22 }
 0x155   : > { %v2263_v40 = vsel %vm3975_vm14, %v2189_v58, %v2801_v18  ;;  %v2266_v39 = vsel %vm3984_vm15, %v2190_v59, %v2803_v55  ;;  %v2085_v45 = vadd.f32 %v2084_v29, %v2083_v36  ;;  %v1797_v24 = vadd.f32 %v1784_v61, %v1715_v19 }
 0x156   : > { %2802 = vst [vmem:[%s3881_s26 + $0x20] sm:$0xf] %v2263_v40  ;;  %v2115_v20 = vsel %vm2076_vm13, %v2104_v50, 0.0  ;;  %v2192_v6 = vshrl.u32 %v2155_v5, 16  ;;  %v2195_v30 = vshll.u32 %v2155_v5, 16  ;;  %v2063_v60 = vpop.f32.mrf.mxu0  ;;  %v1717_v18 = vadd.f32 %v3969_v12, %v1523_v33 }
 0x157   : > { %2804 = vst [vmem:[%s3881_s26 + $0x24] sm:$0x1] %v2266_v39  ;;  %v2116_v51 = vadd.f32 %v2115_v20, %v2114_v14  ;;  %v1866_v38 = vpop.f32.mrf.mxu3  ;;  %v2813_v39 = vld [vmem:[%s3881_s26 + $0x38] sm:$0xf] }
 0x158   : > { %v2194_v62 = vrot.slane %v2192_v6, 7  ;;  %v1879_v37 = vadd.f32 %v1866_v38, %v1797_v24 }
 0x159   : > { %v2355_v0 = vpop.f32.mrf.mxu1 }
 0x15a   : > { %v2197_v23 = vor.u32 %v2195_v30, %v2194_v62  ;;  %v2198_v63 = vrot.slane %v2194_v62, 4  ;;  %v2073_v27 = vadd.f32 %v2060_v10, %v1879_v37  ;;  %v2369_v25 = vpack.c.bf16 %v2355_v0, %v2355_v0 }
 0x15c   : > { %v2269_v28 = vsel %vm3975_vm14, %v2197_v23, %v2805_v15  ;;  %v2272_v4 = vsel %vm3984_vm15, %v2198_v63, %v2807_v11  ;;  %v2086_v31 = vsel %vm2076_vm13, %v2073_v27, 0.0  ;;  %v2105_v32 = vmul.f32 %v2073_v27, %v2073_v27  ;;  %v1787_v42 = vpop.f32.mrf.mxu2  ;;  %2377 = vst.msk [vmem:[%s4001_s12 + $0x10] sm:$0xf] %vm2130_vm12, %v2369_v25 }
 0x15d   : > { %2806 = vst [vmem:[%s3881_s26 + $0x28] sm:$0xf] %v2269_v28  ;;  %v2087_v3 = vadd.f32 %v2086_v31, %v2085_v45  ;;  %v2156_v1 = vpack.c.bf16 %v2073_v27, %v2073_v27  ;;  %v1798_v43 = vadd.f32 %v1787_v42, %v1716_v17  ;;  %v2815_v45 = vld [vmem:[%s3881_s26 + $0x3c] sm:$0x1]  ;;  %v2817_v28 = vld [vmem:[%s3881_s26 + $0x40] sm:$0xf] }
 0x15e   : > { %2808 = vst [vmem:[%s3881_s26 + $0x2c] sm:$0x1] %v2272_v4  ;;  %v2117_v49 = vsel %vm2076_vm13, %v2105_v32, 0.0  ;;  %v2065_v10 = vpop.f32.mrf.mxu0  ;;  %v2819_v4 = vld [vmem:[%s3881_s26 + $0x44] sm:$0x1] }
 0x15f   : > { %v2118_v53 = vadd.f32 %v2117_v49, %v2116_v51  ;;  %v2200_v34 = vshrl.u32 %v2156_v1, 16  ;;  %v1869_v36 = vpop.f32.mrf.mxu3  ;;  %v2203_v14 = vshll.u32 %v2156_v1, 16 }
 0x160   : > { %v1880_v57 = vadd.f32 %v1869_v36, %v1798_v43 }
 0x161   : > { %v2202_v54 = vrot.slane %v2200_v34, 7  ;;  %v2357_v7 = vpop.f32.mrf.mxu1 }
 0x162   : > { %v2074_v47 = vadd.f32 %v2063_v60, %v1880_v57  ;;  %v2370_v46 = vpack.c.bf16 %v2357_v7, %v2357_v7 }
 0x163   : > { %v2205_v2 = vor.u32 %v2203_v14, %v2202_v54  ;;  %v2206_v16 = vrot.slane %v2202_v54, 4 }
 0x164   : > { %v2088_v55 = vsel %vm2076_vm13, %v2074_v47, 0.0  ;;  %v2106_v48 = vmul.f32 %v2074_v47, %v2074_v47  ;;  %v2157_v21 = vpack.c.bf16 %v2074_v47, %v2074_v47  ;;  %v1789_v8 = vpop.f32.mrf.mxu2  ;;  %2378 = vst.msk [vmem:[%s4001_s12 + $0x14] sm:$0xf] %vm2130_vm12, %v2370_v46 }
 0x165   : > { %v2275_v52 = vsel %vm3975_vm14, %v2205_v2, %v2809_v35  ;;  %v2278_v58 = vsel %vm3984_vm15, %v2206_v16, %v2811_v13  ;;  %v2089_v59 = vadd.f32 %v2088_v55, %v2087_v3  ;;  %v1799_v19 = vadd.f32 %v1789_v8, %v1717_v18 }
 0x166   : > { %2810 = vst [vmem:[%s3881_s26 + $0x30] sm:$0xf] %v2275_v52  ;;  %v2119_v22 = vsel %vm2076_vm13, %v2106_v48, 0.0  ;;  %v2208_v12 = vshrl.u32 %v2157_v21, 16  ;;  %v2211_v61 = vshll.u32 %v2157_v21, 16 }
 0x167   : > { %2812 = vst [vmem:[%s3881_s26 + $0x34] sm:$0x1] %v2278_v58  ;;  %v2120_v29 = vadd.f32 %v2119_v22, %v2118_v53  ;;  %v1871_v50 = vpop.f32.mrf.mxu3 }
 0x168   : > { %v2210_v5 = vrot.slane %v2208_v12, 7  ;;  %v1881_v40 = vadd.f32 %v1871_v50, %v1799_v19 }
 0x169   : > { %v2360_v44 = vpop.f32.mrf.mxu1 }
 0x16a   : > { %v2213_v20 = vor.u32 %v2211_v61, %v2210_v5  ;;  %v2214_v6 = vrot.slane %v2210_v5, 4  ;;  %v2075_v24 = vadd.f32 %v2065_v10, %v1881_v40  ;;  %v2371_v51 = vpack.c.bf16 %v2360_v44, %v2360_v44 }
 0x16c   : > { %v2281_v38 = vsel %vm3975_vm14, %v2213_v20, %v2813_v39  ;;  %v2284_v62 = vsel %vm3984_vm15, %v2214_v6, %v2815_v45  ;;  %v2090_v30 = vsel %vm2076_vm13, %v2075_v24, 0.0  ;;  %v2107_v37 = vmul.f32 %v2075_v24, %v2075_v24  ;;  %2379 = vst.msk [vmem:[%s4001_s12 + $0x18] sm:$0xf] %vm2130_vm12, %v2371_v51 }
 0x16d   : > { %2814 = vst [vmem:[%s3881_s26 + $0x38] sm:$0xf] %v2281_v38  ;;  %v2091_v41 = vadd.f32 %v2090_v30, %v2089_v59  ;;  %v2158_v15 = vpack.c.bf16 %v2075_v24, %v2075_v24 }
 0x16e   : > { %2816 = vst [vmem:[%s3881_s26 + $0x3c] sm:$0x1] %v2284_v62  ;;  %v2121_v11 = vsel %vm2076_vm13, %v2107_v37, 0.0 }
 0x16f   : > { %v2092_v23 = vrot.slane %v2091_v41, 4  ;;  %v2122_v63 = vadd.f32 %v2121_v11, %v2120_v29  ;;  %v2216_v27 = vshrl.u32 %v2158_v15, 16  ;;  %v2219_v25 = vshll.u32 %v2158_v15, 16 }
 0x171   : > { %v2093_v0 = vadd.f32 %v2092_v23, %v2091_v41  ;;  %v2123_v17 = vrot.slane %v2122_v63, 4  ;;  %v2218_v26 = vrot.slane %v2216_v27, 7  ;;  %v2362_v31 = vpop.f32.mrf.mxu1 }
 0x172   : > { %v2372_v49 = vpack.c.bf16 %v2362_v31, %v2362_v31 }
 0x173   : > { %v2094_v32 = vrot.slane %v2093_v0, 2  ;;  %v2124_v42 = vadd.f32 %v2123_v17, %v2122_v63  ;;  %v2221_v3 = vor.u32 %v2219_v25, %v2218_v26  ;;  %v2222_v1 = vrot.slane %v2218_v26, 4 }
 0x174   : > { %2380 = vst.msk [vmem:[%s4001_s12 + $0x1c] sm:$0xf] %vm2130_vm12, %v2372_v49 }
 0x175   : > { %v2095_v43 = vadd.f32 %v2094_v32, %v2093_v0  ;;  %v2125_v53 = vrot.slane %v2124_v42, 2  ;;  %v2287_v34 = vsel %vm3975_vm14, %v2221_v3, %v2817_v28  ;;  %v2290_v60 = vsel %vm3984_vm15, %v2222_v1, %v2819_v4 }
 0x176   : > { %2818 = vst [vmem:[%s3881_s26 + $0x40] sm:$0xf] %v2287_v34 }
 0x177   : > { %v2096_v36 = vrot.slane %v2095_v43, 1  ;;  %v2126_v33 = vadd.f32 %v2125_v53, %v2124_v42  ;;  %2820 = vst [vmem:[%s3881_s26 + $0x44] sm:$0x1] %v2290_v60 }
 0x179   : > { %v2097_v57 = vadd.f32 %v2096_v36, %v2095_v43  ;;  %v2127_v54 = vrot.slane %v2126_v33, 1 }
 0x17b   : > { %2099 = vst.msk [vmem:[%s398_s15] sm:$0x1] %vm2098_vm11, %v2097_v57  ;;  %v2128_v9 = vadd.f32 %v2127_v54, %v2126_v33 }
 0x17d   : > { %2129 = vst.msk [vmem:[%s404_s19] sm:$0x1] %vm2098_vm11, %v2128_v9 }
 0x17e PF: > { %s19_s29 = sadd.s32 1, %s2927_s29   ;;  %s4159_s27 = smov %s2923_s28 }
 0x17f   : > { %p16_p5 = scmp.ge.s32.totalorder %s19_s29, 4   ;;  %s4160_s28 = smov %s4162_s30 }
 0x181   :  { %18 = sbr.rel (!%p16_p5) target bundleno = 2 (0x2), region = 130 }

</bundles_post_ra>
